<compile_context>
chip_gen: v6e
topology: v6e:2x2x1
jax: 0.10.0
libtpu: 0.0.40
codegen_flags: <defaults>
</compile_context>

<pallas_src>
import math

import jax
import jax.numpy as jnp
import numpy as np
from jax.experimental import pallas as pl

# ---------------- small synthetic BERT config ----------------
VOCAB = 100
MAX_POS = 32
NUM_TYPES = 2
BATCH = 2
SEQ = 8
HIDDEN = 32
NUM_HEADS = 4
HEAD_DIM = HIDDEN // NUM_HEADS
INTERMEDIATE = 64
NUM_LAYERS = 2
NUM_DISEASES = 5

HP = 128            # lane-padded hidden width (output lane dim of every weight)
IP = 128            # lane-padded intermediate width
BS = BATCH * SEQ    # flattened (batch*seq) rows
K_PAD = 128         # lane-padded class dim (classifier output / probs store)
K_SUB = 8           # lane width of the sparsemax pairwise tensor (classes 0:5 live here)
NEG = -1e9          # additive-mask / padded-logit value (never enters sparsemax support)


# ---------------- fused whole-model kernel ----------------
def _fused_kernel(x_ref, bias_ref, embg_ref, embb_ref,
                  wqkv_ref, bqkv_ref, wo_ref, bo_ref,
                  ln1g_ref, ln1b_ref, w1_ref, b1_ref, w2_ref, b2_ref,
                  ln2g_ref, ln2b_ref, clsw_ref, clsb_ref,
                  probs_ref):
    # per-head lane masks over the true 32 hidden lanes (built in-kernel, static)
    lane = jax.lax.broadcasted_iota(jnp.int32, (1, HIDDEN), 1)
    head_masks = [((lane >= h * HEAD_DIM) & (lane < (h + 1) * HEAD_DIM)).astype(jnp.float32)
                  for h in range(NUM_HEADS)]

    def ln(x, g, b, eps=1e-12):
        # padded lanes of x are exactly zero and gamma/beta are zero in the pad -> no masks;
        # one-pass moments so the two cross-lane reductions are independent (review #9).
        mean = jnp.sum(x, axis=-1, keepdims=True) * (1.0 / HIDDEN)
        m2 = jnp.sum(x * x, axis=-1, keepdims=True) * (1.0 / HIDDEN)
        var = jnp.maximum(m2 - mean * mean, 0.0)
        return (x - mean) * jax.lax.rsqrt(var + eps) * g + b

    def mm(a, w_bf16):
        # bf16 MXU feed, f32 accumulate (review #2); weights already bf16.
        return jnp.dot(a.astype(jnp.bfloat16), w_bf16, preferred_element_type=jnp.float32)

    nt_dims = (((1,), (1,)), ((), ()))                       # contract last dims (q . k^T)

    bias = bias_ref[...]                                     # (BS, BS) additive attn bias
    x = ln(x_ref[...].astype(jnp.float32), embg_ref[...], embb_ref[...])   # embedding LN

    for l in range(NUM_LAYERS):                              # static layer loop
        # packed QKV projection: one (BS,32) @ (32,128) matmul -> Q|K|V|0 lanes (review #1/#5)
        qkv = mm(x[:, :HIDDEN], wqkv_ref[l]) + bqkv_ref[l]   # (BS, HP)
        q = qkv[:, 0:HIDDEN]                                 # 1/sqrt(hd) folded into Wq
        k = qkv[:, HIDDEN:2 * HIDDEN]                        # loop-invariant across heads (#4)
        v = qkv[:, 2 * HIDDEN:3 * HIDDEN]

        ctx = jnp.zeros((BS, HIDDEN), jnp.float32)
        for hm in head_masks:                                # static head loop
            # per-head scores: mask Q (not K); bias blocks cross-batch rows + padded keys
            s = jax.lax.dot_general(q * hm, k, nt_dims,
                                    preferred_element_type=jnp.float32) + bias   # (BS, BS)
            m = jnp.max(s, axis=-1, keepdims=True)
            p = jnp.exp(s - m)
            p = p * pl.reciprocal(jnp.sum(p, axis=-1, keepdims=True), approx=True)
            ctx = ctx + jnp.dot(p, v * hm, preferred_element_type=jnp.float32)   # head lanes

        attn = mm(ctx, wo_ref[l]) + bo_ref[l]                # (BS, HP), pad lanes stay 0
        h1 = ln(x + attn, ln1g_ref[l], ln1b_ref[l])

        ff = mm(h1[:, :HIDDEN], w1_ref[l]) + b1_ref[l]       # (BS, IP)
        ff = jax.nn.gelu(ff[:, :INTERMEDIATE])               # TODO(synk): HF BERT uses exact erf-GELU (this is the tanh approximation)
        ff = mm(ff, w2_ref[l]) + b2_ref[l]                   # (BS, HP)
        x = ln(h1 + ff, ln2g_ref[l], ln2b_ref[l])

    # ---- classifier + sparsemax on ALL rows (caller slices the CLS rows) (review #3) ----
    # padded class columns have weight 0 and bias -1e9 -> logits exactly -1e9, never in support
    z = mm(x[:, :HIDDEN], clsw_ref[...]) + clsb_ref[...]     # (BS, K_PAD)
    zsub = z[:, :K_SUB]                                      # (BS, 8): all true classes here
    zj = zsub[:, None, :]                                    # (BS, 1, 8)
    zi = zsub[:, :, None]                                    # (BS, 8, 1)
    ge = (zj >= zi).astype(jnp.float32)                      # (BS, 8, 8)
    kcnt = jnp.sum(ge, axis=-1)                              # descending rank of each element
    ssum = jnp.sum(ge * zj, axis=-1)                         # cumulative sum at that rank
    support = ((1.0 + kcnt * zsub) > ssum).astype(jnp.float32)
    ksup = jnp.sum(support, axis=-1, keepdims=True)          # >= 1 always
    ssup = jnp.sum(support * zsub, axis=-1, keepdims=True)
    tau = (ssup - 1.0) / ksup                                # exact divide: rows sum to 1
    probs_ref[...] = jnp.maximum(z - tau, 0.0)               # lane-dense (BS, K_PAD) store


def fused_forward(params, x0, bias):
    st = params['layers']
    args = (x0, bias, params['emb_ln_g'], params['emb_ln_b'],
            st['wqkv'], st['bqkv'], st['wo'], st['bo'],
            st['ln1_g'], st['ln1_b'], st['w1'], st['b1'],
            st['w2'], st['b2'], st['ln2_g'], st['ln2_b'],
            params['cls_w'], params['cls_b'])

    flops = (NUM_LAYERS * (2 * BS * HIDDEN * HP                    # packed qkv
                           + NUM_HEADS * 2 * BS * BS * HIDDEN      # scores
                           + NUM_HEADS * 2 * BS * BS * HIDDEN      # p @ v
                           + 2 * BS * HIDDEN * HP                  # wo
                           + 2 * BS * HIDDEN * IP                  # w1
                           + 2 * BS * INTERMEDIATE * HP)           # w2
             + 2 * BS * HIDDEN * K_PAD)                            # classifier
    transcendentals = (NUM_LAYERS * NUM_HEADS * BS * BS            # exp
                       + NUM_LAYERS * BS * INTERMEDIATE            # gelu tanh
                       + (1 + 2 * NUM_LAYERS) * BS)                # rsqrt
    bytes_accessed = int(sum(int(a.size) * a.dtype.itemsize for a in args)
                         + BS * K_PAD * 4)

    return pl.pallas_call(
        _fused_kernel,
        out_shape=jax.ShapeDtypeStruct((BS, K_PAD), jnp.float32),
        cost_estimate=pl.CostEstimate(flops=flops,
                                      transcendentals=transcendentals,
                                      bytes_accessed=bytes_accessed),
    )(*args)


# ---------------- parameter init (deterministic, synthetic, pre-padded) ----------------
def init_params(key):
    keys = jax.random.split(key, 4 + NUM_LAYERS)

    def nrm(k, shape):
        return jax.random.normal(k, shape, jnp.float32) * 0.02

    def pad_lane(a, width):
        return jnp.zeros(a.shape[:-1] + (width,), a.dtype).at[..., :a.shape[-1]].set(a)

    ones_h = jnp.zeros((1, HP), jnp.float32).at[:, :HIDDEN].set(1.0)

    params = {
        'word_emb': pad_lane(nrm(keys[0], (VOCAB, HIDDEN)), HP),
        'pos_emb': pad_lane(nrm(keys[1], (MAX_POS, HIDDEN)), HP),
        'type_emb': pad_lane(nrm(keys[2], (NUM_TYPES, HIDDEN)), HP),
        'emb_ln_g': ones_h,
        'emb_ln_b': jnp.zeros((1, HP), jnp.float32),
    }

    scale = HEAD_DIM ** -0.5
    layers = []
    for l in range(NUM_LAYERS):
        lk = jax.random.split(keys[3 + l], 6)
        wq = nrm(lk[0], (HIDDEN, HIDDEN)) * scale            # fold 1/sqrt(head_dim) into Wq
        wk = nrm(lk[1], (HIDDEN, HIDDEN))
        wv = nrm(lk[2], (HIDDEN, HIDDEN))
        # packed (HIDDEN, 128) QKV weight: Q|K|V in lanes 0:32|32:64|64:96, rest zero
        wqkv = jnp.zeros((HIDDEN, HP), jnp.float32)
        wqkv = wqkv.at[:, 0:HIDDEN].set(wq)
        wqkv = wqkv.at[:, HIDDEN:2 * HIDDEN].set(wk)
        wqkv = wqkv.at[:, 2 * HIDDEN:3 * HIDDEN].set(wv)
        wo = jnp.zeros((HIDDEN, HP), jnp.float32).at[:, :HIDDEN].set(
            nrm(lk[3], (HIDDEN, HIDDEN)))
        w1 = jnp.zeros((HIDDEN, IP), jnp.float32).at[:, :INTERMEDIATE].set(
            nrm(lk[4], (HIDDEN, INTERMEDIATE)))
        w2 = jnp.zeros((INTERMEDIATE, HP), jnp.float32).at[:, :HIDDEN].set(
            nrm(lk[5], (INTERMEDIATE, HIDDEN)))
        layers.append(dict(
            wqkv=wqkv.astype(jnp.bfloat16), bqkv=jnp.zeros((1, HP), jnp.float32),
            wo=wo.astype(jnp.bfloat16), bo=jnp.zeros((1, HP), jnp.float32),
            ln1_g=ones_h, ln1_b=jnp.zeros((1, HP), jnp.float32),
            w1=w1.astype(jnp.bfloat16), b1=jnp.zeros((1, IP), jnp.float32),
            w2=w2.astype(jnp.bfloat16), b2=jnp.zeros((1, HP), jnp.float32),
            ln2_g=ones_h, ln2_b=jnp.zeros((1, HP), jnp.float32),
        ))
    params['layers'] = {k: jnp.stack([ly[k] for ly in layers], axis=0) for k in layers[0]}

    # classifier: nn.Linear(hidden, num_diseases), xavier_uniform_ weight, zero bias
    limit = math.sqrt(6.0 / (HIDDEN + NUM_DISEASES))
    cw = jax.random.uniform(keys[3 + NUM_LAYERS], (NUM_DISEASES, HIDDEN),
                            jnp.float32, -limit, limit)
    params['cls_w'] = (jnp.zeros((HIDDEN, K_PAD), jnp.float32)
                       .at[:, :NUM_DISEASES].set(cw.T)).astype(jnp.bfloat16)
    params['cls_b'] = jnp.full((1, K_PAD), NEG, jnp.float32).at[:, :NUM_DISEASES].set(0.0)
    return params


# ---------------- forward pass (mirrors BertForDiseasePrediction.forward) ----------------
def bert_for_disease_prediction(params, input_ids, attention_mask=None,
                                token_type_ids=None, labels=None):
    B, S = input_ids.shape
    if attention_mask is None:
        attention_mask = jnp.ones((B, S), jnp.int32)
    if token_type_ids is None:
        token_type_ids = jnp.zeros((B, S), jnp.int32)

    # embedding gathers are glue; everything downstream runs in ONE fused Pallas kernel
    emb = (params['word_emb'][input_ids]
           + params['pos_emb'][:S][None, :, :]
           + params['type_emb'][token_type_ids])                    # (B, S, HP), pad lanes = 0
    x0 = emb.reshape(B * S, HP).astype(jnp.bfloat16)                # bf16 MXU feed (review #2)

    # additive attention bias: block-diagonal over batch rows + key-padding mask
    row_b = jnp.arange(B * S) // S
    same = row_b[:, None] == row_b[None, :]
    key_bias = (attention_mask.astype(jnp.float32).reshape(-1) - 1.0) * 1e9
    bias = jnp.where(same, key_bias[None, :], NEG).astype(jnp.float32)   # (B*S, B*S)

    probs_pad = fused_forward(params, x0, bias)                     # (B*S, K_PAD)
    probs = probs_pad[0::S, :NUM_DISEASES]                          # CLS rows, true classes

    loss = None
    if labels is not None:
        loss = jnp.mean((probs - labels) ** 2)                      # nn.MSELoss (scalar glue)
    return {'loss': loss, 'probs': probs}


# ---------------- pure-JAX reference (same packed params, f32 math) ----------------
def reference_forward(params, input_ids, attention_mask, token_type_ids):
    B, S = input_ids.shape
    st = params['layers']

    def ln(x, g, b, eps=1e-12):
        mu = jnp.mean(x, axis=-1, keepdims=True)
        var = jnp.mean((x - mu) ** 2, axis=-1, keepdims=True)
        return (x - mu) * jax.lax.rsqrt(var + eps) * g + b

    emb = (params['word_emb'][input_ids] + params['pos_emb'][:S][None]
           + params['type_emb'][token_type_ids])[..., :HIDDEN]      # (B, S, 32)
    x = ln(emb, params['emb_ln_g'][0, :HIDDEN], params['emb_ln_b'][0, :HIDDEN])
    kbias = (attention_mask.astype(jnp.float32) - 1.0) * 1e9        # (B, S)

    for l in range(NUM_LAYERS):
        wqkv = st['wqkv'][l].astype(jnp.float32)
        qkv = jnp.einsum('bsd,de->bse', x, wqkv) + st['bqkv'][l][0]
        q = qkv[..., 0:HIDDEN].reshape(B, S, NUM_HEADS, HEAD_DIM)   # scale already in Wq
        k = qkv[..., HIDDEN:2 * HIDDEN].reshape(B, S, NUM_HEADS, HEAD_DIM)
        v = qkv[..., 2 * HIDDEN:3 * HIDDEN].reshape(B, S, NUM_HEADS, HEAD_DIM)
        s = jnp.einsum('bqhd,bkhd->bhqk', q, k) + kbias[:, None, None, :]
        p = jax.nn.softmax(s, axis=-1)
        ctx = jnp.einsum('bhqk,bkhd->bqhd', p, v).reshape(B, S, HIDDEN)
        attn = ctx @ st['wo'][l].astype(jnp.float32)[:, :HIDDEN] + st['bo'][l][0, :HIDDEN]
        h1 = ln(x + attn, st['ln1_g'][l][0, :HIDDEN], st['ln1_b'][l][0, :HIDDEN])
        ff = jax.nn.gelu(h1 @ st['w1'][l].astype(jnp.float32)[:, :INTERMEDIATE]
                         + st['b1'][l][0, :INTERMEDIATE])
        ff = ff @ st['w2'][l].astype(jnp.float32)[:, :HIDDEN] + st['b2'][l][0, :HIDDEN]
        x = ln(h1 + ff, st['ln2_g'][l][0, :HIDDEN], st['ln2_b'][l][0, :HIDDEN])

    cls = x[:, 0, :]
    z = (cls @ params['cls_w'].astype(jnp.float32)[:, :NUM_DISEASES]
         + params['cls_b'][0, :NUM_DISEASES])
    # exact sort-based sparsemax
    zs = jnp.sort(z, axis=-1)[:, ::-1]
    kk = jnp.arange(1, NUM_DISEASES + 1, dtype=jnp.float32)
    css = jnp.cumsum(zs, axis=-1)
    ksup = jnp.sum((1.0 + kk * zs > css).astype(jnp.int32), axis=-1, keepdims=True)
    tau = (jnp.take_along_axis(css, ksup - 1, axis=-1) - 1.0) / ksup.astype(jnp.float32)
    return jnp.maximum(z - tau, 0.0)


if __name__ == "__main__":
    key = jax.random.PRNGKey(0)
    pkey, ikey, lkey = jax.random.split(key, 3)
    params = init_params(pkey)

    input_ids = jax.random.randint(ikey, (BATCH, SEQ), 0, VOCAB, dtype=jnp.int32)
    attention_mask = jnp.ones((BATCH, SEQ), jnp.int32).at[1, SEQ - 2:].set(0)
    token_type_ids = jnp.zeros((BATCH, SEQ), jnp.int32)
    labels = jax.nn.softmax(
        jax.random.normal(lkey, (BATCH, NUM_DISEASES), jnp.float32), axis=-1)

    out = bert_for_disease_prediction(params, input_ids, attention_mask,
                                      token_type_ids, labels)
    probs = np.asarray(jax.block_until_ready(out['probs']))
    loss = float(jax.block_until_ready(out['loss']))

    probs_ref = np.asarray(reference_forward(params, input_ids, attention_mask,
                                             token_type_ids))

    assert probs.shape == (BATCH, NUM_DISEASES)
    assert np.all(np.isfinite(probs)) and np.isfinite(loss)
    # sparsemax rows must sum to 1 (exact divide in-kernel)
    assert np.allclose(probs.sum(axis=-1), 1.0, atol=2e-3)
    # kernel must match the pure-JAX reference (bf16 matmul feeds + approx softmax recip)
    assert np.allclose(probs, probs_ref, atol=5e-2)
    print("KERNEL_OK")
</pallas_src>

<mosaic_0001>
module attributes {stable_mosaic.version = 11 : i64} {
  func.func @_fused_kernel(%arg0: memref<16x128xbf16, #tpu.memory_space<vmem>>, %arg1: memref<16x16xf32, #tpu.memory_space<vmem>>, %arg2: memref<1x128xf32, #tpu.memory_space<vmem>>, %arg3: memref<1x128xf32, #tpu.memory_space<vmem>>, %arg4: memref<2x32x128xbf16, #tpu.memory_space<vmem>>, %arg5: memref<2x1x128xf32, #tpu.memory_space<vmem>>, %arg6: memref<2x32x128xbf16, #tpu.memory_space<vmem>>, %arg7: memref<2x1x128xf32, #tpu.memory_space<vmem>>, %arg8: memref<2x1x128xf32, #tpu.memory_space<vmem>>, %arg9: memref<2x1x128xf32, #tpu.memory_space<vmem>>, %arg10: memref<2x32x128xbf16, #tpu.memory_space<vmem>>, %arg11: memref<2x1x128xf32, #tpu.memory_space<vmem>>, %arg12: memref<2x64x128xbf16, #tpu.memory_space<vmem>>, %arg13: memref<2x1x128xf32, #tpu.memory_space<vmem>>, %arg14: memref<2x1x128xf32, #tpu.memory_space<vmem>>, %arg15: memref<2x1x128xf32, #tpu.memory_space<vmem>>, %arg16: memref<32x128xbf16, #tpu.memory_space<vmem>>, %arg17: memref<1x128xf32, #tpu.memory_space<vmem>>, %arg18: memref<16x128xf32, #tpu.memory_space<vmem>>) attributes {dimension_semantics = [], scalar_prefetch = 0 : i64, scratch_operands = 0 : i64, tpu.core_type = #tpu.core_type<tc>} {
    %0 = tpu.iota {dimensions = array<i32: 1>} : vector<1x32xi32>
    %c0_i32 = arith.constant 0 : i32
    %1 = vector.broadcast %c0_i32 : i32 to vector<1x32xi32>
    %2 = arith.cmpi sge, %0, %1 : vector<1x32xi32>
    %c8_i32 = arith.constant 8 : i32
    %3 = vector.broadcast %c8_i32 : i32 to vector<1x32xi32>
    %4 = arith.cmpi slt, %0, %3 : vector<1x32xi32>
    %5 = arith.andi %2, %4 : vector<1x32xi1>
    %6 = arith.extui %5 : vector<1x32xi1> to vector<1x32xi32>
    %7 = arith.sitofp %6 : vector<1x32xi32> to vector<1x32xf32>
    %c8_i32_0 = arith.constant 8 : i32
    %8 = vector.broadcast %c8_i32_0 : i32 to vector<1x32xi32>
    %9 = arith.cmpi sge, %0, %8 : vector<1x32xi32>
    %c16_i32 = arith.constant 16 : i32
    %10 = vector.broadcast %c16_i32 : i32 to vector<1x32xi32>
    %11 = arith.cmpi slt, %0, %10 : vector<1x32xi32>
    %12 = arith.andi %9, %11 : vector<1x32xi1>
    %13 = arith.extui %12 : vector<1x32xi1> to vector<1x32xi32>
    %14 = arith.sitofp %13 : vector<1x32xi32> to vector<1x32xf32>
    %c16_i32_1 = arith.constant 16 : i32
    %15 = vector.broadcast %c16_i32_1 : i32 to vector<1x32xi32>
    %16 = arith.cmpi sge, %0, %15 : vector<1x32xi32>
    %c24_i32 = arith.constant 24 : i32
    %17 = vector.broadcast %c24_i32 : i32 to vector<1x32xi32>
    %18 = arith.cmpi slt, %0, %17 : vector<1x32xi32>
    %19 = arith.andi %16, %18 : vector<1x32xi1>
    %20 = arith.extui %19 : vector<1x32xi1> to vector<1x32xi32>
    %21 = arith.sitofp %20 : vector<1x32xi32> to vector<1x32xf32>
    %c24_i32_2 = arith.constant 24 : i32
    %22 = vector.broadcast %c24_i32_2 : i32 to vector<1x32xi32>
    %23 = arith.cmpi sge, %0, %22 : vector<1x32xi32>
    %c32_i32 = arith.constant 32 : i32
    %24 = vector.broadcast %c32_i32 : i32 to vector<1x32xi32>
    %25 = arith.cmpi slt, %0, %24 : vector<1x32xi32>
    %26 = arith.andi %23, %25 : vector<1x32xi1>
    %27 = arith.extui %26 : vector<1x32xi1> to vector<1x32xi32>
    %28 = arith.sitofp %27 : vector<1x32xi32> to vector<1x32xf32>
    %c0 = arith.constant 0 : index
    %c0_3 = arith.constant 0 : index
    %29 = vector.load %arg1[%c0, %c0_3] : memref<16x16xf32, #tpu.memory_space<vmem>>, vector<16x16xf32>
    %c0_4 = arith.constant 0 : index
    %c0_5 = arith.constant 0 : index
    %30 = vector.load %arg0[%c0_4, %c0_5] : memref<16x128xbf16, #tpu.memory_space<vmem>>, vector<16x128xbf16>
    %31 = arith.extf %30 : vector<16x128xbf16> to vector<16x128xf32>
    %c0_6 = arith.constant 0 : index
    %c0_7 = arith.constant 0 : index
    %32 = vector.load %arg2[%c0_6, %c0_7] : memref<1x128xf32, #tpu.memory_space<vmem>>, vector<1x128xf32>
    %c0_8 = arith.constant 0 : index
    %c0_9 = arith.constant 0 : index
    %33 = vector.load %arg3[%c0_8, %c0_9] : memref<1x128xf32, #tpu.memory_space<vmem>>, vector<1x128xf32>
    %cst = arith.constant dense<0.000000e+00> : vector<16xf32>
    %34 = vector.multi_reduction <add>, %31, %cst [1] : vector<16x128xf32> to vector<16xf32>
    %35 = vector.shape_cast %34 : vector<16xf32> to vector<16x1xf32>
    %cst_10 = arith.constant 3.125000e-02 : f32
    %36 = vector.broadcast %cst_10 : f32 to vector<16x1xf32>
    %37 = arith.mulf %35, %36 : vector<16x1xf32>
    %38 = arith.mulf %31, %31 : vector<16x128xf32>
    %cst_11 = arith.constant dense<0.000000e+00> : vector<16xf32>
    %39 = vector.multi_reduction <add>, %38, %cst_11 [1] : vector<16x128xf32> to vector<16xf32>
    %40 = vector.shape_cast %39 : vector<16xf32> to vector<16x1xf32>
    %cst_12 = arith.constant 3.125000e-02 : f32
    %41 = vector.broadcast %cst_12 : f32 to vector<16x1xf32>
    %42 = arith.mulf %40, %41 : vector<16x1xf32>
    %43 = arith.mulf %37, %37 : vector<16x1xf32>
    %44 = arith.subf %42, %43 : vector<16x1xf32>
    %cst_13 = arith.constant 0.000000e+00 : f32
    %45 = vector.broadcast %cst_13 : f32 to vector<16x1xf32>
    %46 = arith.maximumf %44, %45 : vector<16x1xf32>
    %47 = vector.broadcast %37 : vector<16x1xf32> to vector<16x128xf32>
    %48 = arith.subf %31, %47 : vector<16x128xf32>
    %cst_14 = arith.constant 9.99999996E-13 : f32
    %49 = vector.broadcast %cst_14 : f32 to vector<16x1xf32>
    %50 = arith.addf %46, %49 : vector<16x1xf32>
    %51 = math.rsqrt %50 : vector<16x1xf32>
    %52 = vector.broadcast %51 : vector<16x1xf32> to vector<16x128xf32>
    %53 = arith.mulf %48, %52 : vector<16x128xf32>
    %54 = vector.broadcast %32 : vector<1x128xf32> to vector<16x128xf32>
    %55 = arith.mulf %53, %54 : vector<16x128xf32>
    %56 = vector.broadcast %33 : vector<1x128xf32> to vector<16x128xf32>
    %57 = arith.addf %55, %56 : vector<16x128xf32>
    %58 = vector.extract_strided_slice %57 {offsets = [0, 0], sizes = [16, 32], strides = [1, 1]} : vector<16x128xf32> to vector<16x32xf32>
    %c0_15 = arith.constant 0 : index
    %c0_16 = arith.constant 0 : index
    %c0_17 = arith.constant 0 : index
    %59 = vector.load %arg4[%c0_15, %c0_16, %c0_17] : memref<2x32x128xbf16, #tpu.memory_space<vmem>>, vector<1x32x128xbf16>
    %60 = vector.shape_cast %59 : vector<1x32x128xbf16> to vector<32x128xbf16>
    %61 = arith.truncf %58 : vector<16x32xf32> to vector<16x32xbf16>
    %cst_18 = arith.constant dense<0.000000e+00> : vector<16x128xf32>
    %62 = tpu.matmul %61, %60, %cst_18 {dimension_numbers = #tpu.dot_dimension_numbers<[1], [0], [0], [1], [0, 0, 1, 1], [], []>} : vector<16x32xbf16>, vector<32x128xbf16>, vector<16x128xf32> -> vector<16x128xf32>
    %c0_19 = arith.constant 0 : index
    %c0_20 = arith.constant 0 : index
    %c0_21 = arith.constant 0 : index
    %63 = vector.load %arg5[%c0_19, %c0_20, %c0_21] : memref<2x1x128xf32, #tpu.memory_space<vmem>>, vector<1x1x128xf32>
    %64 = vector.shape_cast %63 : vector<1x1x128xf32> to vector<1x128xf32>
    %65 = vector.broadcast %64 : vector<1x128xf32> to vector<16x128xf32>
    %66 = arith.addf %62, %65 : vector<16x128xf32>
    %67 = vector.extract_strided_slice %66 {offsets = [0, 0], sizes = [16, 32], strides = [1, 1]} : vector<16x128xf32> to vector<16x32xf32>
    %68 = vector.extract_strided_slice %66 {offsets = [0, 32], sizes = [16, 32], strides = [1, 1]} : vector<16x128xf32> to vector<16x32xf32>
    %69 = vector.extract_strided_slice %66 {offsets = [0, 64], sizes = [16, 32], strides = [1, 1]} : vector<16x128xf32> to vector<16x32xf32>
    %cst_22 = arith.constant 0.000000e+00 : f32
    %70 = vector.broadcast %cst_22 : f32 to vector<16x32xf32>
    %71 = vector.broadcast %7 : vector<1x32xf32> to vector<16x32xf32>
    %72 = arith.mulf %67, %71 : vector<16x32xf32>
    %cst_23 = arith.constant dense<0.000000e+00> : vector<16x16xf32>
    %73 = tpu.matmul %72, %68, %cst_23 {dimension_numbers = #tpu.dot_dimension_numbers<[1], [1], [0], [0], [0, 0, 1, 0], [], []>} : vector<16x32xf32>, vector<16x32xf32>, vector<16x16xf32> -> vector<16x16xf32>
    %74 = arith.addf %73, %29 : vector<16x16xf32>
    %cst_24 = arith.constant dense<0xFF800000> : vector<16xf32>
    %75 = vector.multi_reduction <maximumf>, %74, %cst_24 [1] : vector<16x16xf32> to vector<16xf32>
    %76 = vector.shape_cast %75 : vector<16xf32> to vector<16x1xf32>
    %77 = vector.broadcast %76 : vector<16x1xf32> to vector<16x16xf32>
    %78 = arith.subf %74, %77 : vector<16x16xf32>
    %79 = math.exp %78 : vector<16x16xf32>
    %cst_25 = arith.constant dense<0.000000e+00> : vector<16xf32>
    %80 = vector.multi_reduction <add>, %79, %cst_25 [1] : vector<16x16xf32> to vector<16xf32>
    %81 = vector.shape_cast %80 : vector<16xf32> to vector<16x1xf32>
    %82 = tpu.reciprocal %81 {approx = true} : vector<16x1xf32> -> vector<16x1xf32>
    %83 = vector.broadcast %82 : vector<16x1xf32> to vector<16x16xf32>
    %84 = arith.mulf %79, %83 : vector<16x16xf32>
    %85 = vector.broadcast %7 : vector<1x32xf32> to vector<16x32xf32>
    %86 = arith.mulf %69, %85 : vector<16x32xf32>
    %cst_26 = arith.constant dense<0.000000e+00> : vector<16x32xf32>
    %87 = tpu.matmul %84, %86, %cst_26 {dimension_numbers = #tpu.dot_dimension_numbers<[1], [0], [0], [1], [0, 0, 1, 1], [], []>} : vector<16x16xf32>, vector<16x32xf32>, vector<16x32xf32> -> vector<16x32xf32>
    %88 = arith.addf %70, %87 : vector<16x32xf32>
    %89 = vector.broadcast %14 : vector<1x32xf32> to vector<16x32xf32>
    %90 = arith.mulf %67, %89 : vector<16x32xf32>
    %cst_27 = arith.constant dense<0.000000e+00> : vector<16x16xf32>
    %91 = tpu.matmul %90, %68, %cst_27 {dimension_numbers = #tpu.dot_dimension_numbers<[1], [1], [0], [0], [0, 0, 1, 0], [], []>} : vector<16x32xf32>, vector<16x32xf32>, vector<16x16xf32> -> vector<16x16xf32>
    %92 = arith.addf %91, %29 : vector<16x16xf32>
    %cst_28 = arith.constant dense<0xFF800000> : vector<16xf32>
    %93 = vector.multi_reduction <maximumf>, %92, %cst_28 [1] : vector<16x16xf32> to vector<16xf32>
    %94 = vector.shape_cast %93 : vector<16xf32> to vector<16x1xf32>
    %95 = vector.broadcast %94 : vector<16x1xf32> to vector<16x16xf32>
    %96 = arith.subf %92, %95 : vector<16x16xf32>
    %97 = math.exp %96 : vector<16x16xf32>
    %cst_29 = arith.constant dense<0.000000e+00> : vector<16xf32>
    %98 = vector.multi_reduction <add>, %97, %cst_29 [1] : vector<16x16xf32> to vector<16xf32>
    %99 = vector.shape_cast %98 : vector<16xf32> to vector<16x1xf32>
    %100 = tpu.reciprocal %99 {approx = true} : vector<16x1xf32> -> vector<16x1xf32>
    %101 = vector.broadcast %100 : vector<16x1xf32> to vector<16x16xf32>
    %102 = arith.mulf %97, %101 : vector<16x16xf32>
    %103 = vector.broadcast %14 : vector<1x32xf32> to vector<16x32xf32>
    %104 = arith.mulf %69, %103 : vector<16x32xf32>
    %cst_30 = arith.constant dense<0.000000e+00> : vector<16x32xf32>
    %105 = tpu.matmul %102, %104, %cst_30 {dimension_numbers = #tpu.dot_dimension_numbers<[1], [0], [0], [1], [0, 0, 1, 1], [], []>} : vector<16x16xf32>, vector<16x32xf32>, vector<16x32xf32> -> vector<16x32xf32>
    %106 = arith.addf %88, %105 : vector<16x32xf32>
    %107 = vector.broadcast %21 : vector<1x32xf32> to vector<16x32xf32>
    %108 = arith.mulf %67, %107 : vector<16x32xf32>
    %cst_31 = arith.constant dense<0.000000e+00> : vector<16x16xf32>
    %109 = tpu.matmul %108, %68, %cst_31 {dimension_numbers = #tpu.dot_dimension_numbers<[1], [1], [0], [0], [0, 0, 1, 0], [], []>} : vector<16x32xf32>, vector<16x32xf32>, vector<16x16xf32> -> vector<16x16xf32>
    %110 = arith.addf %109, %29 : vector<16x16xf32>
    %cst_32 = arith.constant dense<0xFF800000> : vector<16xf32>
    %111 = vector.multi_reduction <maximumf>, %110, %cst_32 [1] : vector<16x16xf32> to vector<16xf32>
    %112 = vector.shape_cast %111 : vector<16xf32> to vector<16x1xf32>
    %113 = vector.broadcast %112 : vector<16x1xf32> to vector<16x16xf32>
    %114 = arith.subf %110, %113 : vector<16x16xf32>
    %115 = math.exp %114 : vector<16x16xf32>
    %cst_33 = arith.constant dense<0.000000e+00> : vector<16xf32>
    %116 = vector.multi_reduction <add>, %115, %cst_33 [1] : vector<16x16xf32> to vector<16xf32>
    %117 = vector.shape_cast %116 : vector<16xf32> to vector<16x1xf32>
    %118 = tpu.reciprocal %117 {approx = true} : vector<16x1xf32> -> vector<16x1xf32>
    %119 = vector.broadcast %118 : vector<16x1xf32> to vector<16x16xf32>
    %120 = arith.mulf %115, %119 : vector<16x16xf32>
    %121 = vector.broadcast %21 : vector<1x32xf32> to vector<16x32xf32>
    %122 = arith.mulf %69, %121 : vector<16x32xf32>
    %cst_34 = arith.constant dense<0.000000e+00> : vector<16x32xf32>
    %123 = tpu.matmul %120, %122, %cst_34 {dimension_numbers = #tpu.dot_dimension_numbers<[1], [0], [0], [1], [0, 0, 1, 1], [], []>} : vector<16x16xf32>, vector<16x32xf32>, vector<16x32xf32> -> vector<16x32xf32>
    %124 = arith.addf %106, %123 : vector<16x32xf32>
    %125 = vector.broadcast %28 : vector<1x32xf32> to vector<16x32xf32>
    %126 = arith.mulf %67, %125 : vector<16x32xf32>
    %cst_35 = arith.constant dense<0.000000e+00> : vector<16x16xf32>
    %127 = tpu.matmul %126, %68, %cst_35 {dimension_numbers = #tpu.dot_dimension_numbers<[1], [1], [0], [0], [0, 0, 1, 0], [], []>} : vector<16x32xf32>, vector<16x32xf32>, vector<16x16xf32> -> vector<16x16xf32>
    %128 = arith.addf %127, %29 : vector<16x16xf32>
    %cst_36 = arith.constant dense<0xFF800000> : vector<16xf32>
    %129 = vector.multi_reduction <maximumf>, %128, %cst_36 [1] : vector<16x16xf32> to vector<16xf32>
    %130 = vector.shape_cast %129 : vector<16xf32> to vector<16x1xf32>
    %131 = vector.broadcast %130 : vector<16x1xf32> to vector<16x16xf32>
    %132 = arith.subf %128, %131 : vector<16x16xf32>
    %133 = math.exp %132 : vector<16x16xf32>
    %cst_37 = arith.constant dense<0.000000e+00> : vector<16xf32>
    %134 = vector.multi_reduction <add>, %133, %cst_37 [1] : vector<16x16xf32> to vector<16xf32>
    %135 = vector.shape_cast %134 : vector<16xf32> to vector<16x1xf32>
    %136 = tpu.reciprocal %135 {approx = true} : vector<16x1xf32> -> vector<16x1xf32>
    %137 = vector.broadcast %136 : vector<16x1xf32> to vector<16x16xf32>
    %138 = arith.mulf %133, %137 : vector<16x16xf32>
    %139 = vector.broadcast %28 : vector<1x32xf32> to vector<16x32xf32>
    %140 = arith.mulf %69, %139 : vector<16x32xf32>
    %cst_38 = arith.constant dense<0.000000e+00> : vector<16x32xf32>
    %141 = tpu.matmul %138, %140, %cst_38 {dimension_numbers = #tpu.dot_dimension_numbers<[1], [0], [0], [1], [0, 0, 1, 1], [], []>} : vector<16x16xf32>, vector<16x32xf32>, vector<16x32xf32> -> vector<16x32xf32>
    %142 = arith.addf %124, %141 : vector<16x32xf32>
    %c0_39 = arith.constant 0 : index
    %c0_40 = arith.constant 0 : index
    %c0_41 = arith.constant 0 : index
    %143 = vector.load %arg6[%c0_39, %c0_40, %c0_41] : memref<2x32x128xbf16, #tpu.memory_space<vmem>>, vector<1x32x128xbf16>
    %144 = vector.shape_cast %143 : vector<1x32x128xbf16> to vector<32x128xbf16>
    %145 = arith.truncf %142 : vector<16x32xf32> to vector<16x32xbf16>
    %cst_42 = arith.constant dense<0.000000e+00> : vector<16x128xf32>
    %146 = tpu.matmul %145, %144, %cst_42 {dimension_numbers = #tpu.dot_dimension_numbers<[1], [0], [0], [1], [0, 0, 1, 1], [], []>} : vector<16x32xbf16>, vector<32x128xbf16>, vector<16x128xf32> -> vector<16x128xf32>
    %c0_43 = arith.constant 0 : index
    %c0_44 = arith.constant 0 : index
    %c0_45 = arith.constant 0 : index
    %147 = vector.load %arg7[%c0_43, %c0_44, %c0_45] : memref<2x1x128xf32, #tpu.memory_space<vmem>>, vector<1x1x128xf32>
    %148 = vector.shape_cast %147 : vector<1x1x128xf32> to vector<1x128xf32>
    %149 = vector.broadcast %148 : vector<1x128xf32> to vector<16x128xf32>
    %150 = arith.addf %146, %149 : vector<16x128xf32>
    %151 = arith.addf %57, %150 : vector<16x128xf32>
    %c0_46 = arith.constant 0 : index
    %c0_47 = arith.constant 0 : index
    %c0_48 = arith.constant 0 : index
    %152 = vector.load %arg8[%c0_46, %c0_47, %c0_48] : memref<2x1x128xf32, #tpu.memory_space<vmem>>, vector<1x1x128xf32>
    %153 = vector.shape_cast %152 : vector<1x1x128xf32> to vector<1x128xf32>
    %c0_49 = arith.constant 0 : index
    %c0_50 = arith.constant 0 : index
    %c0_51 = arith.constant 0 : index
    %154 = vector.load %arg9[%c0_49, %c0_50, %c0_51] : memref<2x1x128xf32, #tpu.memory_space<vmem>>, vector<1x1x128xf32>
    %155 = vector.shape_cast %154 : vector<1x1x128xf32> to vector<1x128xf32>
    %cst_52 = arith.constant dense<0.000000e+00> : vector<16xf32>
    %156 = vector.multi_reduction <add>, %151, %cst_52 [1] : vector<16x128xf32> to vector<16xf32>
    %157 = vector.shape_cast %156 : vector<16xf32> to vector<16x1xf32>
    %cst_53 = arith.constant 3.125000e-02 : f32
    %158 = vector.broadcast %cst_53 : f32 to vector<16x1xf32>
    %159 = arith.mulf %157, %158 : vector<16x1xf32>
    %160 = arith.mulf %151, %151 : vector<16x128xf32>
    %cst_54 = arith.constant dense<0.000000e+00> : vector<16xf32>
    %161 = vector.multi_reduction <add>, %160, %cst_54 [1] : vector<16x128xf32> to vector<16xf32>
    %162 = vector.shape_cast %161 : vector<16xf32> to vector<16x1xf32>
    %cst_55 = arith.constant 3.125000e-02 : f32
    %163 = vector.broadcast %cst_55 : f32 to vector<16x1xf32>
    %164 = arith.mulf %162, %163 : vector<16x1xf32>
    %165 = arith.mulf %159, %159 : vector<16x1xf32>
    %166 = arith.subf %164, %165 : vector<16x1xf32>
    %cst_56 = arith.constant 0.000000e+00 : f32
    %167 = vector.broadcast %cst_56 : f32 to vector<16x1xf32>
    %168 = arith.maximumf %166, %167 : vector<16x1xf32>
    %169 = vector.broadcast %159 : vector<16x1xf32> to vector<16x128xf32>
    %170 = arith.subf %151, %169 : vector<16x128xf32>
    %cst_57 = arith.constant 9.99999996E-13 : f32
    %171 = vector.broadcast %cst_57 : f32 to vector<16x1xf32>
    %172 = arith.addf %168, %171 : vector<16x1xf32>
    %173 = math.rsqrt %172 : vector<16x1xf32>
    %174 = vector.broadcast %173 : vector<16x1xf32> to vector<16x128xf32>
    %175 = arith.mulf %170, %174 : vector<16x128xf32>
    %176 = vector.broadcast %153 : vector<1x128xf32> to vector<16x128xf32>
    %177 = arith.mulf %175, %176 : vector<16x128xf32>
    %178 = vector.broadcast %155 : vector<1x128xf32> to vector<16x128xf32>
    %179 = arith.addf %177, %178 : vector<16x128xf32>
    %180 = vector.extract_strided_slice %179 {offsets = [0, 0], sizes = [16, 32], strides = [1, 1]} : vector<16x128xf32> to vector<16x32xf32>
    %c0_58 = arith.constant 0 : index
    %c0_59 = arith.constant 0 : index
    %c0_60 = arith.constant 0 : index
    %181 = vector.load %arg10[%c0_58, %c0_59, %c0_60] : memref<2x32x128xbf16, #tpu.memory_space<vmem>>, vector<1x32x128xbf16>
    %182 = vector.shape_cast %181 : vector<1x32x128xbf16> to vector<32x128xbf16>
    %183 = arith.truncf %180 : vector<16x32xf32> to vector<16x32xbf16>
    %cst_61 = arith.constant dense<0.000000e+00> : vector<16x128xf32>
    %184 = tpu.matmul %183, %182, %cst_61 {dimension_numbers = #tpu.dot_dimension_numbers<[1], [0], [0], [1], [0, 0, 1, 1], [], []>} : vector<16x32xbf16>, vector<32x128xbf16>, vector<16x128xf32> -> vector<16x128xf32>
    %c0_62 = arith.constant 0 : index
    %c0_63 = arith.constant 0 : index
    %c0_64 = arith.constant 0 : index
    %185 = vector.load %arg11[%c0_62, %c0_63, %c0_64] : memref<2x1x128xf32, #tpu.memory_space<vmem>>, vector<1x1x128xf32>
    %186 = vector.shape_cast %185 : vector<1x1x128xf32> to vector<1x128xf32>
    %187 = vector.broadcast %186 : vector<1x128xf32> to vector<16x128xf32>
    %188 = arith.addf %184, %187 : vector<16x128xf32>
    %189 = vector.extract_strided_slice %188 {offsets = [0, 0], sizes = [16, 64], strides = [1, 1]} : vector<16x128xf32> to vector<16x64xf32>
    %190 = arith.mulf %189, %189 : vector<16x64xf32>
    %191 = arith.mulf %189, %190 : vector<16x64xf32>
    %cst_65 = arith.constant 4.471500e-02 : f32
    %192 = vector.broadcast %cst_65 : f32 to vector<16x64xf32>
    %193 = arith.mulf %192, %191 : vector<16x64xf32>
    %194 = arith.addf %189, %193 : vector<16x64xf32>
    %cst_66 = arith.constant 0.797884583 : f32
    %195 = vector.broadcast %cst_66 : f32 to vector<16x64xf32>
    %196 = arith.mulf %195, %194 : vector<16x64xf32>
    %197 = math.tanh %196 : vector<16x64xf32>
    %cst_67 = arith.constant 1.000000e+00 : f32
    %198 = vector.broadcast %cst_67 : f32 to vector<16x64xf32>
    %199 = arith.addf %198, %197 : vector<16x64xf32>
    %cst_68 = arith.constant 5.000000e-01 : f32
    %200 = vector.broadcast %cst_68 : f32 to vector<16x64xf32>
    %201 = arith.mulf %200, %199 : vector<16x64xf32>
    %202 = arith.mulf %189, %201 : vector<16x64xf32>
    %c0_69 = arith.constant 0 : index
    %c0_70 = arith.constant 0 : index
    %c0_71 = arith.constant 0 : index
    %203 = vector.load %arg12[%c0_69, %c0_70, %c0_71] : memref<2x64x128xbf16, #tpu.memory_space<vmem>>, vector<1x64x128xbf16>
    %204 = vector.shape_cast %203 : vector<1x64x128xbf16> to vector<64x128xbf16>
    %205 = arith.truncf %202 : vector<16x64xf32> to vector<16x64xbf16>
    %cst_72 = arith.constant dense<0.000000e+00> : vector<16x128xf32>
    %206 = tpu.matmul %205, %204, %cst_72 {dimension_numbers = #tpu.dot_dimension_numbers<[1], [0], [0], [1], [0, 0, 1, 1], [], []>} : vector<16x64xbf16>, vector<64x128xbf16>, vector<16x128xf32> -> vector<16x128xf32>
    %c0_73 = arith.constant 0 : index
    %c0_74 = arith.constant 0 : index
    %c0_75 = arith.constant 0 : index
    %207 = vector.load %arg13[%c0_73, %c0_74, %c0_75] : memref<2x1x128xf32, #tpu.memory_space<vmem>>, vector<1x1x128xf32>
    %208 = vector.shape_cast %207 : vector<1x1x128xf32> to vector<1x128xf32>
    %209 = vector.broadcast %208 : vector<1x128xf32> to vector<16x128xf32>
    %210 = arith.addf %206, %209 : vector<16x128xf32>
    %211 = arith.addf %179, %210 : vector<16x128xf32>
    %c0_76 = arith.constant 0 : index
    %c0_77 = arith.constant 0 : index
    %c0_78 = arith.constant 0 : index
    %212 = vector.load %arg14[%c0_76, %c0_77, %c0_78] : memref<2x1x128xf32, #tpu.memory_space<vmem>>, vector<1x1x128xf32>
    %213 = vector.shape_cast %212 : vector<1x1x128xf32> to vector<1x128xf32>
    %c0_79 = arith.constant 0 : index
    %c0_80 = arith.constant 0 : index
    %c0_81 = arith.constant 0 : index
    %214 = vector.load %arg15[%c0_79, %c0_80, %c0_81] : memref<2x1x128xf32, #tpu.memory_space<vmem>>, vector<1x1x128xf32>
    %215 = vector.shape_cast %214 : vector<1x1x128xf32> to vector<1x128xf32>
    %cst_82 = arith.constant dense<0.000000e+00> : vector<16xf32>
    %216 = vector.multi_reduction <add>, %211, %cst_82 [1] : vector<16x128xf32> to vector<16xf32>
    %217 = vector.shape_cast %216 : vector<16xf32> to vector<16x1xf32>
    %cst_83 = arith.constant 3.125000e-02 : f32
    %218 = vector.broadcast %cst_83 : f32 to vector<16x1xf32>
    %219 = arith.mulf %217, %218 : vector<16x1xf32>
    %220 = arith.mulf %211, %211 : vector<16x128xf32>
    %cst_84 = arith.constant dense<0.000000e+00> : vector<16xf32>
    %221 = vector.multi_reduction <add>, %220, %cst_84 [1] : vector<16x128xf32> to vector<16xf32>
    %222 = vector.shape_cast %221 : vector<16xf32> to vector<16x1xf32>
    %cst_85 = arith.constant 3.125000e-02 : f32
    %223 = vector.broadcast %cst_85 : f32 to vector<16x1xf32>
    %224 = arith.mulf %222, %223 : vector<16x1xf32>
    %225 = arith.mulf %219, %219 : vector<16x1xf32>
    %226 = arith.subf %224, %225 : vector<16x1xf32>
    %cst_86 = arith.constant 0.000000e+00 : f32
    %227 = vector.broadcast %cst_86 : f32 to vector<16x1xf32>
    %228 = arith.maximumf %226, %227 : vector<16x1xf32>
    %229 = vector.broadcast %219 : vector<16x1xf32> to vector<16x128xf32>
    %230 = arith.subf %211, %229 : vector<16x128xf32>
    %cst_87 = arith.constant 9.99999996E-13 : f32
    %231 = vector.broadcast %cst_87 : f32 to vector<16x1xf32>
    %232 = arith.addf %228, %231 : vector<16x1xf32>
    %233 = math.rsqrt %232 : vector<16x1xf32>
    %234 = vector.broadcast %233 : vector<16x1xf32> to vector<16x128xf32>
    %235 = arith.mulf %230, %234 : vector<16x128xf32>
    %236 = vector.broadcast %213 : vector<1x128xf32> to vector<16x128xf32>
    %237 = arith.mulf %235, %236 : vector<16x128xf32>
    %238 = vector.broadcast %215 : vector<1x128xf32> to vector<16x128xf32>
    %239 = arith.addf %237, %238 : vector<16x128xf32>
    %240 = vector.extract_strided_slice %239 {offsets = [0, 0], sizes = [16, 32], strides = [1, 1]} : vector<16x128xf32> to vector<16x32xf32>
    %c1 = arith.constant 1 : index
    %c0_88 = arith.constant 0 : index
    %c0_89 = arith.constant 0 : index
    %241 = vector.load %arg4[%c1, %c0_88, %c0_89] : memref<2x32x128xbf16, #tpu.memory_space<vmem>>, vector<1x32x128xbf16>
    %242 = vector.shape_cast %241 : vector<1x32x128xbf16> to vector<32x128xbf16>
    %243 = arith.truncf %240 : vector<16x32xf32> to vector<16x32xbf16>
    %cst_90 = arith.constant dense<0.000000e+00> : vector<16x128xf32>
    %244 = tpu.matmul %243, %242, %cst_90 {dimension_numbers = #tpu.dot_dimension_numbers<[1], [0], [0], [1], [0, 0, 1, 1], [], []>} : vector<16x32xbf16>, vector<32x128xbf16>, vector<16x128xf32> -> vector<16x128xf32>
    %c1_91 = arith.constant 1 : index
    %c0_92 = arith.constant 0 : index
    %c0_93 = arith.constant 0 : index
    %245 = vector.load %arg5[%c1_91, %c0_92, %c0_93] : memref<2x1x128xf32, #tpu.memory_space<vmem>>, vector<1x1x128xf32>
    %246 = vector.shape_cast %245 : vector<1x1x128xf32> to vector<1x128xf32>
    %247 = vector.broadcast %246 : vector<1x128xf32> to vector<16x128xf32>
    %248 = arith.addf %244, %247 : vector<16x128xf32>
    %249 = vector.extract_strided_slice %248 {offsets = [0, 0], sizes = [16, 32], strides = [1, 1]} : vector<16x128xf32> to vector<16x32xf32>
    %250 = vector.extract_strided_slice %248 {offsets = [0, 32], sizes = [16, 32], strides = [1, 1]} : vector<16x128xf32> to vector<16x32xf32>
    %251 = vector.extract_strided_slice %248 {offsets = [0, 64], sizes = [16, 32], strides = [1, 1]} : vector<16x128xf32> to vector<16x32xf32>
    %cst_94 = arith.constant 0.000000e+00 : f32
    %252 = vector.broadcast %cst_94 : f32 to vector<16x32xf32>
    %253 = vector.broadcast %7 : vector<1x32xf32> to vector<16x32xf32>
    %254 = arith.mulf %249, %253 : vector<16x32xf32>
    %cst_95 = arith.constant dense<0.000000e+00> : vector<16x16xf32>
    %255 = tpu.matmul %254, %250, %cst_95 {dimension_numbers = #tpu.dot_dimension_numbers<[1], [1], [0], [0], [0, 0, 1, 0], [], []>} : vector<16x32xf32>, vector<16x32xf32>, vector<16x16xf32> -> vector<16x16xf32>
    %256 = arith.addf %255, %29 : vector<16x16xf32>
    %cst_96 = arith.constant dense<0xFF800000> : vector<16xf32>
    %257 = vector.multi_reduction <maximumf>, %256, %cst_96 [1] : vector<16x16xf32> to vector<16xf32>
    %258 = vector.shape_cast %257 : vector<16xf32> to vector<16x1xf32>
    %259 = vector.broadcast %258 : vector<16x1xf32> to vector<16x16xf32>
    %260 = arith.subf %256, %259 : vector<16x16xf32>
    %261 = math.exp %260 : vector<16x16xf32>
    %cst_97 = arith.constant dense<0.000000e+00> : vector<16xf32>
    %262 = vector.multi_reduction <add>, %261, %cst_97 [1] : vector<16x16xf32> to vector<16xf32>
    %263 = vector.shape_cast %262 : vector<16xf32> to vector<16x1xf32>
    %264 = tpu.reciprocal %263 {approx = true} : vector<16x1xf32> -> vector<16x1xf32>
    %265 = vector.broadcast %264 : vector<16x1xf32> to vector<16x16xf32>
    %266 = arith.mulf %261, %265 : vector<16x16xf32>
    %267 = vector.broadcast %7 : vector<1x32xf32> to vector<16x32xf32>
    %268 = arith.mulf %251, %267 : vector<16x32xf32>
    %cst_98 = arith.constant dense<0.000000e+00> : vector<16x32xf32>
    %269 = tpu.matmul %266, %268, %cst_98 {dimension_numbers = #tpu.dot_dimension_numbers<[1], [0], [0], [1], [0, 0, 1, 1], [], []>} : vector<16x16xf32>, vector<16x32xf32>, vector<16x32xf32> -> vector<16x32xf32>
    %270 = arith.addf %252, %269 : vector<16x32xf32>
    %271 = vector.broadcast %14 : vector<1x32xf32> to vector<16x32xf32>
    %272 = arith.mulf %249, %271 : vector<16x32xf32>
    %cst_99 = arith.constant dense<0.000000e+00> : vector<16x16xf32>
    %273 = tpu.matmul %272, %250, %cst_99 {dimension_numbers = #tpu.dot_dimension_numbers<[1], [1], [0], [0], [0, 0, 1, 0], [], []>} : vector<16x32xf32>, vector<16x32xf32>, vector<16x16xf32> -> vector<16x16xf32>
    %274 = arith.addf %273, %29 : vector<16x16xf32>
    %cst_100 = arith.constant dense<0xFF800000> : vector<16xf32>
    %275 = vector.multi_reduction <maximumf>, %274, %cst_100 [1] : vector<16x16xf32> to vector<16xf32>
    %276 = vector.shape_cast %275 : vector<16xf32> to vector<16x1xf32>
    %277 = vector.broadcast %276 : vector<16x1xf32> to vector<16x16xf32>
    %278 = arith.subf %274, %277 : vector<16x16xf32>
    %279 = math.exp %278 : vector<16x16xf32>
    %cst_101 = arith.constant dense<0.000000e+00> : vector<16xf32>
    %280 = vector.multi_reduction <add>, %279, %cst_101 [1] : vector<16x16xf32> to vector<16xf32>
    %281 = vector.shape_cast %280 : vector<16xf32> to vector<16x1xf32>
    %282 = tpu.reciprocal %281 {approx = true} : vector<16x1xf32> -> vector<16x1xf32>
    %283 = vector.broadcast %282 : vector<16x1xf32> to vector<16x16xf32>
    %284 = arith.mulf %279, %283 : vector<16x16xf32>
    %285 = vector.broadcast %14 : vector<1x32xf32> to vector<16x32xf32>
    %286 = arith.mulf %251, %285 : vector<16x32xf32>
    %cst_102 = arith.constant dense<0.000000e+00> : vector<16x32xf32>
    %287 = tpu.matmul %284, %286, %cst_102 {dimension_numbers = #tpu.dot_dimension_numbers<[1], [0], [0], [1], [0, 0, 1, 1], [], []>} : vector<16x16xf32>, vector<16x32xf32>, vector<16x32xf32> -> vector<16x32xf32>
    %288 = arith.addf %270, %287 : vector<16x32xf32>
    %289 = vector.broadcast %21 : vector<1x32xf32> to vector<16x32xf32>
    %290 = arith.mulf %249, %289 : vector<16x32xf32>
    %cst_103 = arith.constant dense<0.000000e+00> : vector<16x16xf32>
    %291 = tpu.matmul %290, %250, %cst_103 {dimension_numbers = #tpu.dot_dimension_numbers<[1], [1], [0], [0], [0, 0, 1, 0], [], []>} : vector<16x32xf32>, vector<16x32xf32>, vector<16x16xf32> -> vector<16x16xf32>
    %292 = arith.addf %291, %29 : vector<16x16xf32>
    %cst_104 = arith.constant dense<0xFF800000> : vector<16xf32>
    %293 = vector.multi_reduction <maximumf>, %292, %cst_104 [1] : vector<16x16xf32> to vector<16xf32>
    %294 = vector.shape_cast %293 : vector<16xf32> to vector<16x1xf32>
    %295 = vector.broadcast %294 : vector<16x1xf32> to vector<16x16xf32>
    %296 = arith.subf %292, %295 : vector<16x16xf32>
    %297 = math.exp %296 : vector<16x16xf32>
    %cst_105 = arith.constant dense<0.000000e+00> : vector<16xf32>
    %298 = vector.multi_reduction <add>, %297, %cst_105 [1] : vector<16x16xf32> to vector<16xf32>
    %299 = vector.shape_cast %298 : vector<16xf32> to vector<16x1xf32>
    %300 = tpu.reciprocal %299 {approx = true} : vector<16x1xf32> -> vector<16x1xf32>
    %301 = vector.broadcast %300 : vector<16x1xf32> to vector<16x16xf32>
    %302 = arith.mulf %297, %301 : vector<16x16xf32>
    %303 = vector.broadcast %21 : vector<1x32xf32> to vector<16x32xf32>
    %304 = arith.mulf %251, %303 : vector<16x32xf32>
    %cst_106 = arith.constant dense<0.000000e+00> : vector<16x32xf32>
    %305 = tpu.matmul %302, %304, %cst_106 {dimension_numbers = #tpu.dot_dimension_numbers<[1], [0], [0], [1], [0, 0, 1, 1], [], []>} : vector<16x16xf32>, vector<16x32xf32>, vector<16x32xf32> -> vector<16x32xf32>
    %306 = arith.addf %288, %305 : vector<16x32xf32>
    %307 = vector.broadcast %28 : vector<1x32xf32> to vector<16x32xf32>
    %308 = arith.mulf %249, %307 : vector<16x32xf32>
    %cst_107 = arith.constant dense<0.000000e+00> : vector<16x16xf32>
    %309 = tpu.matmul %308, %250, %cst_107 {dimension_numbers = #tpu.dot_dimension_numbers<[1], [1], [0], [0], [0, 0, 1, 0], [], []>} : vector<16x32xf32>, vector<16x32xf32>, vector<16x16xf32> -> vector<16x16xf32>
    %310 = arith.addf %309, %29 : vector<16x16xf32>
    %cst_108 = arith.constant dense<0xFF800000> : vector<16xf32>
    %311 = vector.multi_reduction <maximumf>, %310, %cst_108 [1] : vector<16x16xf32> to vector<16xf32>
    %312 = vector.shape_cast %311 : vector<16xf32> to vector<16x1xf32>
    %313 = vector.broadcast %312 : vector<16x1xf32> to vector<16x16xf32>
    %314 = arith.subf %310, %313 : vector<16x16xf32>
    %315 = math.exp %314 : vector<16x16xf32>
    %cst_109 = arith.constant dense<0.000000e+00> : vector<16xf32>
    %316 = vector.multi_reduction <add>, %315, %cst_109 [1] : vector<16x16xf32> to vector<16xf32>
    %317 = vector.shape_cast %316 : vector<16xf32> to vector<16x1xf32>
    %318 = tpu.reciprocal %317 {approx = true} : vector<16x1xf32> -> vector<16x1xf32>
    %319 = vector.broadcast %318 : vector<16x1xf32> to vector<16x16xf32>
    %320 = arith.mulf %315, %319 : vector<16x16xf32>
    %321 = vector.broadcast %28 : vector<1x32xf32> to vector<16x32xf32>
    %322 = arith.mulf %251, %321 : vector<16x32xf32>
    %cst_110 = arith.constant dense<0.000000e+00> : vector<16x32xf32>
    %323 = tpu.matmul %320, %322, %cst_110 {dimension_numbers = #tpu.dot_dimension_numbers<[1], [0], [0], [1], [0, 0, 1, 1], [], []>} : vector<16x16xf32>, vector<16x32xf32>, vector<16x32xf32> -> vector<16x32xf32>
    %324 = arith.addf %306, %323 : vector<16x32xf32>
    %c1_111 = arith.constant 1 : index
    %c0_112 = arith.constant 0 : index
    %c0_113 = arith.constant 0 : index
    %325 = vector.load %arg6[%c1_111, %c0_112, %c0_113] : memref<2x32x128xbf16, #tpu.memory_space<vmem>>, vector<1x32x128xbf16>
    %326 = vector.shape_cast %325 : vector<1x32x128xbf16> to vector<32x128xbf16>
    %327 = arith.truncf %324 : vector<16x32xf32> to vector<16x32xbf16>
    %cst_114 = arith.constant dense<0.000000e+00> : vector<16x128xf32>
    %328 = tpu.matmul %327, %326, %cst_114 {dimension_numbers = #tpu.dot_dimension_numbers<[1], [0], [0], [1], [0, 0, 1, 1], [], []>} : vector<16x32xbf16>, vector<32x128xbf16>, vector<16x128xf32> -> vector<16x128xf32>
    %c1_115 = arith.constant 1 : index
    %c0_116 = arith.constant 0 : index
    %c0_117 = arith.constant 0 : index
    %329 = vector.load %arg7[%c1_115, %c0_116, %c0_117] : memref<2x1x128xf32, #tpu.memory_space<vmem>>, vector<1x1x128xf32>
    %330 = vector.shape_cast %329 : vector<1x1x128xf32> to vector<1x128xf32>
    %331 = vector.broadcast %330 : vector<1x128xf32> to vector<16x128xf32>
    %332 = arith.addf %328, %331 : vector<16x128xf32>
    %333 = arith.addf %239, %332 : vector<16x128xf32>
    %c1_118 = arith.constant 1 : index
    %c0_119 = arith.constant 0 : index
    %c0_120 = arith.constant 0 : index
    %334 = vector.load %arg8[%c1_118, %c0_119, %c0_120] : memref<2x1x128xf32, #tpu.memory_space<vmem>>, vector<1x1x128xf32>
    %335 = vector.shape_cast %334 : vector<1x1x128xf32> to vector<1x128xf32>
    %c1_121 = arith.constant 1 : index
    %c0_122 = arith.constant 0 : index
    %c0_123 = arith.constant 0 : index
    %336 = vector.load %arg9[%c1_121, %c0_122, %c0_123] : memref<2x1x128xf32, #tpu.memory_space<vmem>>, vector<1x1x128xf32>
    %337 = vector.shape_cast %336 : vector<1x1x128xf32> to vector<1x128xf32>
    %cst_124 = arith.constant dense<0.000000e+00> : vector<16xf32>
    %338 = vector.multi_reduction <add>, %333, %cst_124 [1] : vector<16x128xf32> to vector<16xf32>
    %339 = vector.shape_cast %338 : vector<16xf32> to vector<16x1xf32>
    %cst_125 = arith.constant 3.125000e-02 : f32
    %340 = vector.broadcast %cst_125 : f32 to vector<16x1xf32>
    %341 = arith.mulf %339, %340 : vector<16x1xf32>
    %342 = arith.mulf %333, %333 : vector<16x128xf32>
    %cst_126 = arith.constant dense<0.000000e+00> : vector<16xf32>
    %343 = vector.multi_reduction <add>, %342, %cst_126 [1] : vector<16x128xf32> to vector<16xf32>
    %344 = vector.shape_cast %343 : vector<16xf32> to vector<16x1xf32>
    %cst_127 = arith.constant 3.125000e-02 : f32
    %345 = vector.broadcast %cst_127 : f32 to vector<16x1xf32>
    %346 = arith.mulf %344, %345 : vector<16x1xf32>
    %347 = arith.mulf %341, %341 : vector<16x1xf32>
    %348 = arith.subf %346, %347 : vector<16x1xf32>
    %cst_128 = arith.constant 0.000000e+00 : f32
    %349 = vector.broadcast %cst_128 : f32 to vector<16x1xf32>
    %350 = arith.maximumf %348, %349 : vector<16x1xf32>
    %351 = vector.broadcast %341 : vector<16x1xf32> to vector<16x128xf32>
    %352 = arith.subf %333, %351 : vector<16x128xf32>
    %cst_129 = arith.constant 9.99999996E-13 : f32
    %353 = vector.broadcast %cst_129 : f32 to vector<16x1xf32>
    %354 = arith.addf %350, %353 : vector<16x1xf32>
    %355 = math.rsqrt %354 : vector<16x1xf32>
    %356 = vector.broadcast %355 : vector<16x1xf32> to vector<16x128xf32>
    %357 = arith.mulf %352, %356 : vector<16x128xf32>
    %358 = vector.broadcast %335 : vector<1x128xf32> to vector<16x128xf32>
    %359 = arith.mulf %357, %358 : vector<16x128xf32>
    %360 = vector.broadcast %337 : vector<1x128xf32> to vector<16x128xf32>
    %361 = arith.addf %359, %360 : vector<16x128xf32>
    %362 = vector.extract_strided_slice %361 {offsets = [0, 0], sizes = [16, 32], strides = [1, 1]} : vector<16x128xf32> to vector<16x32xf32>
    %c1_130 = arith.constant 1 : index
    %c0_131 = arith.constant 0 : index
    %c0_132 = arith.constant 0 : index
    %363 = vector.load %arg10[%c1_130, %c0_131, %c0_132] : memref<2x32x128xbf16, #tpu.memory_space<vmem>>, vector<1x32x128xbf16>
    %364 = vector.shape_cast %363 : vector<1x32x128xbf16> to vector<32x128xbf16>
    %365 = arith.truncf %362 : vector<16x32xf32> to vector<16x32xbf16>
    %cst_133 = arith.constant dense<0.000000e+00> : vector<16x128xf32>
    %366 = tpu.matmul %365, %364, %cst_133 {dimension_numbers = #tpu.dot_dimension_numbers<[1], [0], [0], [1], [0, 0, 1, 1], [], []>} : vector<16x32xbf16>, vector<32x128xbf16>, vector<16x128xf32> -> vector<16x128xf32>
    %c1_134 = arith.constant 1 : index
    %c0_135 = arith.constant 0 : index
    %c0_136 = arith.constant 0 : index
    %367 = vector.load %arg11[%c1_134, %c0_135, %c0_136] : memref<2x1x128xf32, #tpu.memory_space<vmem>>, vector<1x1x128xf32>
    %368 = vector.shape_cast %367 : vector<1x1x128xf32> to vector<1x128xf32>
    %369 = vector.broadcast %368 : vector<1x128xf32> to vector<16x128xf32>
    %370 = arith.addf %366, %369 : vector<16x128xf32>
    %371 = vector.extract_strided_slice %370 {offsets = [0, 0], sizes = [16, 64], strides = [1, 1]} : vector<16x128xf32> to vector<16x64xf32>
    %372 = arith.mulf %371, %371 : vector<16x64xf32>
    %373 = arith.mulf %371, %372 : vector<16x64xf32>
    %cst_137 = arith.constant 4.471500e-02 : f32
    %374 = vector.broadcast %cst_137 : f32 to vector<16x64xf32>
    %375 = arith.mulf %374, %373 : vector<16x64xf32>
    %376 = arith.addf %371, %375 : vector<16x64xf32>
    %cst_138 = arith.constant 0.797884583 : f32
    %377 = vector.broadcast %cst_138 : f32 to vector<16x64xf32>
    %378 = arith.mulf %377, %376 : vector<16x64xf32>
    %379 = math.tanh %378 : vector<16x64xf32>
    %cst_139 = arith.constant 1.000000e+00 : f32
    %380 = vector.broadcast %cst_139 : f32 to vector<16x64xf32>
    %381 = arith.addf %380, %379 : vector<16x64xf32>
    %cst_140 = arith.constant 5.000000e-01 : f32
    %382 = vector.broadcast %cst_140 : f32 to vector<16x64xf32>
    %383 = arith.mulf %382, %381 : vector<16x64xf32>
    %384 = arith.mulf %371, %383 : vector<16x64xf32>
    %c1_141 = arith.constant 1 : index
    %c0_142 = arith.constant 0 : index
    %c0_143 = arith.constant 0 : index
    %385 = vector.load %arg12[%c1_141, %c0_142, %c0_143] : memref<2x64x128xbf16, #tpu.memory_space<vmem>>, vector<1x64x128xbf16>
    %386 = vector.shape_cast %385 : vector<1x64x128xbf16> to vector<64x128xbf16>
    %387 = arith.truncf %384 : vector<16x64xf32> to vector<16x64xbf16>
    %cst_144 = arith.constant dense<0.000000e+00> : vector<16x128xf32>
    %388 = tpu.matmul %387, %386, %cst_144 {dimension_numbers = #tpu.dot_dimension_numbers<[1], [0], [0], [1], [0, 0, 1, 1], [], []>} : vector<16x64xbf16>, vector<64x128xbf16>, vector<16x128xf32> -> vector<16x128xf32>
    %c1_145 = arith.constant 1 : index
    %c0_146 = arith.constant 0 : index
    %c0_147 = arith.constant 0 : index
    %389 = vector.load %arg13[%c1_145, %c0_146, %c0_147] : memref<2x1x128xf32, #tpu.memory_space<vmem>>, vector<1x1x128xf32>
    %390 = vector.shape_cast %389 : vector<1x1x128xf32> to vector<1x128xf32>
    %391 = vector.broadcast %390 : vector<1x128xf32> to vector<16x128xf32>
    %392 = arith.addf %388, %391 : vector<16x128xf32>
    %393 = arith.addf %361, %392 : vector<16x128xf32>
    %c1_148 = arith.constant 1 : index
    %c0_149 = arith.constant 0 : index
    %c0_150 = arith.constant 0 : index
    %394 = vector.load %arg14[%c1_148, %c0_149, %c0_150] : memref<2x1x128xf32, #tpu.memory_space<vmem>>, vector<1x1x128xf32>
    %395 = vector.shape_cast %394 : vector<1x1x128xf32> to vector<1x128xf32>
    %c1_151 = arith.constant 1 : index
    %c0_152 = arith.constant 0 : index
    %c0_153 = arith.constant 0 : index
    %396 = vector.load %arg15[%c1_151, %c0_152, %c0_153] : memref<2x1x128xf32, #tpu.memory_space<vmem>>, vector<1x1x128xf32>
    %397 = vector.shape_cast %396 : vector<1x1x128xf32> to vector<1x128xf32>
    %cst_154 = arith.constant dense<0.000000e+00> : vector<16xf32>
    %398 = vector.multi_reduction <add>, %393, %cst_154 [1] : vector<16x128xf32> to vector<16xf32>
    %399 = vector.shape_cast %398 : vector<16xf32> to vector<16x1xf32>
    %cst_155 = arith.constant 3.125000e-02 : f32
    %400 = vector.broadcast %cst_155 : f32 to vector<16x1xf32>
    %401 = arith.mulf %399, %400 : vector<16x1xf32>
    %402 = arith.mulf %393, %393 : vector<16x128xf32>
    %cst_156 = arith.constant dense<0.000000e+00> : vector<16xf32>
    %403 = vector.multi_reduction <add>, %402, %cst_156 [1] : vector<16x128xf32> to vector<16xf32>
    %404 = vector.shape_cast %403 : vector<16xf32> to vector<16x1xf32>
    %cst_157 = arith.constant 3.125000e-02 : f32
    %405 = vector.broadcast %cst_157 : f32 to vector<16x1xf32>
    %406 = arith.mulf %404, %405 : vector<16x1xf32>
    %407 = arith.mulf %401, %401 : vector<16x1xf32>
    %408 = arith.subf %406, %407 : vector<16x1xf32>
    %cst_158 = arith.constant 0.000000e+00 : f32
    %409 = vector.broadcast %cst_158 : f32 to vector<16x1xf32>
    %410 = arith.maximumf %408, %409 : vector<16x1xf32>
    %411 = vector.broadcast %401 : vector<16x1xf32> to vector<16x128xf32>
    %412 = arith.subf %393, %411 : vector<16x128xf32>
    %cst_159 = arith.constant 9.99999996E-13 : f32
    %413 = vector.broadcast %cst_159 : f32 to vector<16x1xf32>
    %414 = arith.addf %410, %413 : vector<16x1xf32>
    %415 = math.rsqrt %414 : vector<16x1xf32>
    %416 = vector.broadcast %415 : vector<16x1xf32> to vector<16x128xf32>
    %417 = arith.mulf %412, %416 : vector<16x128xf32>
    %418 = vector.broadcast %395 : vector<1x128xf32> to vector<16x128xf32>
    %419 = arith.mulf %417, %418 : vector<16x128xf32>
    %420 = vector.broadcast %397 : vector<1x128xf32> to vector<16x128xf32>
    %421 = arith.addf %419, %420 : vector<16x128xf32>
    %422 = vector.extract_strided_slice %421 {offsets = [0, 0], sizes = [16, 32], strides = [1, 1]} : vector<16x128xf32> to vector<16x32xf32>
    %c0_160 = arith.constant 0 : index
    %c0_161 = arith.constant 0 : index
    %423 = vector.load %arg16[%c0_160, %c0_161] : memref<32x128xbf16, #tpu.memory_space<vmem>>, vector<32x128xbf16>
    %424 = arith.truncf %422 : vector<16x32xf32> to vector<16x32xbf16>
    %cst_162 = arith.constant dense<0.000000e+00> : vector<16x128xf32>
    %425 = tpu.matmul %424, %423, %cst_162 {dimension_numbers = #tpu.dot_dimension_numbers<[1], [0], [0], [1], [0, 0, 1, 1], [], []>} : vector<16x32xbf16>, vector<32x128xbf16>, vector<16x128xf32> -> vector<16x128xf32>
    %c0_163 = arith.constant 0 : index
    %c0_164 = arith.constant 0 : index
    %426 = vector.load %arg17[%c0_163, %c0_164] : memref<1x128xf32, #tpu.memory_space<vmem>>, vector<1x128xf32>
    %427 = vector.broadcast %426 : vector<1x128xf32> to vector<16x128xf32>
    %428 = arith.addf %425, %427 : vector<16x128xf32>
    %429 = vector.extract_strided_slice %428 {offsets = [0, 0], sizes = [16, 8], strides = [1, 1]} : vector<16x128xf32> to vector<16x8xf32>
    %430 = vector.shape_cast %429 : vector<16x8xf32> to vector<16x1x8xf32>
    %431 = vector.shape_cast %429 : vector<16x8xf32> to vector<16x8x1xf32>
    %432 = vector.broadcast %430 : vector<16x1x8xf32> to vector<16x8x8xf32>
    %433 = vector.broadcast %431 : vector<16x8x1xf32> to vector<16x8x8xf32>
    %434 = arith.cmpf oge, %432, %433 : vector<16x8x8xf32>
    %435 = arith.extui %434 : vector<16x8x8xi1> to vector<16x8x8xi32>
    %436 = arith.sitofp %435 : vector<16x8x8xi32> to vector<16x8x8xf32>
    %cst_165 = arith.constant dense<0.000000e+00> : vector<16x8xf32>
    %437 = vector.multi_reduction <add>, %436, %cst_165 [2] : vector<16x8x8xf32> to vector<16x8xf32>
    %438 = vector.broadcast %430 : vector<16x1x8xf32> to vector<16x8x8xf32>
    %439 = arith.mulf %436, %438 : vector<16x8x8xf32>
    %cst_166 = arith.constant dense<0.000000e+00> : vector<16x8xf32>
    %440 = vector.multi_reduction <add>, %439, %cst_166 [2] : vector<16x8x8xf32> to vector<16x8xf32>
    %441 = arith.mulf %437, %429 : vector<16x8xf32>
    %cst_167 = arith.constant 1.000000e+00 : f32
    %442 = vector.broadcast %cst_167 : f32 to vector<16x8xf32>
    %443 = arith.addf %442, %441 : vector<16x8xf32>
    %444 = arith.cmpf ogt, %443, %440 : vector<16x8xf32>
    %445 = arith.extui %444 : vector<16x8xi1> to vector<16x8xi32>
    %446 = arith.sitofp %445 : vector<16x8xi32> to vector<16x8xf32>
    %cst_168 = arith.constant dense<0.000000e+00> : vector<16xf32>
    %447 = vector.multi_reduction <add>, %446, %cst_168 [1] : vector<16x8xf32> to vector<16xf32>
    %448 = vector.shape_cast %447 : vector<16xf32> to vector<16x1xf32>
    %449 = arith.mulf %446, %429 : vector<16x8xf32>
    %cst_169 = arith.constant dense<0.000000e+00> : vector<16xf32>
    %450 = vector.multi_reduction <add>, %449, %cst_169 [1] : vector<16x8xf32> to vector<16xf32>
    %451 = vector.shape_cast %450 : vector<16xf32> to vector<16x1xf32>
    %cst_170 = arith.constant 1.000000e+00 : f32
    %452 = vector.broadcast %cst_170 : f32 to vector<16x1xf32>
    %453 = arith.subf %451, %452 : vector<16x1xf32>
    %454 = arith.divf %453, %448 : vector<16x1xf32>
    %455 = vector.broadcast %454 : vector<16x1xf32> to vector<16x128xf32>
    %456 = arith.subf %428, %455 : vector<16x128xf32>
    %cst_171 = arith.constant 0.000000e+00 : f32
    %457 = vector.broadcast %cst_171 : f32 to vector<16x128xf32>
    %458 = arith.maximumf %456, %457 : vector<16x128xf32>
    %c0_172 = arith.constant 0 : index
    %c0_173 = arith.constant 0 : index
    %459 = vector.load %arg18[%c0_172, %c0_173] : memref<16x128xf32, #tpu.memory_space<vmem>>, vector<16x128xf32>
    tpu.vector_store %arg18[%c0_172, %c0_173], %458 {strides = array<i32>} : memref<16x128xf32, #tpu.memory_space<vmem>>, vector<16x128xf32>,
    return
  }
}

</mosaic_0001>

<bundles_post_ra>
// kernel: tpu_custom_call.1
= control target key start
LH: loop header
LB: loop body
LE: loop exit
PB: predicated region body
PF: predicated region fallthrough
CT: control target
= control target key end

     0   :  { %s5509_s0 = inlined_call_operand.hbm [shape: bf16[16,128], index: 0, kind: input, shape index: {}]   ;;  %s5510_s1 = inlined_call_operand.hbm [shape: f32[16,16], index: 1, kind: input, shape index: {}]   ;;  %s5511_s2 = inlined_call_operand.hbm [shape: f32[1,128], index: 2, kind: input, shape index: {}]   ;;  %s5512_s3 = inlined_call_operand.hbm [shape: f32[1,128], index: 3, kind: input, shape index: {}]   ;;  %s5513_s4 = inlined_call_operand.hbm [shape: bf16[2,32,128], index: 4, kind: input, shape index: {}]   ;;  %s5514_s5 = inlined_call_operand.vmem [shape: f32[2,1,128], index: 5, kind: input, shape index: {}]   ;;  %s5515_s6 = inlined_call_operand.hbm [shape: bf16[2,32,128], index: 6, kind: input, shape index: {}]   ;;  %s5516_s7 = inlined_call_operand.vmem [shape: f32[2,1,128], index: 7, kind: input, shape index: {}]   ;;  %s5517_s8 = inlined_call_operand.vmem [shape: f32[2,1,128], index: 8, kind: input, shape index: {}]   ;;  %s5518_s9 = inlined_call_operand.vmem [shape: f32[2,1,128], index: 9, kind: input, shape index: {}]   ;;  %s5519_s10 = inlined_call_operand.hbm [shape: bf16[2,32,128], index: 10, kind: input, shape index: {}]   ;;  %s5520_s11 = inlined_call_operand.vmem [shape: f32[2,1,128], index: 11, kind: input, shape index: {}]   ;;  %s5521_s12 = inlined_call_operand.hbm [shape: bf16[2,64,128], index: 12, kind: input, shape index: {}]   ;;  %s5522_s13 = inlined_call_operand.vmem [shape: f32[2,1,128], index: 13, kind: input, shape index: {}]   ;;  %s5523_s14 = inlined_call_operand.hbm [shape: f32[2,1,128], index: 14, kind: input, shape index: {}]   ;;  %s5524_s15 = inlined_call_operand.hbm [shape: f32[2,1,128], index: 15, kind: input, shape index: {}]   ;;  %s5525_s16 = inlined_call_operand.vmem [shape: bf16[32,128], index: 16, kind: input, shape index: {}]   ;;  %s5526_s17 = inlined_call_operand.vmem [shape: f32[1,128], index: 17, kind: input, shape index: {}]   ;;  %s5527_s18 = inlined_call_operand.hbm [shape: f32[16,128], index: 18, kind: output, shape index: {}]  }
   0x1   :  { %5528 = sst [smem:[#allocation27_spill]] %s5509_s0 }
   0x2   :  { %5529 = sst [smem:[#allocation28_spill]] %s5510_s1 }
   0x3   :  { %5530 = sst [smem:[#allocation29_spill]] %s5511_s2 }
   0x4   :  { %23 = vsyncpa [#allocation3], 0 }
   0x5   :  { %24 = vsyncpa [#allocation6], 0 }
   0x6   :  { %25 = vsyncpa [#allocation9], 0 }
   0x7   :  { %26 = vsyncpa [#allocation12], 0 }
   0x8   :  { %27 = vsyncpa [#allocation15], 0 }
   0x9   :  { %28 = vsyncpa [#allocation18], 0 }
   0xa   :  { %29 = vsyncpa [#allocation4], 0  ;;  %s4635_s27 = smov [#allocation5]  }
   0xb   :  { %s47_s28 = sshll.u32 %s4635_s27, 4  ;;  %s48_s28 = int_to_ptr.vmem [resolvable:$true] %s47_s28 }
   0xc   :  { %s4409_s29 = scalar_lea.vmem %s48_s28, 256  ;;  %p4414_p1 = scmp.lt.s32.totalorder %s48_s28, %s48_s28 }
   0xd   :  { %p4410_p0 = scmp.ne.s32.totalorder %s48_s28, %s4409_s29  ;;  %p4415_p2 = scmp.lt.s32.totalorder %s4409_s29, %s4409_s29 }
   0xf   :  { %p4416_p3 = por %p4415_p2, %p4414_p1 }
  0x11   :  { %p4417_p4 = pnand %p4416_p3, %p4410_p0 }
  0x13   :  { %4420 = shalt.err (!%p4417_p4)
}
  0x14   :  { %s4636_s30 = smov 128   ;;  %s4637_s0 = smov 8  }
  0x15   :  { %s5531_s20 = sld [smem:[#allocation28_spill]]  ;;  %s4638_s21 = smov [#allocation8]  }
  0x16   :  { %s70_s22 = sshll.u32 %s4638_s21, 4  ;;  %s71_s22 = int_to_ptr.vmem [resolvable:$true] %s70_s22 }
  0x17   :  { %s4429_s2 = scalar_lea.vmem %s71_s22, 16  ;;  %s4433_s23 = scalar_lea.vmem %s71_s22, 32 }
  0x18   :  { %p4430_p5 = scmp.ne.s32.totalorder %s71_s22, %s4429_s2  ;;  %p4434_p6 = scmp.lt.s32.totalorder %s71_s22, %s71_s22 }
  0x19   :  { %p4435_p7 = scmp.lt.s32.totalorder %s4433_s23, %s4429_s2 }
  0x1b   :  { %53 = dma.hbm_to_vmem [thread:$0]  %s5531_s20, 256, %s48_s28, [#allocation6], %s4636_s30, %s4636_s30, %s4637_s0  }
  0x1c   :  { %p4436_p8 = por %p4435_p7, %p4434_p6 }
  0x1e   :  { %p4437_p9 = pnand %p4436_p8, %p4430_p5 }
  0x20   :  { %4440 = shalt.err (!%p4437_p9)
}
  0x21   :  { %73 = dma.hbm_to_vmem [thread:$0]  %s5512_s3, 16, %s71_s22, [#allocation9]  }
  0x22   :  { %s4639_s26 = smov [#allocation11]   ;;  %s4640_s29 = smov [#allocation14]  }
  0x23   :  { %s93_s27 = sshll.u32 %s4639_s26, 4  ;;  %s125_s19 = sshll.u32 %s4640_s29, 4  ;;  %s94_s27 = int_to_ptr.vmem [resolvable:$true] %s93_s27  ;;  %s126_s19 = int_to_ptr.vmem [resolvable:$true] %s125_s19 }
  0x24   :  { %s4449_s28 = scalar_lea.vmem %s94_s27, 512  ;;  %p4454_p11 = scmp.lt.s32.totalorder %s94_s27, %s94_s27 }
  0x25   :  { %p4450_p10 = scmp.ne.s32.totalorder %s94_s27, %s4449_s28  ;;  %p4455_p12 = scmp.lt.s32.totalorder %s4449_s28, %s4449_s28 }
  0x27   :  { %p4456_p13 = por %p4455_p12, %p4454_p11 }
  0x29   :  { %p4457_p0 = pnand %p4456_p13, %p4450_p10 }
  0x2b   :  { %4460 = shalt.err (!%p4457_p0)
}
  0x2c   :  { %s4641_s1 = smov 64   ;;  %s4642_s20 = smov 4  }
  0x2d   :  { %99 = dma.hbm_to_vmem [thread:$0]  %s5515_s6, 512, %s94_s27, [#allocation12], %s4641_s1, %s4641_s1, %s4642_s20  }
  0x2e   :  { %s4469_s22 = scalar_lea.vmem %s126_s19, 1024  ;;  %p4474_p2 = scmp.lt.s32.totalorder %s126_s19, %s126_s19 }
  0x2f   :  { %p4470_p1 = scmp.ne.s32.totalorder %s126_s19, %s4469_s22  ;;  %p4475_p3 = scmp.lt.s32.totalorder %s4469_s22, %s4469_s22 }
  0x31   :  { %p4476_p4 = por %p4475_p3, %p4474_p2 }
  0x33   :  { %p4477_p5 = pnand %p4476_p4, %p4470_p1 }
  0x35   :  { %4480 = shalt.err (!%p4477_p5)
}
  0x36   :  { %131 = dma.hbm_to_vmem [thread:$0]  %s5521_s12, 1024, %s126_s19, [#allocation15], %s4641_s1, %s4641_s1, %s4642_s20  }
  0x37   :  { %s4643_s24 = smov [#allocation2]   ;;  %s4644_s26 = smov [#allocation7]  }
  0x38   :  { %s35_s25 = sshll.u32 %s4643_s24, 4  ;;  %s60_s29 = sshll.u32 %s4644_s26, 4  ;;  %s36_s25 = int_to_ptr.vmem [resolvable:$true] %s35_s25  ;;  %s61_s29 = int_to_ptr.vmem [resolvable:$true] %s60_s29 }
  0x39   :  { %s4489_s6 = scalar_lea.vmem %s36_s25, 128  ;;  %p4494_p7 = scmp.lt.s32.totalorder %s36_s25, %s36_s25 }
  0x3a   :  { %p4490_p6 = scmp.ne.s32.totalorder %s36_s25, %s4489_s6  ;;  %p4495_p8 = scmp.lt.s32.totalorder %s4489_s6, %s4489_s6 }
  0x3c   :  { %p4496_p9 = por %p4495_p8, %p4494_p7 }
  0x3e   :  { %p4497_p10 = pnand %p4496_p9, %p4490_p6 }
  0x40   :  { %4500 = shalt.err (!%p4497_p10)
}
  0x41   :  { %s5532_s21 = sld [smem:[#allocation27_spill]]  ;;  %s4509_s12 = scalar_lea.vmem %s61_s29, 16 }
  0x42   :  { %p4510_p11 = scmp.ne.s32.totalorder %s61_s29, %s4509_s12  ;;  %s4513_s19 = scalar_lea.vmem %s61_s29, 32 }
  0x43   :  { %p4514_p12 = scmp.lt.s32.totalorder %s61_s29, %s61_s29  ;;  %p4515_p13 = scmp.lt.s32.totalorder %s4513_s19, %s4509_s12 }
  0x45   :  { %p4516_p0 = por %p4515_p13, %p4514_p12 }
  0x47   :  { %41 = dma.hbm_to_vmem [thread:$0]  %s5532_s21, 128, %s36_s25, [#allocation3], %s4641_s1, %s4641_s1, %s4642_s20  }
  0x48   :  { %p4517_p1 = pnand %p4516_p0, %p4510_p11 }
  0x4a   :  { %4520 = shalt.err (!%p4517_p1)
}
  0x4b   :  { %s5533_s2 = sld [smem:[#allocation29_spill]]  ;;  %s4645_s23 = smov [#allocation10]  }
  0x4c   :  { %s79_s24 = sshll.u32 %s4645_s23, 4  ;;  %s4646_s26 = smov [#allocation13]   ;;  %s80_s24 = int_to_ptr.vmem [resolvable:$true] %s79_s24 }
  0x4d   :  { %s111_s6 = sshll.u32 %s4646_s26, 4  ;;  %s4529_s27 = scalar_lea.vmem %s80_s24, 512  ;;  %s112_s6 = int_to_ptr.vmem [resolvable:$true] %s111_s6 }
  0x4e   :  { %p4530_p2 = scmp.ne.s32.totalorder %s80_s24, %s4529_s27  ;;  %p4534_p3 = scmp.lt.s32.totalorder %s80_s24, %s80_s24 }
  0x4f   :  { %p4535_p4 = scmp.lt.s32.totalorder %s4529_s27, %s4529_s27 }
  0x51   :  { %63 = dma.hbm_to_vmem [thread:$0]  %s5533_s2, 16, %s61_s29, [#allocation6]  }
  0x52   :  { %p4536_p5 = por %p4535_p4, %p4534_p3 }
  0x54   :  { %p4537_p6 = pnand %p4536_p5, %p4530_p2 }
  0x56   :  { %4540 = shalt.err (!%p4537_p6)
}
  0x57   :  { %85 = dma.hbm_to_vmem [thread:$0]  %s5513_s4, 512, %s80_s24, [#allocation9], %s4641_s1, %s4641_s1, %s4642_s20  }
  0x58   :  { %s4549_s29 = scalar_lea.vmem %s112_s6, 512  ;;  %p4554_p8 = scmp.lt.s32.totalorder %s112_s6, %s112_s6 }
  0x59   :  { %p4550_p7 = scmp.ne.s32.totalorder %s112_s6, %s4549_s29  ;;  %p4555_p9 = scmp.lt.s32.totalorder %s4549_s29, %s4549_s29 }
  0x5b   :  { %p4556_p10 = por %p4555_p9, %p4554_p8 }
  0x5d   :  { %p4557_p11 = pnand %p4556_p10, %p4550_p7 }
  0x5f   :  { %4560 = shalt.err (!%p4557_p11)
}
  0x60   :  { %117 = dma.hbm_to_vmem [thread:$0]  %s5519_s10, 512, %s112_s6, [#allocation12], %s4641_s1, %s4641_s1, %s4642_s20  }
  0x61   :  { %s4647_s19 = smov [#allocation16]  }
  0x62   :  { %s139_s3 = sshll.u32 %s4647_s19, 4  ;;  %s140_s3 = int_to_ptr.vmem [resolvable:$true] %s139_s3 }
  0x63   :  { %s4569_s22 = scalar_lea.vmem %s140_s3, 32  ;;  %p4574_p13 = scmp.lt.s32.totalorder %s140_s3, %s140_s3 }
  0x64   :  { %p4570_p12 = scmp.ne.s32.totalorder %s140_s3, %s4569_s22  ;;  %p4575_p0 = scmp.lt.s32.totalorder %s4569_s22, %s4569_s22 }
  0x66   :  { %p4576_p1 = por %p4575_p0, %p4574_p13 }
  0x68   :  { %p4577_p2 = pnand %p4576_p1, %p4570_p12 }
  0x6a   :  { %4580 = shalt.err (!%p4577_p2)
}
  0x6b   :  { %s4648_s4 = smov 16   ;;  %s4649_s2 = smov 1  }
  0x6c   :  { %145 = dma.hbm_to_vmem [thread:$0]  %s5523_s14, 32, %s140_s3, [#allocation15], %s4648_s4, %s4648_s4, %s4649_s2  }
  0x6d   :  { %s4650_s26 = smov [#allocation17]  }
  0x6e   :  { %s151_s27 = sshll.u32 %s4650_s26, 4  ;;  %s152_s27 = int_to_ptr.vmem [resolvable:$true] %s151_s27 }
  0x6f   :  { %s4589_s10 = scalar_lea.vmem %s152_s27, 32  ;;  %p4594_p4 = scmp.lt.s32.totalorder %s152_s27, %s152_s27 }
  0x70   :  { %p4590_p3 = scmp.ne.s32.totalorder %s152_s27, %s4589_s10  ;;  %p4595_p5 = scmp.lt.s32.totalorder %s4589_s10, %s4589_s10 }
  0x72   :  { %p4596_p6 = por %p4595_p5, %p4594_p4 }
  0x74   :  { %p4597_p7 = pnand %p4596_p6, %p4590_p3 }
  0x76   :  { %4600 = shalt.err (!%p4597_p7)
}
  0x77   :  { %157 = dma.hbm_to_vmem [thread:$0]  %s5524_s15, 32, %s152_s27, [#allocation18], %s4648_s4, %s4648_s4, %s4649_s2  }
  0x78   :  { %4621 = dma.done.wait [#allocation3], 128  }
  0x79   :  { %4622 = vsyncadd [#allocation3], 4294967168 }
  0x7a   :  { %4623 = dma.done.wait [#allocation6], 272  }
  0x7b   :  { %4624 = vsyncadd [#allocation6], 4294967024 }
  0x7c   :  { %4625 = dma.done.wait [#allocation9], 528  }
  0x7d   :  { %4626 = vsyncadd [#allocation9], 4294966768 }
  0x7e   :  { %4627 = dma.done.wait [#allocation12], 1024  }
  0x7f   :  { %4628 = vsyncadd [#allocation12], 4294966272 }
  0x80   :  { %4629 = dma.done.wait [#allocation15], 1056  }
  0x81   :  { %4630 = vsyncadd [#allocation15], 4294966240 }
  0x82   :  { %4631 = dma.done.wait [#allocation18], 32  }
  0x83   :  { %4632 = vsyncadd [#allocation18], 4294967264  ;;  %v3927_v0 = vld [vmem:[#allocation2] sm:$0xff]   ;;  %v4651_v6 = vmov 0.0   ;;  %vm4652_vm0 = vmmov 0   ;;  %vm291_vm1 = vcmask 261120   ;;  %v193_v37 = vlaneseq }
  0x84   :  { %v3928_v1 = vunpack.c.l.bf16 %v3927_v0  ;;  %v3929_v2 = vunpack.c.h.bf16 %v3927_v0  ;;  %v4281_v5 = vld [vmem:[#allocation10 + $0x8] sm:$0xff]   ;;  %4025 = vmatprep.subr.bf16.mxu0 %v4651_v6  ;;  %4029 = vmatprep.mubr.msk.bf16.mxu0 %vm4652_vm0, %v4651_v6  ;;  %v4282_v7 = vld [vmem:[#allocation10] sm:$0xff]   ;;  %v3788_v27 = vld [vmem:[#allocation7] ss:$0 sm:$0xff]  ;;  %s4653_s25 = smov 96   ;;  %vm429_vm9 = vcmask 130048  }
  0x85   :  { %4026 = vmatpush3.bf16.msra.mxu0 %v4281_v5  ;;  %v3789_v32 = vld [vmem:[#allocation8] ss:$0 sm:$0xff]  ;;  %v4812_v38 = vand.u32 127, %v193_v37  ;;  %v3790_v39 = vld [vmem:[%s5514_s5] ss:$0 sm:$0xff]  ;;  %v4888_v57 = vld [vmem:[#allocation5 + $0x8] sm:$0xff] }
  0x86   :  { %223 = vadd.xlane.f32.xlu0 %v3928_v1  ;;  %v229_v3 = vmul.f32 %v3928_v1, %v3928_v1  ;;  %v230_v4 = vmul.f32 %v3929_v2, %v3929_v2  ;;  %4027 = vmatprep.subr.bf16.mxu0 %v4651_v6  ;;  %v4890_v60 = vld [vmem:[#allocation5] sm:$0xff]  ;;  %vm1393_vm13 = vcmask 523264   ;;  %vm3106_vm14 = vcmask 64512  }
  0x87   :  { %vm200_vm2 = vcmp.ge.s32.totalorder %v4812_v38, 8  ;;  %vm201_vm3 = vcmp.lt.s32.totalorder %v4812_v38, 16  ;;  %vm196_vm4 = vcmp.lt.s32.totalorder %v4812_v38, 8  ;;  %vm205_vm6 = vcmp.ge.s32.totalorder %v4812_v38, 16 }
  0x88   :  { %231 = vadd.xlane.f32.xlu1 %v229_v3  ;;  %vm202_vm5 = vmand %vm200_vm2, %vm201_vm3  ;;  %v4821_v41 = vsel %vm196_vm4, 1.0, %v4651_v6  ;;  %vm206_vm7 = vcmp.lt.s32.totalorder %v4812_v38, 24  ;;  %vm210_vm10 = vcmp.ge.s32.totalorder %v4812_v38, 24  ;;  %vm211_vm11 = vcmp.lt.s32.totalorder %v4812_v38, 32 }
  0x89   :  { %4028 = vmatpush3.bf16.msra.mxu0 %v4282_v7  ;;  %v4824_v42 = vsel %vm202_vm5, 1.0, %v4651_v6  ;;  %vm207_vm8 = vmand %vm205_vm6, %vm206_vm7 }
  0x8a   :  { %225 = vadd.xlane.f32.xlu0 %v3929_v2  ;;  %v4859_v52 = vsel %vm207_vm8, 1.0, %v4651_v6  ;;  %vm212_vm12 = vmand %vm210_vm10, %vm211_vm11 }
  0x8c   :  { %233 = vadd.xlane.f32.xlu1 %v230_v4 }
 0x10f   :  { %v224_v8 = vpop.xlane.xlu0 %223 }
 0x110   :  { %v227_v9 = vmul.f32 0.03125, %v224_v8 }
 0x111   :  { %v232_v10 = vpop.xlane.xlu1 %231 }
 0x112   :  { %v237_v11 = vmul.f32 %v227_v9, %v227_v9  ;;  %v235_v12 = vmul.f32 0.03125, %v232_v10  ;;  %v243_v24 = vsub.f32 %v3928_v1, %v227_v9 }
 0x113   :  { %v226_v13 = vpop.xlane.xlu0 %225 }
 0x114   :  { %v239_v14 = vsub.f32 %v235_v12, %v237_v11  ;;  %v228_v15 = vmul.f32 0.03125, %v226_v13 }
 0x115   :  { %v234_v16 = vpop.xlane.xlu1 %233 }
 0x116   :  { %v241_v17 = vmax.f32 %v239_v14, 0.0  ;;  %v238_v18 = vmul.f32 %v228_v15, %v228_v15  ;;  %v236_v19 = vmul.f32 0.03125, %v234_v16  ;;  %v244_v28 = vsub.f32 %v3929_v2, %v228_v15 }
 0x118   :  { %v245_v20 = vadd.f32 1e-12, %v241_v17  ;;  %v240_v21 = vsub.f32 %v236_v19, %v238_v18 }
 0x11a   :  { %4303 = vrsqrt.f32 %v245_v20  ;;  %v242_v22 = vmax.f32 %v240_v21, 0.0 }
 0x11c   :  { %v246_v23 = vadd.f32 1e-12, %v242_v22 }
 0x11e   :  { %4305 = vrsqrt.f32 %v246_v23 }
 0x127   :  { %v4304_v25 = vpop.eup %4303 }
 0x128   :  { %v249_v26 = vmul.f32 %v4304_v25, %v243_v24 }
 0x12a   :  { %v257_v31 = vmul.f32 %v3788_v27, %v249_v26 }
 0x12b   :  { %v4306_v29 = vpop.eup %4305 }
 0x12c   :  { %v250_v30 = vmul.f32 %v4306_v29, %v244_v28  ;;  %v4804_v34 = vadd.f32 %v3789_v32, %v257_v31 }
 0x12e   :  { %v258_v33 = vmul.f32 %v3788_v27, %v250_v30 }
 0x130   :  { %v4806_v35 = vadd.f32 %v3789_v32, %v258_v33 }
 0x132   :  { %v271_v36 = vpack.c.bf16 %v4806_v35, %v4804_v34 }
 0x134   :  { %4030 = vmatmul.mubr.msk.bf16.vlgmr.msra.gmra.mxu0 %vm291_vm1, %v271_v36 }
 0x1f4   :  { %v329_v40 = vpop.f32.mrf.mxu0 }
 0x1f5   :  { %v4826_v43 = vadd.f32 %v3790_v39, %v329_v40 }
 0x1f6   :  { %v4031_v44 = vpop.f32.mrf.mxu0 }
 0x1f7   :  { %340 = vrot.lane.b32.xlu1 %v4826_v43, %s4653_s25  ;;  %v336_v45 = vmul.f32 %v4821_v41, %v4826_v43  ;;  %v458_v46 = vmul.f32 %v4824_v42, %v4826_v43  ;;  %v747_v55 = vmul.f32 %v4859_v52, %v4826_v43 }
 0x1f8   :  { %v332_v47 = vpop.f32.mrf.mxu0 }
 0x1f9   :  { %v4834_v48 = vadd.f32 %v3790_v39, %v332_v47  ;;  %4037 = vmatprep.mubr.msk.f32.mxu1 %vm291_vm1, %v336_v45  ;;  %4044 = vmatprep.mubr.msk.f32.mxu0 %vm291_vm1, %v458_v46 }
 0x1fa   :  { %v4032_v49 = vpop.f32.mrf.mxu0 }
 0x1fb   :  { %342 = vrot.lane.b32.xlu0 %v4834_v48, %s4653_s25  ;;  %v337_v53 = vmul.f32 %v4821_v41, %v4834_v48  ;;  %v459_v54 = vmul.f32 %v4824_v42, %v4834_v48  ;;  %v748_v56 = vmul.f32 %v4859_v52, %v4834_v48 }
 0x269   :  { %v4848_v51 = vpop.permute.xlu1 %340 }
 0x26d   :  { %v4842_v50 = vpop.permute.xlu0 %342 }
 0x26e   :  { %4033 = vmatprep.subr.msk.mxu1 %vm291_vm1, %v4842_v50  ;;  %4040 = vmatprep.subr.msk.mxu0 %vm291_vm1, %v4842_v50 }
 0x26f   :  { %4034 = vmatpush3.xpose.msk.msra.mxu1 %vm291_vm1, %v4842_v50  ;;  %4041 = vmatpush3.xpose.msk.msra.mxu0 %vm291_vm1, %v4842_v50 }
 0x270   :  { %4035 = vmatprep.subr.msk.mxu1 %vm291_vm1, %v4848_v51  ;;  %4042 = vmatprep.subr.msk.mxu0 %vm291_vm1, %v4848_v51 }
 0x273   :  { %4036 = vmatpush3.xpose.msk.msra.mxu1 %vm291_vm1, %v4848_v51  ;;  %4043 = vmatpush3.xpose.msk.msra.mxu0 %vm291_vm1, %v4848_v51 }
 0x274   :  { %4061 = vmatprep.subr.msk.mxu0 %vm291_vm1, %v4842_v50 }
 0x276   :  { %4038 = vmatmul.mubr.msk.f32.vlgmr.msra.gmra.mxu1 %vm291_vm1, %v337_v53  ;;  %4045 = vmatmul.mubr.msk.f32.vlgmr.msra.gmra.mxu0 %vm291_vm1, %v459_v54 }
 0x277   :  { %4062 = vmatpush3.xpose.msk.msra.mxu0 %vm291_vm1, %v4842_v50  ;;  %4065 = vmatprep.mubr.msk.f32.mxu0 %vm291_vm1, %v747_v55 }
 0x278   :  { %4063 = vmatprep.subr.msk.mxu0 %vm291_vm1, %v4848_v51 }
 0x27b   :  { %4064 = vmatpush3.xpose.msk.msra.mxu0 %vm291_vm1, %v4848_v51 }
 0x27c   :  { %4089 = vmatprep.subr.bf16.mxu0 %v4651_v6 }
 0x27e   :  { %4066 = vmatmul.mubr.msk.f32.vlgmr.msra.gmra.mxu0 %vm291_vm1, %v748_v56 }
 0x27f   :  { %4093 = vmatprep.mubr.msk.bf16.mxu0 %vm4652_vm0, %v4651_v6 }
 0x336   :  { %v4039_v58 = vpop.f32.mrf.mxu1  ;;  %v4046_v59 = vpop.f32.mrf.mxu0 }
 0x337   :  { %v538_v61 = vadd.f32 %v4046_v59, %v4888_v57  ;;  %v426_v3 = vadd.f32 %v4039_v58, %v4888_v57 }
 0x338   :  { %v420_v62 = vpop.f32.mrf.mxu1  ;;  %v532_v63 = vpop.f32.mrf.mxu0 }
 0x339   :  { %v421_v0 = vadd.f32 %v420_v62, %v4890_v60  ;;  %v533_v1 = vadd.f32 %v532_v63, %v4890_v60  ;;  %v544_v2 = vsel %vm429_vm9, %v538_v61, -inf  ;;  %v433_v9 = vsel %vm429_vm9, %v426_v3, -inf }
 0x33a   :  { %545 = vmax.xlane.f32.xlu0 %v544_v2 }
 0x33b   :  { %v541_v4 = vsel %vm429_vm9, %v533_v1, -inf  ;;  %v430_v5 = vsel %vm429_vm9, %v421_v0, -inf }
 0x33c   :  { %542 = vmax.xlane.f32.xlu1 %v541_v4 }
 0x33e   :  { %v4067_v7 = vpop.f32.mrf.mxu0  ;;  %431 = vmax.xlane.f32.xlu0 %v430_v5 }
 0x33f   :  { %v827_v8 = vadd.f32 %v4067_v7, %v4888_v57 }
 0x340   :  { %v821_v10 = vpop.f32.mrf.mxu0  ;;  %434 = vmax.xlane.f32.xlu1 %v433_v9 }
 0x341   :  { %v822_v11 = vadd.f32 %v821_v10, %v4890_v60  ;;  %v833_v13 = vsel %vm429_vm9, %v827_v8, -inf }
 0x343   :  { %v830_v12 = vsel %vm429_vm9, %v822_v11, -inf }
 0x344   :  { %831 = vmax.xlane.f32.xlu0 %v830_v12  ;;  %834 = vmax.xlane.f32.xlu1 %v833_v13 }
 0x355   :  { %453 = vrot.lane.b32.xlu1 %v4821_v41, %s4641_s1 }
 0x359   :  { %853 = vrot.lane.b32.xlu1 %v4859_v52, %s4641_s1 }
 0x35a   :  { %564 = vrot.lane.b32.xlu0 %v4824_v42, %s4641_s1 }
 0x3c3   :  { %v546_v14 = vpop.xlane.xlu0 %545 }
 0x3c4   :  { %v548_v25 = vsub.f32 %v538_v61, %v546_v14 }
 0x3c5   :  { %v543_v15 = vpop.xlane.xlu1 %542 }
 0x3c6   :  { %v551_v27 = vmul.f32 1.442695, %v548_v25  ;;  %v547_v33 = vsub.f32 %v533_v1, %v543_v15 }
 0x3c7   :  { %v432_v16 = vpop.xlane.xlu0 %431 }
 0x3c8   :  { %4307 = vpow2.f32 %v551_v27  ;;  %v436_v29 = vsub.f32 %v421_v0, %v432_v16  ;;  %v549_v39 = vmul.f32 1.442695, %v547_v33  ;;  %v4950_v27 = vsel %vm212_vm12, 1.0, %v4651_v6 }
 0x3c9   :  { %v435_v17 = vpop.xlane.xlu1 %434 }
 0x3ca   :  { %v437_v28 = vsub.f32 %v426_v3, %v435_v17  ;;  %v438_v31 = vmul.f32 1.442695, %v436_v29 }
 0x3cc   :  { %v440_v30 = vmul.f32 1.442695, %v437_v28 }
 0x3cd   :  { %v832_v18 = vpop.xlane.xlu0 %831  ;;  %v835_v19 = vpop.xlane.xlu1 %834 }
 0x3ce   :  { %4309 = vpow2.f32 %v440_v30  ;;  %v837_v32 = vsub.f32 %v827_v8, %v835_v19  ;;  %v836_v40 = vsub.f32 %v822_v11, %v832_v18  ;;  %v949_v30 = vmul.f32 %v4950_v27, %v4826_v43 }
 0x3cf   :  { %4311 = vpow2.f32 %v438_v31  ;;  %v950_v31 = vmul.f32 %v4950_v27, %v4834_v48 }
 0x3d0   :  { %v840_v36 = vmul.f32 1.442695, %v837_v32  ;;  %v838_v45 = vmul.f32 1.442695, %v836_v40 }
 0x3d1   :  { %v4910_v20 = vpop.permute.xlu0 %564  ;;  %v4916_v23 = vpop.permute.xlu1 %453 }
 0x3d2   :  { %v567_v21 = vmul.f32 %v4910_v20, %v4826_v43  ;;  %v568_v22 = vmul.f32 %v4910_v20, %v4834_v48  ;;  %v457_v24 = vmul.f32 %v4916_v23, %v4834_v48  ;;  %v456_v26 = vmul.f32 %v4916_v23, %v4826_v43 }
 0x3d3   :  { %4313 = vpow2.f32 %v840_v36 }
 0x3d4   :  { %571 = vrot.lane.b32.xlu0 %v567_v21, %s4641_s1  ;;  %573 = vrot.lane.b32.xlu1 %v568_v22, %s4641_s1  ;;  %4315 = vpow2.f32 %v549_v39 }
 0x3d5   :  { %v4308_v44 = vpop.eup %4307  ;;  %4317 = vpow2.f32 %v838_v45  ;;  %v4935_v63 = vpop.permute.xlu1 %853 }
 0x3d6   :  { %v556_v46 = vsel %vm429_vm9, %v4308_v44, 0.0  ;;  %v857_v0 = vmul.f32 %v4935_v63, %v4834_v48  ;;  %v856_v1 = vmul.f32 %v4935_v63, %v4826_v43 }
 0x3d8   :  { %662 = vrot.lane.b32.xlu1 %v457_v24, %s4641_s1 }
 0x3db   :  { %v4310_v47 = vpop.eup %4309 }
 0x3dc   :  { %660 = vrot.lane.b32.xlu1 %v456_v26, %s4641_s1  ;;  %v445_v49 = vsel %vm429_vm9, %v4310_v47, 0.0  ;;  %v4312_v53 = vpop.eup %4311 }
 0x3dd   :  { %v442_v54 = vsel %vm429_vm9, %v4312_v53, 0.0 }
 0x3e0   :  { %v4929_v55 = vpop.eup %4313 }
 0x3e1   :  { %v4316_v56 = vpop.eup %4315  ;;  %v845_v58 = vsel %vm429_vm9, %v4929_v55, 0.0 }
 0x3e2   :  { %v553_v59 = vsel %vm429_vm9, %v4316_v56, 0.0  ;;  %v4318_v61 = vpop.eup %4317 }
 0x3e3   :  { %v842_v62 = vsel %vm429_vm9, %v4318_v61, 0.0 }
 0x3f3   :  { %557 = vadd.xlane.f32.xlu0 %v556_v46 }
 0x3f7   :  { %446 = vadd.xlane.f32.xlu0 %v445_v49 }
 0x3fb   :  { %443 = vadd.xlane.f32.xlu0 %v442_v54 }
 0x3ff   :  { %846 = vadd.xlane.f32.xlu0 %v845_v58 }
 0x400   :  { %554 = vadd.xlane.f32.xlu1 %v553_v59 }
 0x404   :  { %843 = vadd.xlane.f32.xlu1 %v842_v62 }
 0x415   :  { %862 = vrot.lane.b32.xlu1 %v857_v0, %s4641_s1  ;;  %860 = vrot.lane.b32.xlu0 %v856_v1, %s4641_s1 }
 0x446   :  { %v574_v2 = vpop.permute.xlu1 %573  ;;  %v572_v3 = vpop.permute.xlu0 %571 }
 0x447   :  { %4047 = vmatprep.subr.mxu1 %v574_v2 }
 0x448   :  { %4048 = vmatpush3.msra.mxu1 %v574_v2 }
 0x449   :  { %4049 = vmatprep.subr.mxu1 %v572_v3 }
 0x44a   :  { %4050 = vmatpush3.msra.mxu1 %v572_v3  ;;  %v663_v4 = vpop.permute.xlu1 %662 }
 0x44b   :  { %4054 = vmatprep.subr.mxu1 %v663_v4 }
 0x44e   :  { %v661_v8 = vpop.permute.xlu1 %660 }
 0x47c   :  { %v558_v5 = vpop.xlane.xlu0 %557 }
 0x47d   :  { %4319 = vrcp.f32 %v558_v5 }
 0x480   :  { %v447_v7 = vpop.xlane.xlu0 %446 }
 0x484   :  { %v444_v9 = vpop.xlane.xlu0 %443 }
 0x485   :  { %4321 = vrcp.f32 %v444_v9 }
 0x488   :  { %v847_v12 = vpop.xlane.xlu0 %846 }
 0x489   :  { %v555_v10 = vpop.xlane.xlu1 %554 }
 0x48a   :  { %4323 = vrcp.f32 %v555_v10  ;;  %v4320_v13 = vpop.eup %4319 }
 0x48b   :  { %4325 = vrcp.f32 %v447_v7  ;;  %v562_v17 = vmul.f32 %v4320_v13, %v4308_v44 }
 0x48c   :  { %v861_v28 = vpop.permute.xlu0 %860 }
 0x48d   :  { %v844_v11 = vpop.xlane.xlu1 %843 }
 0x48e   :  { %4327 = vrcp.f32 %v844_v11 }
 0x48f   :  { %4329 = vrcp.f32 %v847_v12 }
 0x491   :  { %v863_v25 = vpop.permute.xlu1 %862 }
 0x492   :  { %v4322_v14 = vpop.eup %4321 }
 0x493   :  { %v450_v19 = vmul.f32 %v4322_v14, %v4312_v53 }
 0x497   :  { %v4324_v15 = vpop.eup %4323 }
 0x498   :  { %v561_v16 = vmul.f32 %v4324_v15, %v4316_v56  ;;  %v4326_v18 = vpop.eup %4325 }
 0x499   :  { %v451_v22 = vmul.f32 %v4326_v18, %v4310_v47 }
 0x49a   :  { %4051 = vmatprep.mubr.msk.f32.mxu1 %vm429_vm9, %v561_v16 }
 0x49b   :  { %v4328_v21 = vpop.eup %4327  ;;  %4052 = vmatmul.mubr.msk.f32.vlgmr.msra.gmra.mxu1 %vm429_vm9, %v562_v17  ;;  %v4284_v17 = vld [vmem:[#allocation11] sm:$0xff]  }
 0x49c   :  { %4055 = vmatpush3.msra.mxu1 %v663_v4  ;;  %4058 = vmatprep.mubr.msk.f32.mxu1 %vm429_vm9, %v450_v19  ;;  %v4330_v24 = vpop.eup %4329  ;;  %v850_v26 = vmul.f32 %v4328_v21, %v4318_v61 }
 0x49d   :  { %4056 = vmatprep.subr.mxu1 %v661_v8  ;;  %v851_v29 = vmul.f32 %v4330_v24, %v4929_v55 }
 0x49e   :  { %4057 = vmatpush3.msra.mxu1 %v661_v8 }
 0x49f   :  { %4068 = vmatprep.subr.mxu1 %v863_v25  ;;  %4059 = vmatmul.mubr.msk.f32.vlgmr.msra.gmra.mxu1 %vm429_vm9, %v451_v22 }
 0x4a0   :  { %4069 = vmatpush3.msra.mxu1 %v863_v25  ;;  %4072 = vmatprep.mubr.msk.f32.mxu1 %vm429_vm9, %v850_v26  ;;  %v3818_v25 = vld [vmem:[%s5516_s7] ss:$0 sm:$0xff] }
 0x4a1   :  { %4070 = vmatprep.subr.mxu1 %v861_v28 }
 0x4a2   :  { %4071 = vmatpush3.msra.mxu1 %v861_v28 }
 0x4a3   :  { %4075 = vmatprep.subr.msk.mxu1 %vm291_vm1, %v4842_v50  ;;  %4073 = vmatmul.mubr.msk.f32.vlgmr.msra.gmra.mxu1 %vm429_vm9, %v851_v29 }
 0x4a4   :  { %4076 = vmatpush3.xpose.msk.msra.mxu1 %vm291_vm1, %v4842_v50  ;;  %4079 = vmatprep.mubr.msk.f32.mxu1 %vm291_vm1, %v949_v30 }
 0x4a5   :  { %4077 = vmatprep.subr.msk.mxu1 %vm291_vm1, %v4848_v51 }
 0x4a8   :  { %4078 = vmatpush3.xpose.msk.msra.mxu1 %vm291_vm1, %v4848_v51 }
 0x4ab   :  { %4080 = vmatmul.mubr.msk.f32.vlgmr.msra.gmra.mxu1 %vm291_vm1, %v950_v31 }
 0x55b   :  { %v4053_v32 = vpop.f32.mrf.mxu1 }
 0x55d   :  { %v649_v33 = vpop.f32.mrf.mxu1 }
 0x55f   :  { %v4060_v36 = vpop.f32.mrf.mxu1 }
 0x560   :  { %v744_v39 = vadd.f32 %v4060_v36, %v4053_v32 }
 0x561   :  { %v738_v40 = vpop.f32.mrf.mxu1 }
 0x562   :  { %v739_v44 = vadd.f32 %v738_v40, %v649_v33 }
 0x563   :  { %v4074_v50 = vpop.f32.mrf.mxu1 }
 0x564   :  { %v948_v45 = vadd.f32 %v4074_v50, %v744_v39  ;;  %v4286_v50 = vld [vmem:[#allocation13] sm:$0xff]  }
 0x565   :  { %v938_v46 = vpop.f32.mrf.mxu1 }
 0x566   :  { %v947_v47 = vadd.f32 %v938_v46, %v739_v44  ;;  %v4285_v44 = vld [vmem:[#allocation13 + $0x8] sm:$0xff]  }
 0x56b   :  { %v4081_v49 = vpop.f32.mrf.mxu1 }
 0x56c   :  { %v1029_v53 = vadd.f32 %v4081_v49, %v4888_v57 }
 0x56d   :  { %v1023_v54 = vpop.f32.mrf.mxu1 }
 0x56e   :  { %v1024_v51 = vadd.f32 %v1023_v54, %v4890_v60  ;;  %v1035_v55 = vsel %vm429_vm9, %v1029_v53, -inf }
 0x56f   :  { %1036 = vmax.xlane.f32.xlu0 %v1035_v55 }
 0x570   :  { %v1032_v56 = vsel %vm429_vm9, %v1024_v51, -inf }
 0x571   :  { %1033 = vmax.xlane.f32.xlu1 %v1032_v56 }
 0x585   :  { %1055 = vrot.lane.b32.xlu0 %v4950_v27, %s4641_s1 }
 0x5f8   :  { %v1037_v58 = vpop.xlane.xlu0 %1036 }
 0x5f9   :  { %v1039_v59 = vsub.f32 %v1029_v53, %v1037_v58 }
 0x5fa   :  { %v1034_v61 = vpop.xlane.xlu1 %1033 }
 0x5fb   :  { %v1042_v62 = vmul.f32 1.442695, %v1039_v59  ;;  %v1038_v0 = vsub.f32 %v1024_v51, %v1034_v61 }
 0x5fc   :  { %v4975_v1 = vpop.permute.xlu0 %1055 }
 0x5fd   :  { %4331 = vpow2.f32 %v1042_v62  ;;  %v1040_v2 = vmul.f32 1.442695, %v1038_v0  ;;  %v1058_v3 = vmul.f32 %v4975_v1, %v4826_v43  ;;  %v1059_v9 = vmul.f32 %v4975_v1, %v4834_v48  ;;  %v4283_v48 = vld [vmem:[#allocation11 + $0x8] sm:$0xff]  }
 0x5fe   :  { %4090 = vmatpush3.bf16.msra.mxu0 %v4283_v48  ;;  %v4289_v48 = vld [vmem:[#allocation14 + $0x8] sm:$0xff]  }
 0x5ff   :  { %4333 = vpow2.f32 %v1040_v2  ;;  %1062 = vrot.lane.b32.xlu0 %v1058_v3, %s4641_s1  ;;  %4091 = vmatprep.subr.bf16.mxu0 %v4651_v6 }
 0x602   :  { %4092 = vmatpush3.bf16.msra.mxu0 %v4284_v17  ;;  %v4290_v17 = vld [vmem:[#allocation14] sm:$0xff]  }
 0x603   :  { %4105 = vmatprep.subr.bf16.mxu0 %v4651_v6 }
 0x60a   :  { %v4332_v4 = vpop.eup %4331 }
 0x60b   :  { %v1047_v5 = vsel %vm429_vm9, %v4332_v4, 0.0 }
 0x60c   :  { %v4334_v7 = vpop.eup %4333  ;;  %1048 = vadd.xlane.f32.xlu1 %v1047_v5  ;;  %v3822_v5 = vld [vmem:[%s5517_s8] ss:$0 sm:$0xff] }
 0x60d   :  { %v1044_v8 = vsel %vm429_vm9, %v4334_v7, 0.0 }
 0x610   :  { %1045 = vadd.xlane.f32.xlu1 %v1044_v8 }
 0x621   :  { %1064 = vrot.lane.b32.xlu1 %v1059_v9, %s4641_s1 }
 0x671   :  { %v1063_v12 = vpop.permute.xlu0 %1062 }
 0x695   :  { %v1049_v10 = vpop.xlane.xlu1 %1048 }
 0x696   :  { %4335 = vrcp.f32 %v1049_v10 }
 0x699   :  { %v1046_v11 = vpop.xlane.xlu1 %1045 }
 0x69a   :  { %4337 = vrcp.f32 %v1046_v11  ;;  %v3823_v11 = vld [vmem:[%s5518_s9] ss:$0 sm:$0xff] }
 0x69d   :  { %v1065_v43 = vpop.permute.xlu1 %1064 }
 0x69e   :  { %4082 = vmatprep.subr.mxu1 %v1065_v43 }
 0x69f   :  { %4083 = vmatpush3.msra.mxu1 %v1065_v43 }
 0x6a0   :  { %4084 = vmatprep.subr.mxu1 %v1063_v12 }
 0x6a1   :  { %4085 = vmatpush3.msra.mxu1 %v1063_v12 }
 0x6a2   :  { %4097 = vmatprep.subr.bf16.mxu1 %v4651_v6 }
 0x6a3   :  { %v4336_v13 = vpop.eup %4335 }
 0x6a4   :  { %v1053_v16 = vmul.f32 %v4336_v13, %v4332_v4 }
 0x6a7   :  { %v4338_v14 = vpop.eup %4337 }
 0x6a8   :  { %v1052_v15 = vmul.f32 %v4338_v14, %v4334_v7 }
 0x6aa   :  { %4086 = vmatprep.mubr.msk.f32.mxu1 %vm429_vm9, %v1052_v15  ;;  %v4287_v15 = vld [vmem:[#allocation14 + $0x18] sm:$0xff]  }
 0x6ab   :  { %4087 = vmatmul.mubr.msk.f32.vlgmr.msra.gmra.mxu1 %vm429_vm9, %v1053_v16  ;;  %v4288_v16 = vld [vmem:[#allocation14 + $0x10] sm:$0xff]  }
 0x6ac   :  { %4101 = vmatprep.mubr.msk.bf16.mxu1 %vm4652_vm0, %v4651_v6  ;;  %4098 = vmatpush3.bf16.msra.mxu1 %v4285_v44 }
 0x6ad   :  { %4099 = vmatprep.subr.bf16.mxu1 %v4651_v6 }
 0x6b0   :  { %4100 = vmatpush3.bf16.msra.mxu1 %v4286_v50 }
 0x6b1   :  { %4117 = vmatprep.subr.bf16.mxu1 %v4651_v6 }
 0x76b   :  { %v4088_v18 = vpop.f32.mrf.mxu1 }
 0x76c   :  { %v1150_v21 = vadd.f32 %v4088_v18, %v948_v45  ;;  %v3824_v18 = vld [vmem:[%s5520_s11] ss:$0 sm:$0xff] }
 0x76d   :  { %v1140_v19 = vpop.f32.mrf.mxu1 }
 0x76e   :  { %v1149_v22 = vadd.f32 %v1140_v19, %v947_v47 }
 0x770   :  { %v1155_v24 = vpack.c.bf16 %v1150_v21, %v1149_v22 }
 0x772   :  { %4094 = vmatmul.mubr.msk.bf16.vlgmr.msra.gmra.mxu0 %vm291_vm1, %v1155_v24 }
 0x773   :  { %4113 = vmatprep.mubr.msk.bf16.mxu0 %vm4652_vm0, %v4651_v6  ;;  %4106 = vmatpush3.bf16.msra.mxu0 %v4287_v15 }
 0x774   :  { %4107 = vmatprep.subr.bf16.mxu0 %v4651_v6 }
 0x777   :  { %4108 = vmatpush3.bf16.msra.mxu0 %v4288_v16 }
 0x778   :  { %4109 = vmatprep.subr.bf16.mxu0 %v4651_v6 }
 0x77b   :  { %4110 = vmatpush3.bf16.msra.mxu0 %v4289_v48 }
 0x77c   :  { %4111 = vmatprep.subr.bf16.mxu0 %v4651_v6 }
 0x77f   :  { %4112 = vmatpush3.bf16.msra.mxu0 %v4290_v17 }
 0x832   :  { %v1212_v26 = vpop.f32.mrf.mxu0 }
 0x833   :  { %v1213_v28 = vadd.f32 %v3818_v25, %v1212_v26 }
 0x834   :  { %v4095_v29 = vpop.f32.mrf.mxu0 }
 0x835   :  { %v1219_v30 = vadd.f32 %v1213_v28, %v4804_v34 }
 0x836   :  { %v1215_v31 = vpop.f32.mrf.mxu0 }
 0x837   :  { %v1216_v32 = vadd.f32 %v3818_v25, %v1215_v31  ;;  %1223 = vadd.xlane.f32.xlu0 %v1219_v30  ;;  %v1229_v39 = vmul.f32 %v1219_v30, %v1219_v30 }
 0x838   :  { %v4096_v33 = vpop.f32.mrf.mxu0 }
 0x839   :  { %v1220_v36 = vadd.f32 %v1216_v32, %v4806_v35 }
 0x83b   :  { %1231 = vadd.xlane.f32.xlu0 %v1229_v39  ;;  %1225 = vadd.xlane.f32.xlu1 %v1220_v36  ;;  %v1230_v40 = vmul.f32 %v1220_v36, %v1220_v36 }
 0x83f   :  { %1233 = vadd.xlane.f32.xlu0 %v1230_v40 }
 0x8c0   :  { %v1224_v34 = vpop.xlane.xlu0 %1223 }
 0x8c1   :  { %v1227_v45 = vmul.f32 0.03125, %v1224_v34 }
 0x8c3   :  { %v1237_v49 = vmul.f32 %v1227_v45, %v1227_v45  ;;  %v1243_v2 = vsub.f32 %v1219_v30, %v1227_v45 }
 0x8c4   :  { %v1232_v46 = vpop.xlane.xlu0 %1231  ;;  %v1226_v47 = vpop.xlane.xlu1 %1225 }
 0x8c5   :  { %v1235_v53 = vmul.f32 0.03125, %v1232_v46  ;;  %v1228_v35 = vmul.f32 0.03125, %v1226_v47 }
 0x8c7   :  { %v1239_v54 = vsub.f32 %v1235_v53, %v1237_v49  ;;  %v1238_v56 = vmul.f32 %v1228_v35, %v1228_v35  ;;  %v1244_v7 = vsub.f32 %v1220_v36, %v1228_v35 }
 0x8c8   :  { %v1234_v51 = vpop.xlane.xlu0 %1233 }
 0x8c9   :  { %v1241_v55 = vmax.f32 %v1239_v54, 0.0  ;;  %v1236_v58 = vmul.f32 0.03125, %v1234_v51  ;;  %v3828_v51 = vld [vmem:[%s5522_s13] ss:$0 sm:$0xff] }
 0x8cb   :  { %v1245_v59 = vadd.f32 1e-12, %v1241_v55  ;;  %v1240_v61 = vsub.f32 %v1236_v58, %v1238_v56 }
 0x8cd   :  { %4339 = vrsqrt.f32 %v1245_v59  ;;  %v1242_v62 = vmax.f32 %v1240_v61, 0.0 }
 0x8cf   :  { %v1246_v0 = vadd.f32 1e-12, %v1242_v62 }
 0x8d1   :  { %4341 = vrsqrt.f32 %v1246_v0 }
 0x8da   :  { %v4340_v3 = vpop.eup %4339 }
 0x8db   :  { %v1249_v4 = vmul.f32 %v4340_v3, %v1243_v2 }
 0x8dd   :  { %v1257_v10 = vmul.f32 %v3822_v5, %v1249_v4 }
 0x8de   :  { %v4342_v8 = vpop.eup %4341 }
 0x8df   :  { %v1250_v9 = vmul.f32 %v4342_v8, %v1244_v7  ;;  %v1265_v12 = vadd.f32 %v3823_v11, %v1257_v10  ;;  %v4292_v7 = vld [vmem:[#allocation10 + $0x10] sm:$0xff]  }
 0x8e1   :  { %v1258_v43 = vmul.f32 %v3822_v5, %v1250_v9  ;;  %v4291_v5 = vld [vmem:[#allocation10 + $0x18] sm:$0xff]  }
 0x8e3   :  { %v1266_v13 = vadd.f32 %v3823_v11, %v1258_v43 }
 0x8e5   :  { %v1271_v14 = vpack.c.bf16 %v1266_v13, %v1265_v12 }
 0x8e7   :  { %4102 = vmatmul.mubr.msk.bf16.vlgmr.msra.gmra.mxu1 %vm291_vm1, %v1271_v14 }
 0x8e8   :  { %4121 = vmatprep.mubr.msk.bf16.mxu1 %vm4652_vm0, %v4651_v6  ;;  %4118 = vmatpush3.bf16.msra.mxu1 %v4291_v5 }
 0x8e9   :  { %4119 = vmatprep.subr.bf16.mxu1 %v4651_v6 }
 0x8ec   :  { %4120 = vmatpush3.bf16.msra.mxu1 %v4292_v7 }
 0x9a7   :  { %v1328_v19 = vpop.f32.mrf.mxu1 }
 0x9a8   :  { %v1329_v21 = vadd.f32 %v3824_v18, %v1328_v19 }
 0x9a9   :  { %v4103_v22 = vpop.f32.mrf.mxu1 }
 0x9aa   :  { %v1335_v24 = vmul.f32 %v1329_v21, %v1329_v21 }
 0x9ab   :  { %v1331_v25 = vpop.f32.mrf.mxu1 }
 0x9ac   :  { %v1337_v26 = vmul.f32 %v1335_v24, %v1329_v21  ;;  %v1332_v28 = vadd.f32 %v3824_v18, %v1331_v25 }
 0x9ad   :  { %v4104_v29 = vpop.f32.mrf.mxu1 }
 0x9ae   :  { %v1339_v30 = vmul.f32 0.044715, %v1337_v26  ;;  %v1336_v31 = vmul.f32 %v1332_v28, %v1332_v28 }
 0x9b0   :  { %v1341_v32 = vadd.f32 %v1339_v30, %v1329_v21  ;;  %v1338_v33 = vmul.f32 %v1336_v31, %v1332_v28 }
 0x9b2   :  { %v1343_v36 = vmul.f32 0.7978846, %v1341_v32  ;;  %v1340_v39 = vmul.f32 0.044715, %v1338_v33  ;;  %v3835_v33 = vld [vmem:[#allocation17] ss:$0 sm:$0xff] }
 0x9b4   :  { %4343 = vtanh.f32 %v1343_v36  ;;  %v1342_v40 = vadd.f32 %v1340_v39, %v1332_v28 }
 0x9b6   :  { %v1344_v44 = vmul.f32 0.7978846, %v1342_v40 }
 0x9b8   :  { %4345 = vtanh.f32 %v1344_v44 }
 0x9c1   :  { %v4344_v50 = vpop.eup %4343 }
 0x9c2   :  { %v1347_v34 = vadd.f32 1.0, %v4344_v50  ;;  %v3837_v50 = vld [vmem:[%s5514_s5 + $0x1] ss:$0 sm:$0xff] }
 0x9c4   :  { %v1349_v46 = vmul.f32 0.5, %v1347_v34 }
 0x9c5   :  { %v4346_v45 = vpop.eup %4345 }
 0x9c6   :  { %v1348_v47 = vadd.f32 1.0, %v4346_v45  ;;  %v1351_v53 = vmul.f32 %v1349_v46, %v1329_v21 }
 0x9c8   :  { %v1350_v49 = vmul.f32 0.5, %v1348_v47 }
 0x9ca   :  { %v1352_v35 = vmul.f32 %v1350_v49, %v1332_v28  ;;  %v3834_v28 = vld [vmem:[#allocation16] ss:$0 sm:$0xff] }
 0x9cc   :  { %v1361_v54 = vpack.c.bf16 %v1352_v35, %v1351_v53 }
 0x9ce   :  { %4114 = vmatmul.mubr.msk.bf16.vlgmr.msra.gmra.mxu0 %vm1393_vm13, %v1361_v54 }
 0xa8e   :  { %v1431_v55 = vpop.f32.mrf.mxu0 }
 0xa8f   :  { %v1432_v56 = vadd.f32 %v3828_v51, %v1431_v55 }
 0xa90   :  { %v4115_v58 = vpop.f32.mrf.mxu0 }
 0xa91   :  { %v1438_v59 = vadd.f32 %v1432_v56, %v1265_v12 }
 0xa92   :  { %v1434_v61 = vpop.f32.mrf.mxu0 }
 0xa93   :  { %v1435_v62 = vadd.f32 %v3828_v51, %v1434_v61  ;;  %1442 = vadd.xlane.f32.xlu0 %v1438_v59  ;;  %v1448_v3 = vmul.f32 %v1438_v59, %v1438_v59 }
 0xa94   :  { %v4116_v0 = vpop.f32.mrf.mxu0 }
 0xa95   :  { %v1439_v2 = vadd.f32 %v1435_v62, %v1266_v13 }
 0xa97   :  { %1450 = vadd.xlane.f32.xlu0 %v1448_v3  ;;  %1444 = vadd.xlane.f32.xlu1 %v1439_v2  ;;  %v1449_v4 = vmul.f32 %v1439_v2, %v1439_v2 }
 0xa9b   :  { %1452 = vadd.xlane.f32.xlu1 %v1449_v4 }
 0xb1c   :  { %v1443_v8 = vpop.xlane.xlu0 %1442 }
 0xb1d   :  { %v1446_v9 = vmul.f32 0.03125, %v1443_v8 }
 0xb1f   :  { %v1456_v43 = vmul.f32 %v1446_v9, %v1446_v9  ;;  %v1462_v24 = vsub.f32 %v1438_v59, %v1446_v9 }
 0xb20   :  { %v1451_v10 = vpop.xlane.xlu0 %1450  ;;  %v1445_v11 = vpop.xlane.xlu1 %1444 }
 0xb21   :  { %v1454_v12 = vmul.f32 0.03125, %v1451_v10  ;;  %v1447_v14 = vmul.f32 0.03125, %v1445_v11 }
 0xb23   :  { %v1458_v15 = vsub.f32 %v1454_v12, %v1456_v43  ;;  %v1457_v48 = vmul.f32 %v1447_v14, %v1447_v14  ;;  %v1463_v29 = vsub.f32 %v1439_v2, %v1447_v14 }
 0xb24   :  { %v1453_v13 = vpop.xlane.xlu1 %1452 }
 0xb25   :  { %v1460_v16 = vmax.f32 %v1458_v15, 0.0  ;;  %v1455_v17 = vmul.f32 0.03125, %v1453_v13 }
 0xb27   :  { %v1464_v18 = vadd.f32 1e-12, %v1460_v16  ;;  %v1459_v19 = vsub.f32 %v1455_v17, %v1457_v48 }
 0xb29   :  { %4347 = vrsqrt.f32 %v1464_v18  ;;  %v1461_v21 = vmax.f32 %v1459_v19, 0.0 }
 0xb2b   :  { %v1465_v22 = vadd.f32 1e-12, %v1461_v21 }
 0xb2d   :  { %4349 = vrsqrt.f32 %v1465_v22 }
 0xb36   :  { %v4348_v25 = vpop.eup %4347 }
 0xb37   :  { %v1468_v26 = vmul.f32 %v4348_v25, %v1462_v24 }
 0xb39   :  { %v1476_v32 = vmul.f32 %v3834_v28, %v1468_v26 }
 0xb3a   :  { %v4350_v30 = vpop.eup %4349 }
 0xb3b   :  { %v1469_v31 = vmul.f32 %v4350_v30, %v1463_v29  ;;  %v5022_v39 = vadd.f32 %v3835_v33, %v1476_v32 }
 0xb3d   :  { %v1477_v36 = vmul.f32 %v3834_v28, %v1469_v31 }
 0xb3f   :  { %v5024_v40 = vadd.f32 %v3835_v33, %v1477_v36 }
 0xb41   :  { %v1491_v44 = vpack.c.bf16 %v5024_v40, %v5022_v39 }
 0xb43   :  { %4122 = vmatmul.mubr.msk.bf16.vlgmr.msra.gmra.mxu1 %vm291_vm1, %v1491_v44 }
 0xc03   :  { %v1549_v34 = vpop.f32.mrf.mxu1 }
 0xc04   :  { %v5032_v45 = vadd.f32 %v3837_v50, %v1549_v34 }
 0xc05   :  { %v4123_v46 = vpop.f32.mrf.mxu1 }
 0xc06   :  { %1560 = vrot.lane.b32.xlu1 %v5032_v45, %s4653_s25  ;;  %v1556_v47 = vmul.f32 %v4821_v41, %v5032_v45  ;;  %v1673_v49 = vmul.f32 %v4824_v42, %v5032_v45  ;;  %v1958_v59 = vmul.f32 %v4859_v52, %v5032_v45  ;;  %v1778_v13 = vmul.f32 %v5032_v45, %v4910_v20 }
 0xc07   :  { %v1552_v53 = vpop.f32.mrf.mxu1 }
 0xc08   :  { %v5040_v35 = vadd.f32 %v3837_v50, %v1552_v53  ;;  %4129 = vmatprep.mubr.msk.f32.mxu1 %vm291_vm1, %v1556_v47  ;;  %4136 = vmatprep.mubr.msk.f32.mxu0 %vm291_vm1, %v1673_v49 }
 0xc09   :  { %v4124_v54 = vpop.f32.mrf.mxu1 }
 0xc0a   :  { %1562 = vrot.lane.b32.xlu0 %v5040_v35, %s4653_s25  ;;  %v1557_v56 = vmul.f32 %v4821_v41, %v5040_v35  ;;  %v1674_v58 = vmul.f32 %v4824_v42, %v5040_v35  ;;  %v1959_v41 = vmul.f32 %v4859_v52, %v5040_v35  ;;  %v1779_v16 = vmul.f32 %v5040_v35, %v4910_v20 }
 0xc78   :  { %v5052_v55 = vpop.permute.xlu1 %1560 }
 0xc7c   :  { %v5046_v51 = vpop.permute.xlu0 %1562 }
 0xc7d   :  { %4125 = vmatprep.subr.msk.mxu1 %vm291_vm1, %v5046_v51  ;;  %4132 = vmatprep.subr.msk.mxu0 %vm291_vm1, %v5046_v51 }
 0xc7e   :  { %4126 = vmatpush3.xpose.msk.msra.mxu1 %vm291_vm1, %v5046_v51  ;;  %4133 = vmatpush3.xpose.msk.msra.mxu0 %vm291_vm1, %v5046_v51 }
 0xc7f   :  { %4127 = vmatprep.subr.msk.mxu1 %vm291_vm1, %v5052_v55  ;;  %4134 = vmatprep.subr.msk.mxu0 %vm291_vm1, %v5052_v55 }
 0xc82   :  { %4128 = vmatpush3.xpose.msk.msra.mxu1 %vm291_vm1, %v5052_v55  ;;  %4135 = vmatpush3.xpose.msk.msra.mxu0 %vm291_vm1, %v5052_v55 }
 0xc83   :  { %4153 = vmatprep.subr.msk.mxu0 %vm291_vm1, %v5046_v51 }
 0xc85   :  { %4130 = vmatmul.mubr.msk.f32.vlgmr.msra.gmra.mxu1 %vm291_vm1, %v1557_v56  ;;  %4137 = vmatmul.mubr.msk.f32.vlgmr.msra.gmra.mxu0 %vm291_vm1, %v1674_v58 }
 0xc86   :  { %4154 = vmatpush3.xpose.msk.msra.mxu0 %vm291_vm1, %v5046_v51  ;;  %4157 = vmatprep.mubr.msk.f32.mxu0 %vm291_vm1, %v1958_v59 }
 0xc87   :  { %4155 = vmatprep.subr.msk.mxu0 %vm291_vm1, %v5052_v55 }
 0xc8a   :  { %4156 = vmatpush3.xpose.msk.msra.mxu0 %vm291_vm1, %v5052_v55 }
 0xc8d   :  { %4158 = vmatmul.mubr.msk.f32.vlgmr.msra.gmra.mxu0 %vm291_vm1, %v1959_v41 }
 0xd45   :  { %v4131_v42 = vpop.f32.mrf.mxu1  ;;  %v4138_v61 = vpop.f32.mrf.mxu0 }
 0xd46   :  { %v1753_v62 = vadd.f32 %v4138_v61, %v4888_v57  ;;  %v1646_v7 = vadd.f32 %v4131_v42, %v4888_v57 }
 0xd47   :  { %v1640_v0 = vpop.f32.mrf.mxu1  ;;  %v1747_v2 = vpop.f32.mrf.mxu0 }
 0xd48   :  { %v1641_v3 = vadd.f32 %v1640_v0, %v4890_v60  ;;  %v1748_v4 = vadd.f32 %v1747_v2, %v4890_v60  ;;  %v1759_v5 = vsel %vm429_vm9, %v1753_v62, -inf  ;;  %v1652_v11 = vsel %vm429_vm9, %v1646_v7, -inf }
 0xd49   :  { %1760 = vmax.xlane.f32.xlu0 %v1759_v5  ;;  %v2063_v0 = vmul.f32 %v5032_v45, %v4935_v63  ;;  %v2064_v2 = vmul.f32 %v5040_v35, %v4935_v63 }
 0xd4a   :  { %v1756_v8 = vsel %vm429_vm9, %v1748_v4, -inf  ;;  %v1649_v52 = vsel %vm429_vm9, %v1641_v3, -inf }
 0xd4b   :  { %1757 = vmax.xlane.f32.xlu1 %v1756_v8 }
 0xd4d   :  { %1650 = vmax.xlane.f32.xlu0 %v1649_v52  ;;  %v4159_v9 = vpop.f32.mrf.mxu0 }
 0xd4e   :  { %v2038_v10 = vadd.f32 %v4159_v9, %v4888_v57  ;;  %v1672_v57 = vmul.f32 %v5040_v35, %v4916_v23 }
 0xd4f   :  { %v2032_v43 = vpop.f32.mrf.mxu0  ;;  %1653 = vmax.xlane.f32.xlu1 %v1652_v11 }
 0xd50   :  { %v2033_v12 = vadd.f32 %v2032_v43, %v4890_v60  ;;  %v2044_v15 = vsel %vm429_vm9, %v2038_v10, -inf  ;;  %v1671_v60 = vmul.f32 %v5032_v45, %v4916_v23 }
 0xd52   :  { %v2041_v14 = vsel %vm429_vm9, %v2033_v12, -inf }
 0xd53   :  { %2042 = vmax.xlane.f32.xlu0 %v2041_v14  ;;  %2045 = vmax.xlane.f32.xlu1 %v2044_v15 }
 0xd64   :  { %1782 = vrot.lane.b32.xlu1 %v1778_v13, %s4641_s1 }
 0xd68   :  { %1873 = vrot.lane.b32.xlu1 %v1672_v57, %s4641_s1 }
 0xd69   :  { %1784 = vrot.lane.b32.xlu0 %v1779_v16, %s4641_s1 }
 0xd6c   :  { %1871 = vrot.lane.b32.xlu1 %v1671_v60, %s4641_s1 }
 0xdd2   :  { %v1761_v48 = vpop.xlane.xlu0 %1760 }
 0xdd3   :  { %v1763_v17 = vsub.f32 %v1753_v62, %v1761_v48 }
 0xdd4   :  { %v1758_v18 = vpop.xlane.xlu1 %1757 }
 0xdd5   :  { %v1766_v19 = vmul.f32 1.442695, %v1763_v17  ;;  %v1762_v21 = vsub.f32 %v1748_v4, %v1758_v18 }
 0xdd6   :  { %v1651_v22 = vpop.xlane.xlu0 %1650 }
 0xdd7   :  { %4351 = vpow2.f32 %v1766_v19  ;;  %v1764_v24 = vmul.f32 1.442695, %v1762_v21  ;;  %v1655_v25 = vsub.f32 %v1641_v3, %v1651_v22  ;;  %v2156_v19 = vmul.f32 %v4950_v27, %v5032_v45 }
 0xdd8   :  { %v1654_v26 = vpop.xlane.xlu1 %1653  ;;  %v2157_v21 = vmul.f32 %v4950_v27, %v5040_v35 }
 0xdd9   :  { %4353 = vpow2.f32 %v1764_v24  ;;  %v1657_v20 = vmul.f32 1.442695, %v1655_v25  ;;  %v1656_v28 = vsub.f32 %v1646_v7, %v1654_v26 }
 0xddb   :  { %4355 = vpow2.f32 %v1657_v20  ;;  %v1659_v29 = vmul.f32 1.442695, %v1656_v28 }
 0xddc   :  { %v2043_v30 = vpop.xlane.xlu0 %2042  ;;  %v2046_v31 = vpop.xlane.xlu1 %2045 }
 0xddd   :  { %4357 = vpow2.f32 %v1659_v29  ;;  %v2047_v23 = vsub.f32 %v2033_v12, %v2043_v30  ;;  %v2048_v32 = vsub.f32 %v2038_v10, %v2046_v31 }
 0xddf   :  { %v2049_v33 = vmul.f32 1.442695, %v2047_v23  ;;  %v2051_v36 = vmul.f32 1.442695, %v2048_v32  ;;  %v4399_v23 = vld [vmem:[#allocation5 + $0x8] sm:$0xff] }
 0xde0   :  { %v1785_v44 = vpop.permute.xlu0 %1784  ;;  %v1783_v50 = vpop.permute.xlu1 %1782 }
 0xde1   :  { %4359 = vpow2.f32 %v2049_v33  ;;  %4139 = vmatprep.subr.mxu1 %v1785_v44  ;;  %v4400_v33 = vld [vmem:[#allocation5] sm:$0xff] }
 0xde2   :  { %4361 = vpow2.f32 %v2051_v36  ;;  %4140 = vmatpush3.msra.mxu1 %v1785_v44 }
 0xde3   :  { %4141 = vmatprep.subr.mxu1 %v1783_v50 }
 0xde4   :  { %v4352_v34 = vpop.eup %4351  ;;  %4142 = vmatpush3.msra.mxu1 %v1783_v50  ;;  %v1874_v46 = vpop.permute.xlu1 %1873 }
 0xde5   :  { %4146 = vmatprep.subr.mxu1 %v1874_v46  ;;  %v1771_v47 = vsel %vm429_vm9, %v4352_v34, 0.0 }
 0xde6   :  { %v4354_v49 = vpop.eup %4353  ;;  %1772 = vadd.xlane.f32.xlu1 %v1771_v47 }
 0xde7   :  { %v1768_v53 = vsel %vm429_vm9, %v4354_v49, 0.0 }
 0xde8   :  { %v4356_v54 = vpop.eup %4355  ;;  %1769 = vadd.xlane.f32.xlu0 %v1768_v53  ;;  %v1872_v3 = vpop.permute.xlu1 %1871 }
 0xde9   :  { %v1661_v58 = vsel %vm429_vm9, %v4356_v54, 0.0 }
 0xdea   :  { %v4358_v56 = vpop.eup %4357 }
 0xdeb   :  { %v1664_v59 = vsel %vm429_vm9, %v4358_v56, 0.0 }
 0xdec   :  { %1662 = vadd.xlane.f32.xlu0 %v1661_v58  ;;  %1665 = vadd.xlane.f32.xlu1 %v1664_v59 }
 0xdee   :  { %v4360_v41 = vpop.eup %4359 }
 0xdef   :  { %v4362_v42 = vpop.eup %4361  ;;  %v2053_v61 = vsel %vm429_vm9, %v4360_v41, 0.0 }
 0xdf0   :  { %2054 = vadd.xlane.f32.xlu0 %v2053_v61  ;;  %v2056_v62 = vsel %vm429_vm9, %v4362_v42, 0.0 }
 0xdf1   :  { %2057 = vadd.xlane.f32.xlu1 %v2056_v62 }
 0xe02   :  { %2067 = vrot.lane.b32.xlu1 %v2063_v0, %s4641_s1 }
 0xe06   :  { %2069 = vrot.lane.b32.xlu0 %v2064_v2, %s4641_s1 }
 0xe6f   :  { %v1773_v4 = vpop.xlane.xlu1 %1772 }
 0xe70   :  { %4363 = vrcp.f32 %v1773_v4 }
 0xe71   :  { %v1770_v5 = vpop.xlane.xlu0 %1769 }
 0xe72   :  { %4365 = vrcp.f32 %v1770_v5 }
 0xe75   :  { %v1663_v7 = vpop.xlane.xlu0 %1662  ;;  %v1666_v8 = vpop.xlane.xlu1 %1665 }
 0xe76   :  { %4367 = vrcp.f32 %v1663_v7 }
 0xe77   :  { %4369 = vrcp.f32 %v1666_v8 }
 0xe79   :  { %v2055_v52 = vpop.xlane.xlu0 %2054 }
 0xe7a   :  { %4371 = vrcp.f32 %v2055_v52  ;;  %v2058_v9 = vpop.xlane.xlu1 %2057 }
 0xe7b   :  { %4373 = vrcp.f32 %v2058_v9 }
 0xe7d   :  { %v4364_v10 = vpop.eup %4363  ;;  %v2070_v57 = vpop.permute.xlu0 %2069 }
 0xe7e   :  { %v1777_v12 = vmul.f32 %v4364_v10, %v4352_v34  ;;  %v2068_v48 = vpop.permute.xlu1 %2067  ;;  %v2261_v34 = vmul.f32 %v5032_v45, %v4975_v1  ;;  %v2262_v45 = vmul.f32 %v5040_v35, %v4975_v1  ;;  %v4293_v1 = vld [vmem:[#allocation11 + $0x18] sm:$0xff]   ;;  %v4294_v35 = vld [vmem:[#allocation11 + $0x10] sm:$0xff]  }
 0xe7f   :  { %v4366_v11 = vpop.eup %4365 }
 0xe80   :  { %v1776_v43 = vmul.f32 %v4366_v11, %v4354_v49 }
 0xe82   :  { %4143 = vmatprep.mubr.msk.f32.mxu1 %vm429_vm9, %v1776_v43  ;;  %v3866_v43 = vld [vmem:[%s5516_s7 + $0x1] ss:$0 sm:$0xff] }
 0xe83   :  { %v4368_v63 = vpop.eup %4367  ;;  %4144 = vmatmul.mubr.msk.f32.vlgmr.msra.gmra.mxu1 %vm429_vm9, %v1777_v12 }
 0xe84   :  { %v4370_v14 = vpop.eup %4369  ;;  %4147 = vmatpush3.msra.mxu1 %v1874_v46  ;;  %v1669_v15 = vmul.f32 %v4368_v63, %v4356_v54 }
 0xe85   :  { %4148 = vmatprep.subr.mxu1 %v1872_v3  ;;  %v1670_v13 = vmul.f32 %v4370_v14, %v4358_v56 }
 0xe86   :  { %4149 = vmatpush3.msra.mxu1 %v1872_v3  ;;  %4150 = vmatprep.mubr.msk.f32.mxu1 %vm429_vm9, %v1669_v15 }
 0xe87   :  { %v4372_v16 = vpop.eup %4371  ;;  %4160 = vmatprep.subr.mxu1 %v2070_v57  ;;  %4151 = vmatmul.mubr.msk.f32.vlgmr.msra.gmra.mxu1 %vm429_vm9, %v1670_v13 }
 0xe88   :  { %v4374_v60 = vpop.eup %4373  ;;  %4161 = vmatpush3.msra.mxu1 %v2070_v57  ;;  %v2061_v17 = vmul.f32 %v4372_v16, %v4360_v41 }
 0xe89   :  { %4162 = vmatprep.subr.mxu1 %v2068_v48  ;;  %v2062_v18 = vmul.f32 %v4374_v60, %v4362_v42 }
 0xe8a   :  { %4163 = vmatpush3.msra.mxu1 %v2068_v48  ;;  %4164 = vmatprep.mubr.msk.f32.mxu1 %vm429_vm9, %v2061_v17 }
 0xe8b   :  { %4167 = vmatprep.subr.msk.mxu1 %vm291_vm1, %v5046_v51  ;;  %4165 = vmatmul.mubr.msk.f32.vlgmr.msra.gmra.mxu1 %vm429_vm9, %v2062_v18  ;;  %v4295_v18 = vld [vmem:[#allocation13 + $0x18] sm:$0xff]  }
 0xe8c   :  { %4168 = vmatpush3.xpose.msk.msra.mxu1 %vm291_vm1, %v5046_v51  ;;  %4171 = vmatprep.mubr.msk.f32.mxu1 %vm291_vm1, %v2156_v19  ;;  %v4296_v19 = vld [vmem:[#allocation13 + $0x10] sm:$0xff]  }
 0xe8d   :  { %4169 = vmatprep.subr.msk.mxu1 %vm291_vm1, %v5052_v55 }
 0xe90   :  { %4170 = vmatpush3.xpose.msk.msra.mxu1 %vm291_vm1, %v5052_v55 }
 0xe91   :  { %4189 = vmatprep.subr.bf16.mxu1 %v4651_v6 }
 0xe93   :  { %4172 = vmatmul.mubr.msk.f32.vlgmr.msra.gmra.mxu1 %vm291_vm1, %v2157_v21 }
 0xe94   :  { %4193 = vmatprep.mubr.msk.bf16.mxu1 %vm4652_vm0, %v4651_v6  ;;  %4190 = vmatpush3.bf16.msra.mxu1 %v4295_v18  ;;  %v3880_v18 = vld [vmem:[%s5522_s13 + $0x1] ss:$0 sm:$0xff] }
 0xe95   :  { %4191 = vmatprep.subr.bf16.mxu1 %v4651_v6 }
 0xe98   :  { %4192 = vmatpush3.bf16.msra.mxu1 %v4296_v19 }
 0xe99   :  { %4209 = vmatprep.subr.bf16.mxu1 %v4651_v6 }
 0xf43   :  { %v4145_v22 = vpop.f32.mrf.mxu1 }
 0xf45   :  { %v1860_v51 = vpop.f32.mrf.mxu1 }
 0xf47   :  { %v4152_v24 = vpop.f32.mrf.mxu1 }
 0xf48   :  { %v1955_v25 = vadd.f32 %v4152_v24, %v4145_v22 }
 0xf49   :  { %v1949_v26 = vpop.f32.mrf.mxu1 }
 0xf4a   :  { %v1950_v20 = vadd.f32 %v1949_v26, %v1860_v51 }
 0xf4b   :  { %v4166_v28 = vpop.f32.mrf.mxu1 }
 0xf4c   :  { %v2155_v29 = vadd.f32 %v4166_v28, %v1955_v25 }
 0xf4d   :  { %v2145_v30 = vpop.f32.mrf.mxu1 }
 0xf4e   :  { %v2154_v55 = vadd.f32 %v2145_v30, %v1950_v20 }
 0xf53   :  { %v4173_v31 = vpop.f32.mrf.mxu1 }
 0xf54   :  { %v2236_v27 = vadd.f32 %v4399_v23, %v4173_v31 }
 0xf55   :  { %v2230_v32 = vpop.f32.mrf.mxu1 }
 0xf56   :  { %v2231_v36 = vadd.f32 %v4400_v33, %v2230_v32  ;;  %v2242_v44 = vsel %vm429_vm9, %v2236_v27, -inf }
 0xf57   :  { %2243 = vmax.xlane.f32.xlu1 %v2242_v44 }
 0xf58   :  { %v2239_v50 = vsel %vm429_vm9, %v2231_v36, -inf }
 0xf59   :  { %2240 = vmax.xlane.f32.xlu0 %v2239_v50 }
 0xf68   :  { %2265 = vrot.lane.b32.xlu1 %v2261_v34, %s4641_s1 }
 0xfe0   :  { %v2244_v46 = vpop.xlane.xlu1 %2243 }
 0xfe1   :  { %v2246_v47 = vsub.f32 %v2236_v27, %v2244_v46 }
 0xfe2   :  { %v2241_v49 = vpop.xlane.xlu0 %2240 }
 0xfe3   :  { %v2249_v53 = vmul.f32 1.442695, %v2246_v47  ;;  %v2245_v54 = vsub.f32 %v2231_v36, %v2241_v49  ;;  %v3872_v36 = vld [vmem:[%s5517_s8 + $0x1] ss:$0 sm:$0xff] }
 0xfe4   :  { %v2266_v2 = vpop.permute.xlu1 %2265  ;;  %v3873_v49 = vld [vmem:[%s5518_s9 + $0x1] ss:$0 sm:$0xff] }
 0xfe5   :  { %4375 = vpow2.f32 %v2249_v53  ;;  %v2247_v56 = vmul.f32 1.442695, %v2245_v54 }
 0xfe7   :  { %4377 = vpow2.f32 %v2247_v56 }
 0xff2   :  { %v4376_v58 = vpop.eup %4375 }
 0xff3   :  { %v2254_v59 = vsel %vm429_vm9, %v4376_v58, 0.0 }
 0xff4   :  { %v4378_v41 = vpop.eup %4377  ;;  %2255 = vadd.xlane.f32.xlu0 %v2254_v59  ;;  %v4297_v59 = vld [vmem:[#allocation14 + $0x38] sm:$0xff]  }
 0xff5   :  { %v2251_v42 = vsel %vm429_vm9, %v4378_v41, 0.0 }
 0xff8   :  { %2252 = vadd.xlane.f32.xlu0 %v2251_v42  ;;  %v4299_v42 = vld [vmem:[#allocation14 + $0x28] sm:$0xff]  }
0x100e   :  { %2267 = vrot.lane.b32.xlu0 %v2262_v45, %s4641_s1  ;;  %v4300_v45 = vld [vmem:[#allocation14 + $0x20] sm:$0xff]  }
0x107d   :  { %v2256_v61 = vpop.xlane.xlu0 %2255 }
0x107e   :  { %4379 = vrcp.f32 %v2256_v61  ;;  %v3875_v61 = vld [vmem:[%s5520_s11 + $0x1] ss:$0 sm:$0xff] }
0x1081   :  { %v2253_v62 = vpop.xlane.xlu0 %2252 }
0x1082   :  { %4381 = vrcp.f32 %v2253_v62 }
0x1085   :  { %v2268_v0 = vpop.permute.xlu0 %2267 }
0x1086   :  { %4174 = vmatprep.subr.mxu0 %v2268_v0 }
0x1087   :  { %4175 = vmatpush3.msra.mxu0 %v2268_v0 }
0x1088   :  { %4176 = vmatprep.subr.mxu0 %v2266_v2 }
0x1089   :  { %4177 = vmatpush3.msra.mxu0 %v2266_v2 }
0x108a   :  { %4181 = vmatprep.subr.bf16.mxu0 %v4651_v6 }
0x108b   :  { %v4380_v3 = vpop.eup %4379 }
0x108c   :  { %v2260_v7 = vmul.f32 %v4380_v3, %v4376_v58 }
0x108f   :  { %v4382_v4 = vpop.eup %4381 }
0x1090   :  { %v2259_v5 = vmul.f32 %v4382_v4, %v4378_v41  ;;  %v4298_v41 = vld [vmem:[#allocation14 + $0x30] sm:$0xff]  }
0x1092   :  { %4178 = vmatprep.mubr.msk.f32.mxu0 %vm429_vm9, %v2259_v5 }
0x1093   :  { %4179 = vmatmul.mubr.msk.f32.vlgmr.msra.gmra.mxu0 %vm429_vm9, %v2260_v7 }
0x1094   :  { %4185 = vmatprep.mubr.msk.bf16.mxu0 %vm4652_vm0, %v4651_v6  ;;  %4182 = vmatpush3.bf16.msra.mxu0 %v4293_v1 }
0x1095   :  { %4183 = vmatprep.subr.bf16.mxu0 %v4651_v6 }
0x1098   :  { %4184 = vmatpush3.bf16.msra.mxu0 %v4294_v35 }
0x1099   :  { %4197 = vmatprep.subr.bf16.mxu0 %v4651_v6 }
0x1153   :  { %v4180_v8 = vpop.f32.mrf.mxu0 }
0x1154   :  { %v2353_v9 = vadd.f32 %v4180_v8, %v2155_v29 }
0x1155   :  { %v2343_v52 = vpop.f32.mrf.mxu0 }
0x1156   :  { %v2352_v10 = vadd.f32 %v2343_v52, %v2154_v55 }
0x1158   :  { %v2359_v11 = vpack.c.bf16 %v2353_v9, %v2352_v10 }
0x115a   :  { %4186 = vmatmul.mubr.msk.bf16.vlgmr.msra.gmra.mxu0 %vm291_vm1, %v2359_v11 }
0x115b   :  { %4205 = vmatprep.mubr.msk.bf16.mxu0 %vm4652_vm0, %v4651_v6  ;;  %4198 = vmatpush3.bf16.msra.mxu0 %v4297_v59 }
0x115c   :  { %4199 = vmatprep.subr.bf16.mxu0 %v4651_v6 }
0x115f   :  { %4200 = vmatpush3.bf16.msra.mxu0 %v4298_v41  ;;  %v3886_v41 = vld [vmem:[#allocation16 + $0x1] ss:$0 sm:$0xff] }
0x1160   :  { %4201 = vmatprep.subr.bf16.mxu0 %v4651_v6 }
0x1163   :  { %4202 = vmatpush3.bf16.msra.mxu0 %v4299_v42 }
0x1164   :  { %4203 = vmatprep.subr.bf16.mxu0 %v4651_v6 }
0x1167   :  { %4204 = vmatpush3.bf16.msra.mxu0 %v4300_v45 }
0x121a   :  { %v2417_v12 = vpop.f32.mrf.mxu0 }
0x121b   :  { %v2418_v63 = vadd.f32 %v3866_v43, %v2417_v12 }
0x121c   :  { %v4187_v14 = vpop.f32.mrf.mxu0 }
0x121d   :  { %v2424_v15 = vadd.f32 %v2418_v63, %v5022_v39 }
0x121e   :  { %v2420_v13 = vpop.f32.mrf.mxu0 }
0x121f   :  { %v2421_v57 = vadd.f32 %v3866_v43, %v2420_v13  ;;  %2430 = vadd.xlane.f32.xlu1 %v2424_v15  ;;  %v2436_v17 = vmul.f32 %v2424_v15, %v2424_v15 }
0x1220   :  { %v4188_v16 = vpop.f32.mrf.mxu0 }
0x1221   :  { %v2425_v60 = vadd.f32 %v2421_v57, %v5024_v40 }
0x1223   :  { %2432 = vadd.xlane.f32.xlu0 %v2425_v60  ;;  %v2437_v48 = vmul.f32 %v2425_v60, %v2425_v60 }
0x1225   :  { %2440 = vadd.xlane.f32.xlu1 %v2437_v48 }
0x1227   :  { %2438 = vadd.xlane.f32.xlu0 %v2436_v17 }
0x12a8   :  { %v2431_v39 = vpop.xlane.xlu1 %2430 }
0x12a9   :  { %v2434_v22 = vmul.f32 0.03125, %v2431_v39 }
0x12ab   :  { %v2444_v20 = vmul.f32 %v2434_v22, %v2434_v22  ;;  %v2450_v44 = vsub.f32 %v2424_v15, %v2434_v22 }
0x12ac   :  { %v2433_v21 = vpop.xlane.xlu0 %2432 }
0x12ad   :  { %v2435_v51 = vmul.f32 0.03125, %v2433_v21 }
0x12ae   :  { %v2441_v24 = vpop.xlane.xlu1 %2440 }
0x12af   :  { %v2445_v25 = vmul.f32 %v2435_v51, %v2435_v51  ;;  %v2443_v40 = vmul.f32 0.03125, %v2441_v24  ;;  %v2451_v32 = vsub.f32 %v2425_v60, %v2435_v51 }
0x12b0   :  { %v2439_v26 = vpop.xlane.xlu0 %2438 }
0x12b1   :  { %v2447_v28 = vsub.f32 %v2443_v40, %v2445_v25  ;;  %v2442_v29 = vmul.f32 0.03125, %v2439_v26 }
0x12b3   :  { %v2449_v30 = vmax.f32 %v2447_v28, 0.0  ;;  %v2446_v55 = vsub.f32 %v2442_v29, %v2444_v20  ;;  %v4301_v28 = vld [vmem:[%s5525_s16 + $0x8] sm:$0xff]   ;;  %v4302_v29 = vld [vmem:[%s5525_s16] sm:$0xff]  }
0x12b5   :  { %v2453_v31 = vadd.f32 1e-12, %v2449_v30  ;;  %v2448_v23 = vmax.f32 %v2446_v55, 0.0 }
0x12b7   :  { %4383 = vrsqrt.f32 %v2453_v31  ;;  %v2452_v27 = vadd.f32 1e-12, %v2448_v23 }
0x12b9   :  { %4385 = vrsqrt.f32 %v2452_v27 }
0x12c4   :  { %v4384_v33 = vpop.eup %4383 }
0x12c5   :  { %v2457_v50 = vmul.f32 %v4384_v33, %v2451_v32 }
0x12c6   :  { %v4386_v34 = vpop.eup %4385 }
0x12c7   :  { %v2456_v46 = vmul.f32 %v4386_v34, %v2450_v44  ;;  %v2465_v47 = vmul.f32 %v3872_v36, %v2457_v50 }
0x12c9   :  { %v2464_v53 = vmul.f32 %v3872_v36, %v2456_v46  ;;  %v2473_v56 = vadd.f32 %v3873_v49, %v2465_v47 }
0x12cb   :  { %v2472_v54 = vadd.f32 %v3873_v49, %v2464_v53 }
0x12cd   :  { %v2479_v58 = vpack.c.bf16 %v2473_v56, %v2472_v54 }
0x12cf   :  { %4194 = vmatmul.mubr.msk.bf16.vlgmr.msra.gmra.mxu1 %vm291_vm1, %v2479_v58 }
0x12d0   :  { %4213 = vmatprep.mubr.msk.bf16.mxu1 %vm4652_vm0, %v4651_v6  ;;  %4210 = vmatpush3.bf16.msra.mxu1 %v4301_v28 }
0x12d1   :  { %4211 = vmatprep.subr.bf16.mxu1 %v4651_v6 }
0x12d4   :  { %4212 = vmatpush3.bf16.msra.mxu1 %v4302_v29  ;;  %v4654_v29 = vmov 1966171168  }
0x138f   :  { %v2537_v62 = vpop.f32.mrf.mxu1 }
0x1390   :  { %v2538_v0 = vadd.f32 %v3875_v61, %v2537_v62 }
0x1391   :  { %v4195_v2 = vpop.f32.mrf.mxu1 }
0x1392   :  { %v2544_v3 = vmul.f32 %v2538_v0, %v2538_v0 }
0x1393   :  { %v2540_v4 = vpop.f32.mrf.mxu1 }
0x1394   :  { %v2546_v5 = vmul.f32 %v2544_v3, %v2538_v0  ;;  %v2541_v7 = vadd.f32 %v3875_v61, %v2540_v4 }
0x1395   :  { %v4196_v1 = vpop.f32.mrf.mxu1 }
0x1396   :  { %v2548_v35 = vmul.f32 0.044715, %v2546_v5  ;;  %v2545_v8 = vmul.f32 %v2541_v7, %v2541_v7  ;;  %v3888_v1 = vld [vmem:[%s5526_s17] ss:$0 sm:$0xff]  ;;  %s4656_s17 = smov [#allocation19]  }
0x1397   :  { %s3767_s29 = sshll.u32 %s4656_s17, 4  ;;  %s3768_s29 = int_to_ptr.vmem [resolvable:$true] %s3767_s29 }
0x1398   :  { %v2550_v52 = vadd.f32 %v2548_v35, %v2538_v0  ;;  %v2547_v9 = vmul.f32 %v2545_v8, %v2541_v7  ;;  %s4601_s21 = scalar_lea.vmem %s3768_s29, 256  ;;  %p4606_p9 = scmp.lt.s32.totalorder %s3768_s29, %s3768_s29 }
0x1399   :  { %p4602_p8 = scmp.ne.s32.totalorder %s3768_s29, %s4601_s21  ;;  %p4607_p10 = scmp.lt.s32.totalorder %s4601_s21, %s4601_s21 }
0x139a   :  { %v2552_v10 = vmul.f32 0.7978846, %v2550_v52  ;;  %v2549_v11 = vmul.f32 0.044715, %v2547_v9 }
0x139b   :  { %p4608_p11 = por %p4607_p10, %p4606_p9 }
0x139c   :  { %4387 = vtanh.f32 %v2552_v10  ;;  %v2551_v43 = vadd.f32 %v2549_v11, %v2541_v7 }
0x139d   :  { %p4609_p12 = pnand %p4608_p11, %p4602_p8 }
0x139e   :  { %v2553_v12 = vmul.f32 0.7978846, %v2551_v43 }
0x13a0   :  { %4389 = vtanh.f32 %v2553_v12 }
0x13a9   :  { %v4388_v63 = vpop.eup %4387 }
0x13aa   :  { %v2556_v14 = vadd.f32 1.0, %v4388_v63 }
0x13ac   :  { %v2558_v13 = vmul.f32 0.5, %v2556_v14 }
0x13ad   :  { %v4390_v15 = vpop.eup %4389 }
0x13ae   :  { %v2557_v57 = vadd.f32 1.0, %v4390_v15  ;;  %v2560_v60 = vmul.f32 %v2558_v13, %v2538_v0  ;;  %v3887_v0 = vld [vmem:[#allocation17 + $0x1] ss:$0 sm:$0xff] }
0x13b0   :  { %v2559_v16 = vmul.f32 0.5, %v2557_v57 }
0x13b2   :  { %v2561_v48 = vmul.f32 %v2559_v16, %v2541_v7  ;;  %v5200_v7 = vshrl.u32 %v193_v37, 7 }
0x13b4   :  { %v2571_v17 = vpack.c.bf16 %v2561_v48, %v2560_v60  ;;  %v5206_v35 = vsub.s32 0, %v5200_v7  ;;  %v2875_v8 = vsub.s32 1, %v5200_v7  ;;  %v2882_v37 = vsub.s32 2, %v5200_v7 }
0x13b5   :  { %v2896_v12 = vsub.s32 4, %v5200_v7  ;;  %v2889_v57 = vsub.s32 3, %v5200_v7  ;;  %v2910_v16 = vsub.s32 6, %v5200_v7 }
0x13b6   :  { %4206 = vmatmul.mubr.msk.bf16.vlgmr.msra.gmra.mxu0 %vm1393_vm13, %v2571_v17  ;;  %v2903_v17 = vsub.s32 5, %v5200_v7 }
0x1476   :  { %v2641_v19 = vpop.f32.mrf.mxu0 }
0x1477   :  { %v2642_v39 = vadd.f32 %v3880_v18, %v2641_v19  ;;  %v2917_v19 = vsub.s32 7, %v5200_v7 }
0x1478   :  { %v4207_v21 = vpop.f32.mrf.mxu0 }
0x1479   :  { %v2648_v22 = vadd.f32 %v2642_v39, %v2472_v54 }
0x147a   :  { %v2644_v51 = vpop.f32.mrf.mxu0 }
0x147b   :  { %v2645_v24 = vadd.f32 %v3880_v18, %v2644_v51  ;;  %2654 = vadd.xlane.f32.xlu0 %v2648_v22  ;;  %v2660_v26 = vmul.f32 %v2648_v22, %v2648_v22 }
0x147c   :  { %v4208_v25 = vpop.f32.mrf.mxu0 }
0x147d   :  { %v2649_v40 = vadd.f32 %v2645_v24, %v2473_v56 }
0x147f   :  { %2662 = vadd.xlane.f32.xlu0 %v2660_v26  ;;  %2656 = vadd.xlane.f32.xlu1 %v2649_v40  ;;  %v2661_v20 = vmul.f32 %v2649_v40, %v2649_v40 }
0x1483   :  { %2664 = vadd.xlane.f32.xlu1 %v2661_v20 }
0x1504   :  { %v2655_v30 = vpop.xlane.xlu0 %2654 }
0x1505   :  { %v2658_v55 = vmul.f32 0.03125, %v2655_v30  ;;  %v2770_v30 = vunpack.c.l.s4 %v4654_v29 }
0x1507   :  { %v2668_v27 = vmul.f32 %v2658_v55, %v2658_v55  ;;  %v2674_v56 = vsub.f32 %v2648_v22, %v2658_v55  ;;  %v2771_v55 = vunpack.c.0.s8 %v2770_v30 }
0x1508   :  { %v2663_v31 = vpop.xlane.xlu0 %2662  ;;  %v2657_v23 = vpop.xlane.xlu1 %2656 }
0x1509   :  { %v2666_v32 = vmul.f32 0.03125, %v2663_v31  ;;  %v2659_v33 = vmul.f32 0.03125, %v2657_v23  ;;  %v5244_v31 = vsub.s32 %v2771_v55, %v5200_v7 }
0x150b   :  { %v2670_v36 = vsub.f32 %v2666_v32, %v2668_v27  ;;  %v2669_v34 = vmul.f32 %v2659_v33, %v2659_v33  ;;  %v2675_v42 = vsub.f32 %v2649_v40, %v2659_v33 }
0x150c   :  { %v2665_v44 = vpop.xlane.xlu1 %2664 }
0x150d   :  { %v2672_v50 = vmax.f32 %v2670_v36, 0.0  ;;  %v2667_v46 = vmul.f32 0.03125, %v2665_v44 }
0x150f   :  { %v2676_v47 = vadd.f32 1e-12, %v2672_v50  ;;  %v2671_v49 = vsub.f32 %v2667_v46, %v2669_v34 }
0x1511   :  { %4391 = vrsqrt.f32 %v2676_v47  ;;  %v2673_v53 = vmax.f32 %v2671_v49, 0.0 }
0x1513   :  { %v2677_v54 = vadd.f32 1e-12, %v2673_v53 }
0x1515   :  { %4393 = vrsqrt.f32 %v2677_v54 }
0x151e   :  { %v4392_v58 = vpop.eup %4391 }
0x151f   :  { %v2680_v59 = vmul.f32 %v4392_v58, %v2674_v56 }
0x1521   :  { %v2688_v62 = vmul.f32 %v3886_v41, %v2680_v59 }
0x1522   :  { %v4394_v45 = vpop.eup %4393 }
0x1523   :  { %v2681_v61 = vmul.f32 %v4394_v45, %v2675_v42  ;;  %v2696_v3 = vadd.f32 %v3887_v0, %v2688_v62 }
0x1525   :  { %v2689_v2 = vmul.f32 %v3886_v41, %v2681_v61 }
0x1527   :  { %v2697_v4 = vadd.f32 %v3887_v0, %v2689_v2 }
0x1529   :  { %v2702_v5 = vpack.c.bf16 %v2697_v4, %v2696_v3 }
0x152b   :  { %4214 = vmatmul.mubr.msk.bf16.vlgmr.msra.gmra.mxu1 %vm291_vm1, %v2702_v5 }
0x15eb   :  { %v2759_v52 = vpop.f32.mrf.mxu1 }
0x15ec   :  { %v5209_v9 = vadd.f32 %v3888_v1, %v2759_v52 }
0x15ed   :  { %v4215_v10 = vpop.f32.mrf.mxu1 }
0x15ee   :  { %v2876_v11 = vrot.slane %v5209_v9, %v2875_v8  ;;  %v2869_v43 = vrot.slane %v5209_v9, %v5206_v35  ;;  %v2883_v15 = vrot.slane %v5209_v9, %v2882_v37  ;;  %v2897_v13 = vrot.slane %v5209_v9, %v2896_v12 }
0x15ef   :  { %v2762_v63 = vpop.f32.mrf.mxu1  ;;  %v2890_v60 = vrot.slane %v5209_v9, %v2889_v57  ;;  %v2911_v48 = vrot.slane %v5209_v9, %v2910_v16  ;;  %v2904_v18 = vrot.slane %v5209_v9, %v2903_v17  ;;  %v5226_v39 = vrot.slane %v5209_v9, %v2917_v19 }
0x15f0   :  { %2878 = vbcast.lane.b32.xlu1 %v2876_v11, 256  ;;  %2871 = vbcast.lane.b32.xlu0 %v2869_v43, 256  ;;  %v5229_v21 = vadd.f32 %v3888_v1, %v2762_v63  ;;  %v2775_v23 = vrot.slane %v5209_v9, %v5244_v31  ;;  %v2768_v32 = vcombine.high %v5209_v9, %v5209_v9 }
0x15f1   :  { %v4216_v14 = vpop.f32.mrf.mxu1 }
0x15f2   :  { %v2925_v22 = vrot.slane %v5229_v21, %v5206_v35  ;;  %v2932_v51 = vrot.slane %v5229_v21, %v2875_v8  ;;  %v2939_v24 = vrot.slane %v5229_v21, %v2882_v37  ;;  %v2946_v25 = vrot.slane %v5229_v21, %v2889_v57 }
0x15f3   :  { %v2953_v40 = vrot.slane %v5229_v21, %v2896_v12  ;;  %v2960_v26 = vrot.slane %v5229_v21, %v2903_v17  ;;  %v2967_v20 = vrot.slane %v5229_v21, %v2910_v16  ;;  %v5240_v28 = vrot.slane %v5229_v21, %v2917_v19 }
0x15f4   :  { %2885 = vbcast.lane.b32.xlu1 %v2883_v15, 256  ;;  %2899 = vbcast.lane.b32.xlu0 %v2897_v13, 256  ;;  %v2783_v27 = vcombine.high %v2775_v23, %v2775_v23  ;;  %v2791_v36 = vrot.slane %v2775_v23, %v5244_v31  ;;  %v2782_v44 = vrot.slane %v2768_v32, %v5244_v31 }
0x15f5   :  { %v2817_v30 = vcombine.high %v5229_v21, %v5229_v21 }
0x15f6   :  { %v2805_v33 = vrot.slane %v2783_v27, %v5244_v31  ;;  %v2981_v34 = vrot.slane %v2791_v36, %v5206_v35  ;;  %v2813_v46 = vcombine.high %v2791_v36, %v2791_v36  ;;  %v2798_v56 = vrot.slane %v2782_v44, %v5244_v31 }
0x15f7   :  { %v2784_v58 = vcombine.high %v2782_v44, %v2782_v44 }
0x15f8   :  { %2892 = vbcast.lane.b32.xlu1 %v2890_v60, 256  ;;  %2913 = vbcast.lane.b32.xlu0 %v2911_v48, 256  ;;  %v2985_v50 = vrot.slane %v2805_v33, %v5206_v35  ;;  %v2989_v59 = vrot.slane %v2813_v46, %v5206_v35  ;;  %v2815_v45 = vcombine.high %v2805_v33, %v2805_v33 }
0x15f9   :  { %v2997_v2 = vrot.slane %v2798_v56, %v5206_v35  ;;  %v2814_v4 = vcombine.high %v2798_v56, %v2798_v56  ;;  %v2812_v1 = vrot.slane %v2784_v58, %v5244_v31 }
0x15fa   :  { %v2993_v3 = vrot.slane %v2815_v45, %v5206_v35 }
0x15fb   :  { %v2816_v12 = vcombine.high %v2812_v1, %v2812_v1 }
0x15fc   :  { %2906 = vbcast.lane.b32.xlu1 %v2904_v18, 256  ;;  %3224 = vbcast.lane.b32.xlu0 %v2869_v43, 256  ;;  %v3001_v43 = vrot.slane %v2812_v1, %v5206_v35 }
0x15fd   :  { %v3009_v57 = vrot.slane %v2816_v12, %v5206_v35 }
0x1600   :  { %2920 = vbcast.lane.b32.xlu1 %v5226_v39, 256  ;;  %3252 = vbcast.lane.b32.xlu0 %v2897_v13, 256 }
0x1604   :  { %3231 = vbcast.lane.b32.xlu1 %v2876_v11, 256  ;;  %3259 = vbcast.lane.b32.xlu0 %v2904_v18, 256  ;;  %v3005_v11 = vrot.slane %v2814_v4, %v5206_v35 }
0x1608   :  { %3238 = vbcast.lane.b32.xlu1 %v2883_v15, 256  ;;  %3266 = vbcast.lane.b32.xlu0 %v2911_v48, 256 }
0x160c   :  { %3245 = vbcast.lane.b32.xlu1 %v2890_v60, 256  ;;  %2927 = vbcast.lane.b32.xlu0 %v2925_v22, 256 }
0x1610   :  { %2934 = vbcast.lane.b32.xlu1 %v2932_v51, 256  ;;  %2941 = vbcast.lane.b32.xlu0 %v2939_v24, 256 }
0x1614   :  { %2948 = vbcast.lane.b32.xlu1 %v2946_v25, 256  ;;  %2955 = vbcast.lane.b32.xlu0 %v2953_v40, 256 }
0x1618   :  { %2962 = vbcast.lane.b32.xlu1 %v2960_v26, 256  ;;  %2969 = vbcast.lane.b32.xlu0 %v2967_v20, 256 }
0x161c   :  { %2976 = vbcast.lane.b32.xlu1 %v5240_v28, 256  ;;  %3287 = vbcast.lane.b32.xlu0 %v2932_v51, 256 }
0x1620   :  { %3280 = vbcast.lane.b32.xlu1 %v2925_v22, 256  ;;  %3301 = vbcast.lane.b32.xlu0 %v2946_v25, 256  ;;  %v2824_v22 = vrot.slane %v5229_v21, %v5244_v31 }
0x1622   :  { %v2832_v29 = vcombine.high %v2824_v22, %v2824_v22  ;;  %v2840_v44 = vrot.slane %v2824_v22, %v5244_v31 }
0x1624   :  { %3294 = vbcast.lane.b32.xlu1 %v2939_v24, 256  ;;  %v5305_v58 = vrot.slane %v2840_v44, %v5206_v35 }
0x1628   :  { %3308 = vbcast.lane.b32.xlu1 %v2953_v40, 256 }
0x162c   :  { %3315 = vbcast.lane.b32.xlu1 %v2960_v26, 256 }
0x1630   :  { %3322 = vbcast.lane.b32.xlu1 %v2967_v20, 256 }
0x1662   :  { %v2879_v47 = vpop.permute.xlu1 %2878  ;;  %v2872_v49 = vpop.permute.xlu0 %2871 }
0x1663   :  { %vm3059_vm15 = vcmp.ge.f32.partialorder %v2985_v50, %v2879_v47  ;;  %vm3058_vm0 = vcmp.ge.f32.partialorder %v2981_v34, %v2872_v49 }
0x1664   :  { %v3893_v53 = vsel %vm3059_vm15, 1.0, %v4651_v6  ;;  %v3892_v54 = vsel %vm3058_vm0, 1.0, %v4651_v6 }
0x1665   :  { %v3110_v41 = vsel %vm3106_vm14, %v3893_v53, 0.0  ;;  %v3107_v42 = vsel %vm3106_vm14, %v3892_v54, 0.0  ;;  %v3156_v51 = vmul.f32 %v3893_v53, %v2985_v50  ;;  %v3155_v24 = vmul.f32 %v3892_v54, %v2981_v34 }
0x1666   :  { %v2886_v61 = vpop.permute.xlu1 %2885  ;;  %v2900_v62 = vpop.permute.xlu0 %2899  ;;  %3111 = vadd.xlane.f32.xlu1 %v3110_v41  ;;  %3108 = vadd.xlane.f32.xlu0 %v3107_v42  ;;  %v2854_v50 = vrot.slane %v2832_v29, %v5244_v31  ;;  %v2831_v34 = vrot.slane %v2817_v30, %v5244_v31  ;;  %v2862_v41 = vcombine.high %v2840_v44, %v2840_v44 }
0x1667   :  { %vm3060_vm1 = vcmp.ge.f32.partialorder %v2989_v59, %v2886_v61  ;;  %vm3062_vm2 = vcmp.ge.f32.partialorder %v2997_v2, %v2900_v62  ;;  %v3174_v27 = vsel %vm3106_vm14, %v3156_v51, 0.0  ;;  %v3171_v32 = vsel %vm3106_vm14, %v3155_v24, 0.0 }
0x1668   :  { %v3894_v0 = vsel %vm3060_vm1, 1.0, %v4651_v6  ;;  %v3896_v63 = vsel %vm3062_vm2, 1.0, %v4651_v6  ;;  %v2864_v42 = vcombine.high %v2854_v50, %v2854_v50  ;;  %v2833_v45 = vcombine.high %v2831_v34, %v2831_v34 }
0x1669   :  { %v3113_v5 = vsel %vm3106_vm14, %v3894_v0, 0.0  ;;  %v3119_v60 = vsel %vm3106_vm14, %v3896_v63, 0.0  ;;  %v3157_v55 = vmul.f32 %v3894_v0, %v2989_v59  ;;  %v3159_v46 = vmul.f32 %v3896_v63, %v2997_v2 }
0x166a   :  { %v2893_v8 = vpop.permute.xlu1 %2892  ;;  %v2914_v52 = vpop.permute.xlu0 %2913  ;;  %3114 = vadd.xlane.f32.xlu0 %v3113_v5  ;;  %v5308_v59 = vrot.slane %v2854_v50, %v5206_v35  ;;  %v3021_v5 = vrot.slane %v2862_v41, %v5206_v35  ;;  %v2847_v1 = vrot.slane %v2831_v34, %v5244_v31 }
0x166b   :  { %vm3061_vm3 = vcmp.ge.f32.partialorder %v2993_v3, %v2893_v8  ;;  %vm3064_vm4 = vcmp.ge.f32.partialorder %v3005_v11, %v2914_v52  ;;  %v3177_v53 = vsel %vm3106_vm14, %v3157_v55, 0.0  ;;  %v3183_v2 = vsel %vm3106_vm14, %v3159_v46, 0.0 }
0x166c   :  { %v3895_v10 = vsel %vm3061_vm3, 1.0, %v4651_v6  ;;  %v3898_v48 = vsel %vm3064_vm4, 1.0, %v4651_v6  ;;  %v3025_v8 = vrot.slane %v2864_v42, %v5206_v35 }
0x166d   :  { %v3116_v37 = vsel %vm3106_vm14, %v3895_v10, 0.0  ;;  %v3125_v40 = vsel %vm3106_vm14, %v3898_v48, 0.0  ;;  %v3158_v23 = vmul.f32 %v3895_v10, %v2993_v3  ;;  %v3161_v61 = vmul.f32 %v3898_v48, %v3005_v11 }
0x166e   :  { %v2907_v14 = vpop.permute.xlu1 %2906  ;;  %v5271_v15 = vpop.permute.xlu0 %3224  ;;  %3117 = vadd.xlane.f32.xlu0 %v3116_v37  ;;  %v2861_v11 = vrot.slane %v2833_v45, %v5244_v31 }
0x166f   :  { %vm3063_vm5 = vcmp.ge.f32.partialorder %v3001_v43, %v2907_v14  ;;  %v3180_v49 = vsel %vm3106_vm14, %v3158_v23, 0.0  ;;  %v3189_v10 = vsel %vm3106_vm14, %v3161_v61, 0.0  ;;  %v4655_v14 = vmov 0  }
0x1670   :  { %v3897_v13 = vsel %vm3063_vm5, 1.0, %v4651_v6  ;;  %4239 = vset.pattern.permute.xlu0 %v4655_v14  ;;  %4245 = vset.pattern.permute.xlu1 %v4655_v14  ;;  %v2865_v48 = vcombine.high %v2861_v11, %v2861_v11 }
0x1671   :  { %v3122_v16 = vsel %vm3106_vm14, %v3897_v13, 0.0  ;;  %v3160_v47 = vmul.f32 %v3897_v13, %v3001_v43  ;;  %v3029_v13 = vrot.slane %v2847_v1, %v5206_v35 }
0x1672   :  { %v2921_v17 = vpop.permute.xlu1 %2920  ;;  %v5278_v18 = vpop.permute.xlu0 %3252  ;;  %3123 = vadd.xlane.f32.xlu1 %v3122_v16  ;;  %3120 = vadd.xlane.f32.xlu0 %v3119_v60  ;;  %v3033_v16 = vrot.slane %v2861_v11, %v5206_v35 }
0x1673   :  { %vm3065_vm6 = vcmp.ge.f32.partialorder %v3009_v57, %v2921_v17  ;;  %v3186_v0 = vsel %vm3106_vm14, %v3160_v47, 0.0 }
0x1674   :  { %v3899_v19 = vsel %vm3065_vm6, 1.0, %v4651_v6 }
0x1675   :  { %v3128_v25 = vsel %vm3106_vm14, %v3899_v19, 0.0  ;;  %v3162_v62 = vmul.f32 %v3899_v19, %v3009_v57  ;;  %v2863_v57 = vcombine.high %v2847_v1, %v2847_v1 }
0x1676   :  { %v5285_v26 = vpop.permute.xlu1 %3231  ;;  %v5287_v20 = vpop.permute.xlu0 %3259  ;;  %3129 = vadd.xlane.f32.xlu1 %v3128_v25  ;;  %3126 = vadd.xlane.f32.xlu0 %v3125_v40  ;;  %v3041_v25 = vrot.slane %v2865_v48, %v5206_v35 }
0x1677   :  { %v3192_v52 = vsel %vm3106_vm14, %v3162_v62, 0.0  ;;  %v3037_v24 = vrot.slane %v2863_v57, %v5206_v35 }
0x167a   :  { %v5293_v33 = vpop.permute.xlu1 %3238  ;;  %v5295_v36 = vpop.permute.xlu0 %3266  ;;  %3175 = vadd.xlane.f32.xlu1 %v3174_v27  ;;  %3172 = vadd.xlane.f32.xlu0 %v3171_v32 }
0x167e   :  { %v5302_v54 = vpop.permute.xlu1 %3245  ;;  %3181 = vadd.xlane.f32.xlu1 %v3180_v49  ;;  %3178 = vadd.xlane.f32.xlu0 %v3177_v53  ;;  %v2928_v56 = vpop.permute.xlu0 %2927 }
0x167f   :  { %vm3066_vm7 = vcmp.ge.f32.partialorder %v5305_v58, %v2928_v56 }
0x1680   :  { %v3900_v43 = vsel %vm3066_vm7, 1.0, %v4651_v6 }
0x1681   :  { %v3131_v31 = vsel %vm3106_vm14, %v3900_v43, 0.0  ;;  %v3163_v50 = vmul.f32 %v3900_v43, %v5305_v58 }
0x1682   :  { %v2935_v3 = vpop.permute.xlu1 %2934  ;;  %3187 = vadd.xlane.f32.xlu1 %v3186_v0  ;;  %3184 = vadd.xlane.f32.xlu0 %v3183_v2  ;;  %v2942_v4 = vpop.permute.xlu0 %2941 }
0x1683   :  { %vm3067_vm8 = vcmp.ge.f32.partialorder %v5308_v59, %v2935_v3  ;;  %vm3068_vm9 = vcmp.ge.f32.partialorder %v3021_v5, %v2942_v4  ;;  %v3195_v56 = vsel %vm3106_vm14, %v3163_v50, 0.0 }
0x1684   :  { %v3901_v37 = vsel %vm3067_vm8, 1.0, %v4651_v6  ;;  %v3902_v17 = vsel %vm3068_vm9, 1.0, %v4651_v6 }
0x1685   :  { %v3134_v60 = vsel %vm3106_vm14, %v3901_v37, 0.0  ;;  %v3137_v40 = vsel %vm3106_vm14, %v3902_v17, 0.0  ;;  %v3164_v34 = vmul.f32 %v3901_v37, %v5308_v59  ;;  %v3165_v49 = vmul.f32 %v3902_v17, %v3021_v5 }
0x1686   :  { %v2949_v12 = vpop.permute.xlu1 %2948  ;;  %3193 = vadd.xlane.f32.xlu1 %v3192_v52  ;;  %3190 = vadd.xlane.f32.xlu0 %v3189_v10  ;;  %v2956_v63 = vpop.permute.xlu0 %2955 }
0x1687   :  { %vm3069_vm10 = vcmp.ge.f32.partialorder %v3025_v8, %v2949_v12  ;;  %vm3070_vm11 = vcmp.ge.f32.partialorder %v3029_v13, %v2956_v63  ;;  %v3198_v41 = vsel %vm3106_vm14, %v3164_v34, 0.0  ;;  %v3201_v58 = vsel %vm3106_vm14, %v3165_v49, 0.0 }
0x1688   :  { %v3903_v19 = vsel %vm3069_vm10, 1.0, %v4651_v6  ;;  %v3904_v30 = vsel %vm3070_vm11, 1.0, %v4651_v6 }
0x1689   :  { %v3140_v29 = vsel %vm3106_vm14, %v3903_v19, 0.0  ;;  %v3143_v27 = vsel %vm3106_vm14, %v3904_v30, 0.0  ;;  %v3166_v53 = vmul.f32 %v3903_v19, %v3025_v8  ;;  %v3167_v42 = vmul.f32 %v3904_v30, %v3029_v13 }
0x168a   :  { %v2963_v22 = vpop.permute.xlu1 %2962  ;;  %3132 = vadd.xlane.f32.xlu0 %v3131_v31  ;;  %3135 = vadd.xlane.f32.xlu1 %v3134_v60  ;;  %v2970_v51 = vpop.permute.xlu0 %2969 }
0x168b   :  { %vm3071_vm12 = vcmp.ge.f32.partialorder %v3033_v16, %v2963_v22  ;;  %vm3072_vm13 = vcmp.ge.f32.partialorder %v3037_v24, %v2970_v51  ;;  %v3204_v59 = vsel %vm3106_vm14, %v3166_v53, 0.0  ;;  %v3207_v0 = vsel %vm3106_vm14, %v3167_v42, 0.0 }
0x168c   :  { %v3905_v55 = vsel %vm3071_vm12, 1.0, %v4651_v6  ;;  %v3906_v44 = vsel %vm3072_vm13, 1.0, %v4651_v6 }
0x168d   :  { %v3146_v32 = vsel %vm3106_vm14, %v3905_v55, 0.0  ;;  %v3149_v46 = vsel %vm3106_vm14, %v3906_v44, 0.0  ;;  %v3168_v45 = vmul.f32 %v3905_v55, %v3033_v16  ;;  %v3169_v61 = vmul.f32 %v3906_v44, %v3037_v24 }
0x168e   :  { %v2977_v23 = vpop.permute.xlu1 %2976  ;;  %3138 = vadd.xlane.f32.xlu0 %v3137_v40  ;;  %3141 = vadd.xlane.f32.xlu1 %v3140_v29  ;;  %v5356_v8 = vpop.permute.xlu0 %3287 }
0x168f   :  { %vm3073_vm15 = vcmp.ge.f32.partialorder %v3041_v25, %v2977_v23  ;;  %v3210_v2 = vsel %vm3106_vm14, %v3168_v45, 0.0  ;;  %v3213_v3 = vsel %vm3106_vm14, %v3169_v61, 0.0 }
0x1690   :  { %v3907_v35 = vsel %vm3073_vm15, 1.0, %v4651_v6 }
0x1691   :  { %v3152_v47 = vsel %vm3106_vm14, %v3907_v35, 0.0  ;;  %v3170_v62 = vmul.f32 %v3907_v35, %v3041_v25 }
0x1692   :  { %3144 = vadd.xlane.f32.xlu0 %v3143_v27  ;;  %3147 = vadd.xlane.f32.xlu1 %v3146_v32  ;;  %v5352_v5 = vpop.permute.xlu1 %3280  ;;  %v5360_v10 = vpop.permute.xlu0 %3301 }
0x1693   :  { %v3216_v4 = vsel %vm3106_vm14, %v3170_v62, 0.0 }
0x1696   :  { %3150 = vadd.xlane.f32.xlu0 %v3149_v46  ;;  %3153 = vadd.xlane.f32.xlu1 %v3152_v47  ;;  %v5354_v1 = vpop.permute.xlu1 %3294 }
0x169a   :  { %3196 = vadd.xlane.f32.xlu0 %v3195_v56  ;;  %3199 = vadd.xlane.f32.xlu1 %v3198_v41  ;;  %v5358_v52 = vpop.permute.xlu1 %3308 }
0x169e   :  { %3202 = vadd.xlane.f32.xlu0 %v3201_v58  ;;  %3205 = vadd.xlane.f32.xlu1 %v3204_v59  ;;  %v5362_v11 = vpop.permute.xlu1 %3315 }
0x16a2   :  { %3208 = vadd.xlane.f32.xlu0 %v3207_v0  ;;  %3211 = vadd.xlane.f32.xlu1 %v3210_v2  ;;  %v5364_v37 = vpop.permute.xlu1 %3322 }
0x16a6   :  { %3214 = vadd.xlane.f32.xlu0 %v3213_v3  ;;  %3217 = vadd.xlane.f32.xlu1 %v3216_v4 }
0x16b7   :  { %3329 = vbcast.lane.b32.xlu1 %v5240_v28, 256 }
0x16bc   :  { %3273 = vbcast.lane.b32.xlu0 %v5226_v39, 256 }
0x16ef   :  { %v3109_v43 = vpop.xlane.xlu0 %3108  ;;  %v3112_v63 = vpop.xlane.xlu1 %3111 }
0x16f0   :  { %v3348_v13 = vmul.f32 %v5285_v26, %v3112_v63  ;;  %v3347_v57 = vmul.f32 %v5271_v15, %v3109_v43 }
0x16f2   :  { %v3364_v48 = vadd.f32 1.0, %v3348_v13  ;;  %v3363_v17 = vadd.f32 1.0, %v3347_v57 }
0x16f3   :  { %v3115_v12 = vpop.xlane.xlu0 %3114 }
0x16f4   :  { %v3349_v60 = vmul.f32 %v5293_v33, %v3115_v12 }
0x16f6   :  { %v3365_v24 = vadd.f32 1.0, %v3349_v60 }
0x16f7   :  { %v3118_v28 = vpop.xlane.xlu0 %3117 }
0x16f8   :  { %v3350_v19 = vmul.f32 %v5302_v54, %v3118_v28 }
0x16fa   :  { %v3366_v29 = vadd.f32 1.0, %v3350_v19 }
0x16fb   :  { %v3124_v14 = vpop.xlane.xlu1 %3123  ;;  %v3121_v39 = vpop.xlane.xlu0 %3120 }
0x16fc   :  { %v3352_v30 = vmul.f32 %v5287_v20, %v3124_v14  ;;  %v3351_v55 = vmul.f32 %v5278_v18, %v3121_v39 }
0x16fe   :  { %v3368_v50 = vadd.f32 1.0, %v3352_v30  ;;  %v3367_v34 = vadd.f32 1.0, %v3351_v55 }
0x16ff   :  { %v5368_v16 = vpop.xlane.xlu1 %3129  ;;  %v5370_v31 = vpop.xlane.xlu0 %3126 }
0x1703   :  { %v3176_v22 = vpop.xlane.xlu1 %3175  ;;  %v3173_v51 = vpop.xlane.xlu0 %3172 }
0x1704   :  { %vm3380_vm0 = vcmp.gt.f32.partialorder %v3364_v48, %v3176_v22  ;;  %vm3379_vm1 = vcmp.gt.f32.partialorder %v3363_v17, %v3173_v51 }
0x1705   :  { %v5375_v25 = vsel %vm3380_vm0, 1.0, %v4651_v6  ;;  %v3908_v40 = vsel %vm3379_vm1, 1.0, %v4651_v6  ;;  %vm3555_vm1 = vcmask 1041409  }
0x1706   :  { %v4240_v23 = vpack.i.bf16 %v5375_v25, %v3908_v40  ;;  %v3584_v58 = vmul.f32 %v3908_v40, %v5271_v15 }
0x1707   :  { %v3182_v27 = vpop.xlane.xlu1 %3181  ;;  %v3179_v32 = vpop.xlane.xlu0 %3178 }
0x1708   :  { %vm3382_vm2 = vcmp.gt.f32.partialorder %v3366_v29, %v3182_v27  ;;  %vm3381_vm3 = vcmp.gt.f32.partialorder %v3365_v24, %v3179_v32  ;;  %4241 = vperm.xlu0 %4239, %v4240_v23   ;;  %v3353_v23 = vmul.f32 %v5295_v36, %v5370_v31 }
0x1709   :  { %v3911_v44 = vsel %vm3382_vm2, 1.0, %v4651_v6  ;;  %v3910_v35 = vsel %vm3381_vm3, 1.0, %v4651_v6  ;;  %vm3557_vm2 = vcmask 1042434   ;;  %vm3559_vm3 = vcmask 1043459  }
0x170a   :  { %v4246_v46 = vpack.i.bf16 %v3911_v44, %v3910_v35  ;;  %v3586_v62 = vmul.f32 %v3910_v35, %v5293_v33  ;;  %v3587_v3 = vmul.f32 %v3911_v44, %v5302_v54  ;;  %v3369_v35 = vadd.f32 1.0, %v3353_v23 }
0x170b   :  { %v3188_v47 = vpop.xlane.xlu1 %3187  ;;  %v3185_v49 = vpop.xlane.xlu0 %3184 }
0x170c   :  { %vm3384_vm4 = vcmp.gt.f32.partialorder %v3368_v50, %v3188_v47  ;;  %vm3383_vm5 = vcmp.gt.f32.partialorder %v3367_v34, %v3185_v49  ;;  %4247 = vperm.xlu1 %4245, %v4246_v46  }
0x170d   :  { %v3913_v53 = vsel %vm3384_vm4, 1.0, %v4651_v6  ;;  %v3912_v56 = vsel %vm3383_vm5, 1.0, %v4651_v6  ;;  %vm3561_vm4 = vcmask 1044484   ;;  %vm3563_vm5 = vcmask 1045509  }
0x170e   :  { %v4251_v41 = vpack.i.bf16 %v3913_v53, %v3912_v56  ;;  %v3588_v12 = vmul.f32 %v3912_v56, %v5278_v18  ;;  %v3589_v50 = vmul.f32 %v3913_v53, %v5287_v20 }
0x170f   :  { %v5385_v42 = vpop.xlane.xlu1 %3193  ;;  %v3191_v45 = vpop.xlane.xlu0 %3190 }
0x1710   :  { %4252 = vperm.xlu1 %4245, %v4251_v41   ;;  %vm3385_vm10 = vcmp.gt.f32.partialorder %v3369_v35, %v3191_v45 }
0x1713   :  { %v3133_v59 = vpop.xlane.xlu0 %3132  ;;  %v3136_v61 = vpop.xlane.xlu1 %3135 }
0x1714   :  { %3617 = vperm.xlu1 %4245, %v3584_v58   ;;  %v3355_v63 = vmul.f32 %v5352_v5, %v3133_v59  ;;  %v3356_v28 = vmul.f32 %v5356_v8, %v3136_v61  ;;  %v3914_v58 = vsel %vm3385_vm10, 1.0, %v4651_v6 }
0x1715   :  { %v3590_v53 = vmul.f32 %v3914_v58, %v5295_v36 }
0x1716   :  { %v3371_v39 = vadd.f32 1.0, %v3355_v63  ;;  %v3372_v13 = vadd.f32 1.0, %v3356_v28 }
0x1717   :  { %v3139_v0 = vpop.xlane.xlu0 %3138  ;;  %v3142_v2 = vpop.xlane.xlu1 %3141 }
0x1718   :  { %3623 = vperm.xlu1 %4245, %v3586_v62   ;;  %v3357_v49 = vmul.f32 %v5354_v1, %v3139_v0  ;;  %v3358_v56 = vmul.f32 %v5360_v10, %v3142_v2 }
0x171a   :  { %v3374_v45 = vadd.f32 1.0, %v3358_v56 }
0x171b   :  { %v3145_v4 = vpop.xlane.xlu0 %3144  ;;  %v3148_v43 = vpop.xlane.xlu1 %3147 }
0x171c   :  { %3626 = vperm.xlu1 %4245, %v3587_v3   ;;  %v3359_v48 = vmul.f32 %v5358_v52, %v3145_v4  ;;  %v3360_v18 = vmul.f32 %v5362_v11, %v3148_v43 }
0x171e   :  { %v3375_v51 = vadd.f32 1.0, %v3359_v48  ;;  %v3376_v24 = vadd.f32 1.0, %v3360_v18 }
0x171f   :  { %v3151_v15 = vpop.xlane.xlu0 %3150  ;;  %v3154_v14 = vpop.xlane.xlu1 %3153 }
0x1720   :  { %3629 = vperm.xlu1 %4245, %v3588_v12   ;;  %v3361_v62 = vmul.f32 %v5364_v37, %v3151_v15 }
0x1722   :  { %v3377_v4 = vadd.f32 1.0, %v3361_v62 }
0x1723   :  { %v3197_v33 = vpop.xlane.xlu0 %3196  ;;  %v3200_v57 = vpop.xlane.xlu1 %3199 }
0x1724   :  { %vm3387_vm6 = vcmp.gt.f32.partialorder %v3371_v39, %v3197_v33  ;;  %vm3388_vm7 = vcmp.gt.f32.partialorder %v3372_v13, %v3200_v57 }
0x1725   :  { %v3916_v54 = vsel %vm3387_vm6, 1.0, %v4651_v6  ;;  %v3917_v60 = vsel %vm3388_vm7, 1.0, %v4651_v6  ;;  %vm3565_vm6 = vcmask 1046534   ;;  %vm3567_vm7 = vcmask 1047559  }
0x1726   :  { %v4261_v17 = vpack.i.bf16 %v3917_v60, %v3916_v54  ;;  %v3592_v41 = vmul.f32 %v3916_v54, %v5352_v5  ;;  %v3585_v5 = vmul.f32 %v5375_v25, %v5285_v26  ;;  %v3593_v26 = vmul.f32 %v3917_v60, %v5356_v8 }
0x1727   :  { %v3203_v19 = vpop.xlane.xlu0 %3202  ;;  %v3206_v22 = vpop.xlane.xlu1 %3205 }
0x1728   :  { %4262 = vperm.xlu1 %4245, %v4261_v17   ;;  %vm3390_vm13 = vcmp.gt.f32.partialorder %v3374_v45, %v3206_v22 }
0x1729   :  { %v3919_v3 = vsel %vm3390_vm13, 1.0, %v4651_v6 }
0x172a   :  { %v3595_v28 = vmul.f32 %v3919_v3, %v5360_v10 }
0x172b   :  { %v3209_v40 = vpop.xlane.xlu0 %3208  ;;  %v3212_v29 = vpop.xlane.xlu1 %3211 }
0x172c   :  { %vm3391_vm8 = vcmp.gt.f32.partialorder %v3375_v51, %v3209_v40  ;;  %vm3392_vm9 = vcmp.gt.f32.partialorder %v3376_v24, %v3212_v29 }
0x172d   :  { %v3920_v30 = vsel %vm3391_vm8, 1.0, %v4651_v6  ;;  %v3921_v55 = vsel %vm3392_vm9, 1.0, %v4651_v6 }
0x172e   :  { %v4271_v27 = vpack.i.bf16 %v3921_v55, %v3920_v30  ;;  %v3596_v15 = vmul.f32 %v3920_v30, %v5358_v52  ;;  %v5427_v52 = vsub.s32 %v4812_v38, %v5200_v7 }
0x172f   :  { %v3215_v32 = vpop.xlane.xlu0 %3214  ;;  %v3218_v44 = vpop.xlane.xlu1 %3217 }
0x1730   :  { %4272 = vperm.xlu1 %4245, %v4271_v27   ;;  %vm3393_vm0 = vcmp.gt.f32.partialorder %v3377_v4, %v3215_v32 }
0x1731   :  { %v3922_v12 = vsel %vm3393_vm0, 1.0, %v4651_v6 }
0x1732   :  { %v3598_v39 = vmul.f32 %v3922_v12, %v5364_v37 }
0x1733   :  { %v3274_v34 = vpop.permute.xlu0 %3273  ;;  %v3330_v47 = vpop.permute.xlu1 %3329 }
0x1734   :  { %v3354_v46 = vmul.f32 %v3274_v34, %v5368_v16  ;;  %3632 = vperm.xlu1 %4245, %v3589_v50   ;;  %v3362_v59 = vmul.f32 %v3330_v47, %v3154_v14  ;;  %v3373_v16 = vadd.f32 1.0, %v3357_v49  ;;  %v3597_v14 = vmul.f32 %v3921_v55, %v5362_v11 }
0x1736   :  { %v3370_v31 = vadd.f32 1.0, %v3354_v46  ;;  %vm3389_vm12 = vcmp.gt.f32.partialorder %v3373_v16, %v3203_v19  ;;  %v3378_v0 = vadd.f32 1.0, %v3362_v59 }
0x1737   :  { %v3918_v2 = vsel %vm3389_vm12, 1.0, %v4651_v6 }
0x1738   :  { %vm3386_vm11 = vcmp.gt.f32.partialorder %v3370_v31, %v5385_v42  ;;  %3641 = vperm.xlu1 %4245, %v3592_v41   ;;  %vm3394_vm15 = vcmp.gt.f32.partialorder %v3378_v0, %v3218_v44  ;;  %v4266_v36 = vpack.i.bf16 %v3919_v3, %v3918_v2  ;;  %v3594_v25 = vmul.f32 %v3918_v2, %v5354_v1 }
0x1739   :  { %v3915_v20 = vsel %vm3386_vm11, 1.0, %v4651_v6  ;;  %v3923_v43 = vsel %vm3394_vm15, 1.0, %v4651_v6 }
0x173a   :  { %v4256_v61 = vpack.i.bf16 %v3915_v20, %v3914_v58  ;;  %v3591_v42 = vmul.f32 %v3915_v20, %v3274_v34  ;;  %v4276_v63 = vpack.i.bf16 %v3923_v43, %v3922_v12  ;;  %v3599_v6 = vmul.f32 %v3923_v43, %v3330_v47 }
0x173c   :  { %4257 = vperm.xlu0 %4239, %v4256_v61   ;;  %3635 = vperm.xlu1 %4245, %v3590_v53  }
0x1740   :  { %3620 = vperm.xlu0 %4239, %v3585_v5   ;;  %3638 = vperm.xlu1 %4245, %v3591_v42  }
0x1744   :  { %4267 = vperm.xlu0 %4239, %v4266_v36  }
0x1748   :  { %4277 = vperm.xlu0 %4239, %v4276_v63  }
0x174c   :  { %3644 = vperm.xlu0 %4239, %v3593_v26  }
0x1750   :  { %3647 = vperm.xlu0 %4239, %v3594_v25  }
0x1754   :  { %3650 = vperm.xlu0 %4239, %v3595_v28  }
0x1758   :  { %3653 = vperm.xlu0 %4239, %v3596_v15  }
0x175c   :  { %3656 = vperm.xlu0 %4239, %v3597_v14  }
0x1760   :  { %3659 = vperm.xlu0 %4239, %v3598_v39  }
0x1764   :  { %3662 = vperm.xlu0 %4239, %v3599_v6  }
0x1783   :  { %v4242_v10 = vpop.permute.xlu0 %4241 }
0x1784   :  { %v4244_v11 = vunpack.i.h.bf16 %v4242_v10  ;;  %v4243_v48 = vunpack.i.l.bf16 %v4242_v10 }
0x1786   :  { %v3498_v17 = vrot.slane %v4244_v11, %v5427_v52  ;;  %v3494_v19 = vrot.slane %v4243_v48, %v5427_v52 }
0x1787   :  { %v4248_v13 = vpop.permute.xlu1 %4247 }
0x1788   :  { %v4249_v18 = vunpack.i.l.bf16 %v4248_v13  ;;  %v4250_v22 = vunpack.i.h.bf16 %v4248_v13  ;;  %v3556_v40 = vsel %vm3555_vm1, %v3498_v17, %v3494_v19 }
0x178a   :  { %v3502_v51 = vrot.slane %v4249_v18, %v5427_v52  ;;  %v3506_v38 = vrot.slane %v4250_v22, %v5427_v52 }
0x178b   :  { %v4253_v8 = vpop.permute.xlu1 %4252 }
0x178c   :  { %v4254_v24 = vunpack.i.l.bf16 %v4253_v8  ;;  %v4255_v7 = vunpack.i.h.bf16 %v4253_v8  ;;  %v3558_v29 = vsel %vm3557_vm2, %v3502_v51, %v3556_v40 }
0x178d   :  { %v3560_v23 = vsel %vm3559_vm3, %v3506_v38, %v3558_v29 }
0x178e   :  { %v3510_v30 = vrot.slane %v4254_v24, %v5427_v52  ;;  %v3514_v27 = vrot.slane %v4255_v7, %v5427_v52 }
0x178f   :  { %v3618_v33 = vpop.permute.xlu1 %3617 }
0x1790   :  { %v3562_v44 = vsel %vm3561_vm4, %v3510_v30, %v3560_v23  ;;  %v3667_v58 = vrot.slane %v3618_v33, %v5427_v52 }
0x1791   :  { %v3564_v31 = vsel %vm3563_vm5, %v3514_v27, %v3562_v44 }
0x1793   :  { %v3624_v57 = vpop.permute.xlu1 %3623 }
0x1794   :  { %v3675_v53 = vrot.slane %v3624_v57, %v5427_v52 }
0x1797   :  { %v3627_v1 = vpop.permute.xlu1 %3626 }
0x1798   :  { %v3679_v45 = vrot.slane %v3627_v1, %v5427_v52 }
0x179b   :  { %v5423_v54 = vpop.permute.xlu1 %3629 }
0x179c   :  { %v3683_v0 = vrot.slane %v5423_v54, %v5427_v52 }
0x17a3   :  { %v4263_v60 = vpop.permute.xlu1 %4262 }
0x17a4   :  { %v4265_v49 = vunpack.i.h.bf16 %v4263_v60  ;;  %v4264_v56 = vunpack.i.l.bf16 %v4263_v60 }
0x17a6   :  { %v3530_v5 = vrot.slane %v4265_v49, %v5427_v52  ;;  %v3526_v42 = vrot.slane %v4264_v56, %v5427_v52 }
0x17a8   :  { %v3569_v14 = vsel %vm3555_vm1, %v3530_v5, %v3526_v42 }
0x17ab   :  { %v5429_v37 = vpop.permute.xlu1 %4272 }
0x17ac   :  { %v4274_v4 = vunpack.i.l.bf16 %v5429_v37  ;;  %v4275_v26 = vunpack.i.h.bf16 %v5429_v37 }
0x17ae   :  { %v3542_v13 = vrot.slane %v4274_v4, %v5427_v52  ;;  %v3546_v1 = vrot.slane %v4275_v26, %v5427_v52 }
0x17af   :  { %v3633_v55 = vpop.permute.xlu1 %3632 }
0x17b0   :  { %v3687_v39 = vrot.slane %v3633_v55, %v5427_v52 }
0x17b3   :  { %v5441_v34 = vpop.permute.xlu1 %3641 }
0x17b7   :  { %v4258_v32 = vpop.permute.xlu0 %4257  ;;  %v3636_v36 = vpop.permute.xlu1 %3635 }
0x17b8   :  { %v4260_v35 = vunpack.i.h.bf16 %v4258_v32  ;;  %v4259_v50 = vunpack.i.l.bf16 %v4258_v32  ;;  %v3691_v60 = vrot.slane %v3636_v36, %v5427_v52 }
0x17ba   :  { %v3522_v46 = vrot.slane %v4260_v35, %v5427_v52  ;;  %v3518_v47 = vrot.slane %v4259_v50, %v5427_v52  ;;  %v3699_v35 = vrot.slane %v5441_v34, %v5427_v52 }
0x17bb   :  { %v3621_v41 = vpop.permute.xlu0 %3620  ;;  %v3639_v11 = vpop.permute.xlu1 %3638 }
0x17bc   :  { %v3671_v59 = vrot.slane %v3621_v41, %v5427_v52  ;;  %v3566_v20 = vsel %vm3565_vm6, %v3518_v47, %v3564_v31  ;;  %v3695_v24 = vrot.slane %v3639_v11, %v5427_v52 }
0x17bd   :  { %v3568_v16 = vsel %vm3567_vm7, %v3522_v46, %v3566_v20 }
0x17be   :  { %v3728_v61 = vsel %vm3555_vm1, %v3671_v59, %v3667_v58  ;;  %v3578_v62 = vsel %vm3106_vm14, %v3568_v16, 0.0 }
0x17bf   :  { %v3729_v2 = vsel %vm3557_vm2, %v3675_v53, %v3728_v61  ;;  %v4268_v3 = vpop.permute.xlu0 %4267  ;;  %3579 = vadd.xlane.f32.xlu1 %v3578_v62 }
0x17c0   :  { %v3730_v43 = vsel %vm3559_vm3, %v3679_v45, %v3729_v2  ;;  %v4270_v12 = vunpack.i.h.bf16 %v4268_v3  ;;  %v4269_v63 = vunpack.i.l.bf16 %v4268_v3 }
0x17c1   :  { %v3731_v15 = vsel %vm3561_vm4, %v3683_v0, %v3730_v43 }
0x17c2   :  { %v3538_v25 = vrot.slane %v4270_v12, %v5427_v52  ;;  %v3534_v28 = vrot.slane %v4269_v63, %v5427_v52  ;;  %v3732_v10 = vsel %vm3563_vm5, %v3687_v39, %v3731_v15 }
0x17c3   :  { %v4278_v6 = vpop.permute.xlu0 %4277  ;;  %v3733_v51 = vsel %vm3565_vm6, %v3691_v60, %v3732_v10 }
0x17c4   :  { %v3570_v8 = vsel %vm3557_vm2, %v3534_v28, %v3569_v14  ;;  %v4280_v33 = vunpack.i.h.bf16 %v4278_v6  ;;  %v4279_v57 = vunpack.i.l.bf16 %v4278_v6  ;;  %v3734_v29 = vsel %vm3567_vm7, %v3695_v24, %v3733_v51 }
0x17c5   :  { %v3571_v54 = vsel %vm3559_vm3, %v3538_v25, %v3570_v8  ;;  %v3744_v30 = vsel %vm3106_vm14, %v3734_v29, 0.0 }
0x17c6   :  { %v3554_v48 = vrot.slane %v4280_v33, %v5427_v52  ;;  %v3550_v18 = vrot.slane %v4279_v57, %v5427_v52  ;;  %v3572_v37 = vsel %vm3561_vm4, %v3542_v13, %v3571_v54 }
0x17c7   :  { %v3645_v17 = vpop.permute.xlu0 %3644  ;;  %v3573_v19 = vsel %vm3563_vm5, %v3546_v1, %v3572_v37 }
0x17c8   :  { %v3574_v22 = vsel %vm3565_vm6, %v3550_v18, %v3573_v19  ;;  %v3703_v32 = vrot.slane %v3645_v17, %v5427_v52 }
0x17c9   :  { %v3575_v40 = vsel %vm3567_vm7, %v3554_v48, %v3574_v22 }
0x17ca   :  { %v3581_v38 = vsel %vm3106_vm14, %v3575_v40, 0.0  ;;  %v3735_v49 = vsel %vm3555_vm1, %v3703_v32, %v3699_v35 }
0x17cb   :  { %v3648_v7 = vpop.permute.xlu0 %3647  ;;  %3582 = vadd.xlane.f32.xlu0 %v3581_v38 }
0x17cc   :  { %v3707_v44 = vrot.slane %v3648_v7, %v5427_v52 }
0x17ce   :  { %v3736_v41 = vsel %vm3557_vm2, %v3707_v44, %v3735_v49 }
0x17cf   :  { %v3651_v55 = vpop.permute.xlu0 %3650  ;;  %3745 = vadd.xlane.f32.xlu0 %v3744_v30 }
0x17d0   :  { %v3711_v50 = vrot.slane %v3651_v55, %v5427_v52 }
0x17d2   :  { %v3737_v58 = vsel %vm3559_vm3, %v3711_v50, %v3736_v41 }
0x17d3   :  { %v3654_v23 = vpop.permute.xlu0 %3653 }
0x17d4   :  { %v3715_v46 = vrot.slane %v3654_v23, %v5427_v52 }
0x17d6   :  { %v3738_v59 = vsel %vm3561_vm4, %v3715_v46, %v3737_v58 }
0x17d7   :  { %v3657_v27 = vpop.permute.xlu0 %3656 }
0x17d8   :  { %v3719_v56 = vrot.slane %v3657_v27, %v5427_v52 }
0x17da   :  { %v3739_v34 = vsel %vm3563_vm5, %v3719_v56, %v3738_v59 }
0x17db   :  { %v3660_v47 = vpop.permute.xlu0 %3659 }
0x17dc   :  { %v3723_v31 = vrot.slane %v3660_v47, %v5427_v52 }
0x17de   :  { %v3740_v16 = vsel %vm3565_vm6, %v3723_v31, %v3739_v34 }
0x17df   :  { %v3663_v20 = vpop.permute.xlu0 %3662 }
0x17e0   :  { %v3727_v53 = vrot.slane %v3663_v20, %v5427_v52 }
0x17e2   :  { %v3741_v45 = vsel %vm3567_vm7, %v3727_v53, %v3740_v16 }
0x17e3   :  { %v3747_v61 = vsel %vm3106_vm14, %v3741_v45, 0.0 }
0x17e4   :  { %3748 = vadd.xlane.f32.xlu0 %v3747_v61 }
0x1848   :  { %v3580_v62 = vpop.xlane.xlu1 %3579 }
0x1849   :  { %4395 = vrcp.f32 %v3580_v62 }
0x1854   :  { %v3583_v0 = vpop.xlane.xlu0 %3582 }
0x1855   :  { %4397 = vrcp.f32 %v3583_v0 }
0x1856   :  { %v4396_v2 = vpop.eup %4395 }
0x1858   :  { %v3746_v5 = vpop.xlane.xlu0 %3745 }
0x1859   :  { %v3924_v42 = vadd.f32 -1.0, %v3746_v5 }
0x185b   :  { %v3753_v3 = vmul.f32 %v4396_v2, %v3924_v42 }
0x185d   :  { %v3756_v4 = vsub.f32 %v5209_v9, %v3753_v3 }
0x185f   :  { %v3758_v36 = vmax.f32 %v3756_v4, 0.0 }
0x1861   :  { %3760 = vst [vmem:[#allocation19] sm:$0xff] %v3758_v36 }
0x1862   :  { %v4398_v12 = vpop.eup %4397 }
0x186d   :  { %v3749_v52 = vpop.xlane.xlu0 %3748 }
0x186e   :  { %v3925_v43 = vadd.f32 -1.0, %v3749_v52 }
0x1870   :  { %v3755_v63 = vmul.f32 %v4398_v12, %v3925_v43 }
0x1872   :  { %v3757_v26 = vsub.f32 %v5229_v21, %v3755_v63 }
0x1874   :  { %v3759_v25 = vmax.f32 %v3757_v26, 0.0 }
0x1876   :  { %3761 = vst [vmem:[#allocation19 + $0x8] sm:$0xff] %v3759_v25 }
0x1877   :  { %4612 = shalt.err (!%p4609_p12)
}
0x1878   :  { %3773 = dma.vmem_to_hbm [thread:$0]  %s3768_s29, 256, %s5527_s18, [#allocation4], %s4636_s30, %s4636_s30, %s4637_s0  }
0x1879   :  { %4633 = dma.done.wait [#allocation4], 256  }
0x187a   :  { %4634 = vsyncadd [#allocation4], 4294967040 }
0x187b   :  { %3777 = vsyncpa [#allocation3], 1 }
0x187c   :  { %3778 = vsyncpa [#allocation6], 1 }
0x187d   :  { %3779 = vsyncpa [#allocation9], 1 }
0x187e   :  { %3780 = vsyncpa [#allocation12], 1 }
0x187f   :  { %3781 = vsyncpa [#allocation15], 1 }
0x1880   :  { %3782 = vsyncpa [#allocation18], 1 }
0x1881   :  { %3783 = vsyncpa [#allocation4], 1 }

</bundles_post_ra>
